<compile_context>
chip_gen: v7x
topology: tpu7x:2x2x1
jax: 0.10.0
libtpu: 0.0.40
codegen_flags: <defaults>
</compile_context>

<pallas_src>
import functools

import jax
import jax.numpy as jnp
from jax.experimental import pallas as pl
from jax.experimental.pallas import tpu as pltpu


# ---------------------------------------------------------------------------
# Fused Bottleneck kernel. One grid step = one image, flattened to (H*W, C)
# rows in NHWC order.
# ---------------------------------------------------------------------------
def _bottleneck_kernel(x_ref, w1_ref, b1_ref, w2_ref, b2_ref,
                       lmask_ref, rmask_ref, o_ref,
                       xpad_ref, y1p_ref, *, width, pad, add):
    hw, c1 = x_ref.shape
    c_mid = b1_ref.shape[-1]
    c_out = o_ref.shape[-1]

    def conv3x3(src_ref, w_ref, cin, cout):
        # "same" 3x3 conv on the flattened image:
        #   y[p] += x[p + (kh-1)*W + (kw-1)] @ w[kh, kw]
        # src_ref is the zero-row-padded flattened image in VMEM; top/bottom
        # out-of-image reads land in the zero rows, left/right wrap-around of
        # the kw==0 / kw==2 taps is zeroed by the (H*W, 1) masks.
        acc = jnp.zeros((hw, cout), jnp.float32)
        for kh in range(3):
            for kw in range(3):
                shift = (kh - 1) * width + (kw - 1)
                slab = src_ref[pl.ds(pad + shift, hw), :]
                if kw == 0:
                    slab = slab * lmask_ref[...]
                elif kw == 2:
                    slab = slab * rmask_ref[...]
                w_tap = w_ref[pl.ds((kh * 3 + kw) * cin, cin), :]
                acc = acc + jnp.dot(slab, w_tap,
                                    preferred_element_type=jnp.float32)
        return acc

    # ---- cv1: conv + folded-BN bias + SiLU (BN scale pre-folded into w1) ----
    xpad_ref[...] = jnp.zeros_like(xpad_ref)
    xpad_ref[pl.ds(pad, hw), :] = x_ref[...]
    y1 = conv3x3(xpad_ref, w1_ref, c1, c_mid) + b1_ref[...]
    y1 = y1 * jax.nn.sigmoid(y1)                        # SiLU

    # y1 never leaves VMEM: stash it (zero-padded, bf16) for cv2.
    y1p_ref[...] = jnp.zeros_like(y1p_ref)
    y1p_ref[pl.ds(pad, hw), :] = y1.astype(y1p_ref.dtype)

    # ---- cv2 + residual shortcut --------------------------------------------
    y2 = conv3x3(y1p_ref, w2_ref, c_mid, c_out) + b2_ref[...]
    y2 = y2 * jax.nn.sigmoid(y2)
    if add:
        y2 = y2 + x_ref[...].astype(jnp.float32)
    # TODO(synk): for c2 < 128 this store is lane-sparse; realistic YOLO widths
    # (c2 >= 128) make the output block lane-dense automatically.
    o_ref[...] = y2.astype(o_ref.dtype)


# ---------------------------------------------------------------------------
# Wrapper: BN folding, bf16 casts, layout plumbing, pallas_call.
# ---------------------------------------------------------------------------
def fold_bn(gamma, beta, mean, var, eps=1e-3):
    scale = gamma / jnp.sqrt(var + eps)
    bias = beta - mean * scale
    return scale, bias


def bottleneck_forward(x_nhwc, params, shortcut=True):
    N, H, W, C1 = x_nhwc.shape
    w1, w2 = params["w1"], params["w2"]                 # (3,3,Cin,Cout) HWIO f32
    c_mid, c_out = w1.shape[-1], w2.shape[-1]
    add = bool(shortcut and (C1 == c_out))

    # Fold the BatchNorm scale into the conv weights; keep the bias separate.
    s1, b1 = fold_bn(*params["bn1"])
    s2, b2 = fold_bn(*params["bn2"])
    w1f = (w1 * s1[None, None, None, :]).astype(jnp.bfloat16)
    w2f = (w2 * s2[None, None, None, :]).astype(jnp.bfloat16)

    HW = H * W
    pad = ((W + 1 + 15) // 16) * 16                     # >= W+1, sublane aligned

    x_bf = x_nhwc.astype(jnp.bfloat16).reshape(N, HW, C1)
    w1m = w1f.reshape(9 * C1, c_mid)
    w2m = w2f.reshape(9 * c_mid, c_out)
    b1 = b1.reshape(1, c_mid).astype(jnp.float32)
    b2 = b2.reshape(1, c_out).astype(jnp.float32)

    # masks killing left/right edge wrap-around of the flattened-row shifts
    col = (jnp.arange(HW, dtype=jnp.int32) % W).reshape(HW, 1)
    lmask = (col != 0).astype(jnp.bfloat16)
    rmask = (col != (W - 1)).astype(jnp.bfloat16)

    kernel = functools.partial(_bottleneck_kernel, width=W, pad=pad, add=add)

    out = pl.pallas_call(
        kernel,
        out_shape=jax.ShapeDtypeStruct((N, HW, c_out), jnp.float32),
        grid_spec=pltpu.PrefetchScalarGridSpec(
            num_scalar_prefetch=0,
            grid=(N,),
            in_specs=[
                pl.BlockSpec((None, HW, C1), lambda n: (n, 0, 0)),     # x (bf16)
                pl.BlockSpec((9 * C1, c_mid), lambda n: (0, 0)),       # w1 (folded, bf16)
                pl.BlockSpec((1, c_mid), lambda n: (0, 0)),            # bias1 (f32)
                pl.BlockSpec((9 * c_mid, c_out), lambda n: (0, 0)),    # w2 (folded, bf16)
                pl.BlockSpec((1, c_out), lambda n: (0, 0)),            # bias2 (f32)
                pl.BlockSpec((HW, 1), lambda n: (0, 0)),               # left-edge mask
                pl.BlockSpec((HW, 1), lambda n: (0, 0)),               # right-edge mask
            ],
            out_specs=pl.BlockSpec((None, HW, c_out), lambda n: (n, 0, 0)),
            scratch_shapes=[
                pltpu.VMEM((HW + 2 * pad, C1), jnp.bfloat16),          # zero-padded x
                pltpu.VMEM((HW + 2 * pad, c_mid), jnp.bfloat16),       # zero-padded y1
            ],
        ),
        compiler_params=pltpu.CompilerParams(
            dimension_semantics=("parallel",),
            vmem_limit_bytes=32 * 1024 * 1024,
        ),
    )(x_bf, w1m, b1, w2m, b2, lmask, rmask)
    return out.reshape(N, H, W, c_out)


# ---------------------------------------------------------------------------
# Parameter init (HWIO conv weights, BatchNorm inference stats, eps=1e-3).
# ---------------------------------------------------------------------------
def init_bottleneck_params(key, c1, c2, e=0.5):
    c_ = int(c2 * e)
    ks = jax.random.split(key, 10)
    w1 = 0.1 * jax.random.normal(ks[0], (3, 3, c1, c_), jnp.float32)
    w2 = 0.1 * jax.random.normal(ks[1], (3, 3, c_, c2), jnp.float32)
    g1 = 1.0 + 0.1 * jax.random.normal(ks[2], (c_,), jnp.float32)
    b1 = 0.1 * jax.random.normal(ks[3], (c_,), jnp.float32)
    m1 = 0.1 * jax.random.normal(ks[4], (c_,), jnp.float32)
    v1 = 1.0 + 0.1 * jax.random.uniform(ks[5], (c_,), jnp.float32)
    g2 = 1.0 + 0.1 * jax.random.normal(ks[6], (c2,), jnp.float32)
    b2 = 0.1 * jax.random.normal(ks[7], (c2,), jnp.float32)
    m2 = 0.1 * jax.random.normal(ks[8], (c2,), jnp.float32)
    v2 = 1.0 + 0.1 * jax.random.uniform(ks[9], (c2,), jnp.float32)
    return dict(w1=w1, w2=w2, bn1=(g1, b1, m1, v1), bn2=(g2, b2, m2, v2))


# ---------------------------------------------------------------------------
# Pure-JAX reference (lax.conv) using the SAME deployment numerics as the
# kernel: BN scale folded into bf16 weights, bf16 inputs, bf16 y1 between the
# two convs, f32 accumulation/elementwise — so the check isolates kernel logic.
# ---------------------------------------------------------------------------
def _ref_conv_silu(x, w, bias):
    y = jax.lax.conv_general_dilated(
        x, w, window_strides=(1, 1), padding="SAME",
        dimension_numbers=("NHWC", "HWIO", "NHWC"),
        preferred_element_type=jnp.float32)
    y = y + bias.reshape(1, 1, 1, -1)
    return y * jax.nn.sigmoid(y)


def bottleneck_ref(x_nhwc, params, shortcut=True):
    s1, b1 = fold_bn(*params["bn1"])
    s2, b2 = fold_bn(*params["bn2"])
    w1f = (params["w1"] * s1[None, None, None, :]).astype(jnp.bfloat16).astype(jnp.float32)
    w2f = (params["w2"] * s2[None, None, None, :]).astype(jnp.bfloat16).astype(jnp.float32)
    x = x_nhwc.astype(jnp.bfloat16).astype(jnp.float32)
    y = _ref_conv_silu(x, w1f, b1)
    y = y.astype(jnp.bfloat16).astype(jnp.float32)      # kernel keeps y1 in bf16 VMEM
    y = _ref_conv_silu(y, w2f, b2)
    if shortcut and x.shape[-1] == y.shape[-1]:
        y = y + x
    return y


if __name__ == "__main__":
    # PyTorch-style input [N, C, H, W] = [2, 8, 16, 16]; Bottleneck(c1=8, c2=8, e=0.5).
    N, C1, C2, H, W = 2, 8, 8, 16, 16
    key = jax.random.PRNGKey(0)
    kx, kp = jax.random.split(key)

    x_nchw = jax.random.normal(kx, (N, C1, H, W), jnp.float32)   # PyTorch layout
    x_nhwc = jnp.transpose(x_nchw, (0, 2, 3, 1))                 # kernel layout

    params = init_bottleneck_params(kp, C1, C2, e=0.5)

    out = jax.block_until_ready(bottleneck_forward(x_nhwc, params, shortcut=True))
    ref = jax.block_until_ready(bottleneck_ref(x_nhwc, params, shortcut=True))

    assert out.shape == (N, H, W, C2)
    max_err = float(jnp.max(jnp.abs(out - ref)))
    # bf16 operands/activations (f32 accumulation): allow ~1e-2 vs. the
    # bf16-consistent f32 reference (covers rare one-ulp y1 rounding splits).
    assert jnp.allclose(out, ref, rtol=1e-2, atol=1e-2), max_err

    print("KERNEL_OK")
</pallas_src>

<mosaic_0001>
module attributes {stable_mosaic.version = 11 : i64} {
  func.func @_bottleneck_kernel(%arg0: i32, %arg1: memref<1x256x8xbf16, #tpu.memory_space<vmem>>, %arg2: memref<72x4xbf16, #tpu.memory_space<vmem>>, %arg3: memref<1x4xf32, #tpu.memory_space<vmem>>, %arg4: memref<36x8xbf16, #tpu.memory_space<vmem>>, %arg5: memref<1x8xf32, #tpu.memory_space<vmem>>, %arg6: memref<256x1xbf16, #tpu.memory_space<vmem>>, %arg7: memref<256x1xbf16, #tpu.memory_space<vmem>>, %arg8: memref<1x256x8xf32, #tpu.memory_space<vmem>>, %arg9: memref<320x8xbf16, #tpu.memory_space<vmem>>, %arg10: memref<320x4xbf16, #tpu.memory_space<vmem>>) attributes {dimension_semantics = [#tpu.dimension_semantics<parallel>], iteration_bounds = array<i64: 2>, scalar_prefetch = 0 : i64, scratch_operands = 2 : i64, tpu.core_type = #tpu.core_type<tc>, window_params = [{transform_indices = @transform_0, window_bounds = array<i64: 1, 256, 8>}, {pipeline_mode = #tpu.pipeline_mode<synchronous>, transform_indices = @transform_1, window_bounds = array<i64: 72, 4>}, {pipeline_mode = #tpu.pipeline_mode<synchronous>, transform_indices = @transform_2, window_bounds = array<i64: 1, 4>}, {pipeline_mode = #tpu.pipeline_mode<synchronous>, transform_indices = @transform_3, window_bounds = array<i64: 36, 8>}, {pipeline_mode = #tpu.pipeline_mode<synchronous>, transform_indices = @transform_4, window_bounds = array<i64: 1, 8>}, {pipeline_mode = #tpu.pipeline_mode<synchronous>, transform_indices = @transform_5, window_bounds = array<i64: 256, 1>}, {pipeline_mode = #tpu.pipeline_mode<synchronous>, transform_indices = @transform_6, window_bounds = array<i64: 256, 1>}, {transform_indices = @transform_7, window_bounds = array<i64: 1, 256, 8>}]} {
    %cst = arith.constant 0.000000e+00 : bf16
    %0 = vector.broadcast %cst : bf16 to vector<320x8xbf16>
    %c0 = arith.constant 0 : index
    %c0_0 = arith.constant 0 : index
    %1 = vector.load %arg9[%c0, %c0_0] : memref<320x8xbf16, #tpu.memory_space<vmem>>, vector<320x8xbf16>
    tpu.vector_store %arg9[%c0, %c0_0], %0 {strides = array<i32>} : memref<320x8xbf16, #tpu.memory_space<vmem>>, vector<320x8xbf16>,
    %c0_1 = arith.constant 0 : index
    %c0_2 = arith.constant 0 : index
    %c0_3 = arith.constant 0 : index
    %2 = vector.load %arg1[%c0_1, %c0_2, %c0_3] : memref<1x256x8xbf16, #tpu.memory_space<vmem>>, vector<1x256x8xbf16>
    %3 = vector.shape_cast %2 : vector<1x256x8xbf16> to vector<256x8xbf16>
    %c32 = arith.constant 32 : index
    %c0_4 = arith.constant 0 : index
    %4 = vector.load %arg9[%c32, %c0_4] : memref<320x8xbf16, #tpu.memory_space<vmem>>, vector<256x8xbf16>
    tpu.vector_store %arg9[%c32, %c0_4], %3 {strides = array<i32>} : memref<320x8xbf16, #tpu.memory_space<vmem>>, vector<256x8xbf16>,
    %cst_5 = arith.constant 0.000000e+00 : f32
    %5 = vector.broadcast %cst_5 : f32 to vector<256x4xf32>
    %c15 = arith.constant 15 : index
    %c0_6 = arith.constant 0 : index
    %6 = vector.load %arg9[%c15, %c0_6] : memref<320x8xbf16, #tpu.memory_space<vmem>>, vector<256x8xbf16>
    %c0_7 = arith.constant 0 : index
    %c0_8 = arith.constant 0 : index
    %7 = vector.load %arg6[%c0_7, %c0_8] : memref<256x1xbf16, #tpu.memory_space<vmem>>, vector<256x1xbf16>
    %8 = vector.broadcast %7 : vector<256x1xbf16> to vector<256x8xbf16>
    %9 = arith.mulf %6, %8 : vector<256x8xbf16>
    %c0_9 = arith.constant 0 : index
    %c0_10 = arith.constant 0 : index
    %10 = vector.load %arg2[%c0_9, %c0_10] : memref<72x4xbf16, #tpu.memory_space<vmem>>, vector<8x4xbf16>
    %cst_11 = arith.constant dense<0.000000e+00> : vector<256x4xf32>
    %11 = tpu.matmul %9, %10, %cst_11 {dimension_numbers = #tpu.dot_dimension_numbers<[1], [0], [0], [1], [0, 0, 1, 1], [], []>} : vector<256x8xbf16>, vector<8x4xbf16>, vector<256x4xf32> -> vector<256x4xf32>
    %12 = arith.addf %5, %11 : vector<256x4xf32>
    %c16 = arith.constant 16 : index
    %c0_12 = arith.constant 0 : index
    %13 = vector.load %arg9[%c16, %c0_12] : memref<320x8xbf16, #tpu.memory_space<vmem>>, vector<256x8xbf16>
    %c8 = arith.constant 8 : index
    %c0_13 = arith.constant 0 : index
    %14 = vector.load %arg2[%c8, %c0_13] : memref<72x4xbf16, #tpu.memory_space<vmem>>, vector<8x4xbf16>
    %cst_14 = arith.constant dense<0.000000e+00> : vector<256x4xf32>
    %15 = tpu.matmul %13, %14, %cst_14 {dimension_numbers = #tpu.dot_dimension_numbers<[1], [0], [0], [1], [0, 0, 1, 1], [], []>} : vector<256x8xbf16>, vector<8x4xbf16>, vector<256x4xf32> -> vector<256x4xf32>
    %16 = arith.addf %12, %15 : vector<256x4xf32>
    %c17 = arith.constant 17 : index
    %c0_15 = arith.constant 0 : index
    %17 = vector.load %arg9[%c17, %c0_15] : memref<320x8xbf16, #tpu.memory_space<vmem>>, vector<256x8xbf16>
    %c0_16 = arith.constant 0 : index
    %c0_17 = arith.constant 0 : index
    %18 = vector.load %arg7[%c0_16, %c0_17] : memref<256x1xbf16, #tpu.memory_space<vmem>>, vector<256x1xbf16>
    %19 = vector.broadcast %18 : vector<256x1xbf16> to vector<256x8xbf16>
    %20 = arith.mulf %17, %19 : vector<256x8xbf16>
    %c16_18 = arith.constant 16 : index
    %c0_19 = arith.constant 0 : index
    %21 = vector.load %arg2[%c16_18, %c0_19] : memref<72x4xbf16, #tpu.memory_space<vmem>>, vector<8x4xbf16>
    %cst_20 = arith.constant dense<0.000000e+00> : vector<256x4xf32>
    %22 = tpu.matmul %20, %21, %cst_20 {dimension_numbers = #tpu.dot_dimension_numbers<[1], [0], [0], [1], [0, 0, 1, 1], [], []>} : vector<256x8xbf16>, vector<8x4xbf16>, vector<256x4xf32> -> vector<256x4xf32>
    %23 = arith.addf %16, %22 : vector<256x4xf32>
    %c31 = arith.constant 31 : index
    %c0_21 = arith.constant 0 : index
    %24 = vector.load %arg9[%c31, %c0_21] : memref<320x8xbf16, #tpu.memory_space<vmem>>, vector<256x8xbf16>
    %c0_22 = arith.constant 0 : index
    %c0_23 = arith.constant 0 : index
    %25 = vector.load %arg6[%c0_22, %c0_23] : memref<256x1xbf16, #tpu.memory_space<vmem>>, vector<256x1xbf16>
    %26 = vector.broadcast %25 : vector<256x1xbf16> to vector<256x8xbf16>
    %27 = arith.mulf %24, %26 : vector<256x8xbf16>
    %c24 = arith.constant 24 : index
    %c0_24 = arith.constant 0 : index
    %28 = vector.load %arg2[%c24, %c0_24] : memref<72x4xbf16, #tpu.memory_space<vmem>>, vector<8x4xbf16>
    %cst_25 = arith.constant dense<0.000000e+00> : vector<256x4xf32>
    %29 = tpu.matmul %27, %28, %cst_25 {dimension_numbers = #tpu.dot_dimension_numbers<[1], [0], [0], [1], [0, 0, 1, 1], [], []>} : vector<256x8xbf16>, vector<8x4xbf16>, vector<256x4xf32> -> vector<256x4xf32>
    %30 = arith.addf %23, %29 : vector<256x4xf32>
    %c32_26 = arith.constant 32 : index
    %c0_27 = arith.constant 0 : index
    %31 = vector.load %arg9[%c32_26, %c0_27] : memref<320x8xbf16, #tpu.memory_space<vmem>>, vector<256x8xbf16>
    %c32_28 = arith.constant 32 : index
    %c0_29 = arith.constant 0 : index
    %32 = vector.load %arg2[%c32_28, %c0_29] : memref<72x4xbf16, #tpu.memory_space<vmem>>, vector<8x4xbf16>
    %cst_30 = arith.constant dense<0.000000e+00> : vector<256x4xf32>
    %33 = tpu.matmul %31, %32, %cst_30 {dimension_numbers = #tpu.dot_dimension_numbers<[1], [0], [0], [1], [0, 0, 1, 1], [], []>} : vector<256x8xbf16>, vector<8x4xbf16>, vector<256x4xf32> -> vector<256x4xf32>
    %34 = arith.addf %30, %33 : vector<256x4xf32>
    %c33 = arith.constant 33 : index
    %c0_31 = arith.constant 0 : index
    %35 = vector.load %arg9[%c33, %c0_31] : memref<320x8xbf16, #tpu.memory_space<vmem>>, vector<256x8xbf16>
    %c0_32 = arith.constant 0 : index
    %c0_33 = arith.constant 0 : index
    %36 = vector.load %arg7[%c0_32, %c0_33] : memref<256x1xbf16, #tpu.memory_space<vmem>>, vector<256x1xbf16>
    %37 = vector.broadcast %36 : vector<256x1xbf16> to vector<256x8xbf16>
    %38 = arith.mulf %35, %37 : vector<256x8xbf16>
    %c40 = arith.constant 40 : index
    %c0_34 = arith.constant 0 : index
    %39 = vector.load %arg2[%c40, %c0_34] : memref<72x4xbf16, #tpu.memory_space<vmem>>, vector<8x4xbf16>
    %cst_35 = arith.constant dense<0.000000e+00> : vector<256x4xf32>
    %40 = tpu.matmul %38, %39, %cst_35 {dimension_numbers = #tpu.dot_dimension_numbers<[1], [0], [0], [1], [0, 0, 1, 1], [], []>} : vector<256x8xbf16>, vector<8x4xbf16>, vector<256x4xf32> -> vector<256x4xf32>
    %41 = arith.addf %34, %40 : vector<256x4xf32>
    %c47 = arith.constant 47 : index
    %c0_36 = arith.constant 0 : index
    %42 = vector.load %arg9[%c47, %c0_36] : memref<320x8xbf16, #tpu.memory_space<vmem>>, vector<256x8xbf16>
    %c0_37 = arith.constant 0 : index
    %c0_38 = arith.constant 0 : index
    %43 = vector.load %arg6[%c0_37, %c0_38] : memref<256x1xbf16, #tpu.memory_space<vmem>>, vector<256x1xbf16>
    %44 = vector.broadcast %43 : vector<256x1xbf16> to vector<256x8xbf16>
    %45 = arith.mulf %42, %44 : vector<256x8xbf16>
    %c48 = arith.constant 48 : index
    %c0_39 = arith.constant 0 : index
    %46 = vector.load %arg2[%c48, %c0_39] : memref<72x4xbf16, #tpu.memory_space<vmem>>, vector<8x4xbf16>
    %cst_40 = arith.constant dense<0.000000e+00> : vector<256x4xf32>
    %47 = tpu.matmul %45, %46, %cst_40 {dimension_numbers = #tpu.dot_dimension_numbers<[1], [0], [0], [1], [0, 0, 1, 1], [], []>} : vector<256x8xbf16>, vector<8x4xbf16>, vector<256x4xf32> -> vector<256x4xf32>
    %48 = arith.addf %41, %47 : vector<256x4xf32>
    %c48_41 = arith.constant 48 : index
    %c0_42 = arith.constant 0 : index
    %49 = vector.load %arg9[%c48_41, %c0_42] : memref<320x8xbf16, #tpu.memory_space<vmem>>, vector<256x8xbf16>
    %c56 = arith.constant 56 : index
    %c0_43 = arith.constant 0 : index
    %50 = vector.load %arg2[%c56, %c0_43] : memref<72x4xbf16, #tpu.memory_space<vmem>>, vector<8x4xbf16>
    %cst_44 = arith.constant dense<0.000000e+00> : vector<256x4xf32>
    %51 = tpu.matmul %49, %50, %cst_44 {dimension_numbers = #tpu.dot_dimension_numbers<[1], [0], [0], [1], [0, 0, 1, 1], [], []>} : vector<256x8xbf16>, vector<8x4xbf16>, vector<256x4xf32> -> vector<256x4xf32>
    %52 = arith.addf %48, %51 : vector<256x4xf32>
    %c49 = arith.constant 49 : index
    %c0_45 = arith.constant 0 : index
    %53 = vector.load %arg9[%c49, %c0_45] : memref<320x8xbf16, #tpu.memory_space<vmem>>, vector<256x8xbf16>
    %c0_46 = arith.constant 0 : index
    %c0_47 = arith.constant 0 : index
    %54 = vector.load %arg7[%c0_46, %c0_47] : memref<256x1xbf16, #tpu.memory_space<vmem>>, vector<256x1xbf16>
    %55 = vector.broadcast %54 : vector<256x1xbf16> to vector<256x8xbf16>
    %56 = arith.mulf %53, %55 : vector<256x8xbf16>
    %c64 = arith.constant 64 : index
    %c0_48 = arith.constant 0 : index
    %57 = vector.load %arg2[%c64, %c0_48] : memref<72x4xbf16, #tpu.memory_space<vmem>>, vector<8x4xbf16>
    %cst_49 = arith.constant dense<0.000000e+00> : vector<256x4xf32>
    %58 = tpu.matmul %56, %57, %cst_49 {dimension_numbers = #tpu.dot_dimension_numbers<[1], [0], [0], [1], [0, 0, 1, 1], [], []>} : vector<256x8xbf16>, vector<8x4xbf16>, vector<256x4xf32> -> vector<256x4xf32>
    %59 = arith.addf %52, %58 : vector<256x4xf32>
    %c0_50 = arith.constant 0 : index
    %c0_51 = arith.constant 0 : index
    %60 = vector.load %arg3[%c0_50, %c0_51] : memref<1x4xf32, #tpu.memory_space<vmem>>, vector<1x4xf32>
    %61 = vector.broadcast %60 : vector<1x4xf32> to vector<256x4xf32>
    %62 = arith.addf %59, %61 : vector<256x4xf32>
    %63 = arith.negf %62 : vector<256x4xf32>
    %64 = math.exp %63 : vector<256x4xf32>
    %cst_52 = arith.constant 1.000000e+00 : f32
    %65 = vector.broadcast %cst_52 : f32 to vector<256x4xf32>
    %66 = arith.addf %65, %64 : vector<256x4xf32>
    %67 = arith.divf %65, %66 : vector<256x4xf32>
    %68 = arith.mulf %62, %67 : vector<256x4xf32>
    %cst_53 = arith.constant 0.000000e+00 : bf16
    %69 = vector.broadcast %cst_53 : bf16 to vector<320x4xbf16>
    %c0_54 = arith.constant 0 : index
    %c0_55 = arith.constant 0 : index
    %70 = vector.load %arg10[%c0_54, %c0_55] : memref<320x4xbf16, #tpu.memory_space<vmem>>, vector<320x4xbf16>
    tpu.vector_store %arg10[%c0_54, %c0_55], %69 {strides = array<i32>} : memref<320x4xbf16, #tpu.memory_space<vmem>>, vector<320x4xbf16>,
    %71 = arith.truncf %68 : vector<256x4xf32> to vector<256x4xbf16>
    %c32_56 = arith.constant 32 : index
    %c0_57 = arith.constant 0 : index
    %72 = vector.load %arg10[%c32_56, %c0_57] : memref<320x4xbf16, #tpu.memory_space<vmem>>, vector<256x4xbf16>
    tpu.vector_store %arg10[%c32_56, %c0_57], %71 {strides = array<i32>} : memref<320x4xbf16, #tpu.memory_space<vmem>>, vector<256x4xbf16>,
    %cst_58 = arith.constant 0.000000e+00 : f32
    %73 = vector.broadcast %cst_58 : f32 to vector<256x8xf32>
    %c15_59 = arith.constant 15 : index
    %c0_60 = arith.constant 0 : index
    %74 = vector.load %arg10[%c15_59, %c0_60] : memref<320x4xbf16, #tpu.memory_space<vmem>>, vector<256x4xbf16>
    %c0_61 = arith.constant 0 : index
    %c0_62 = arith.constant 0 : index
    %75 = vector.load %arg6[%c0_61, %c0_62] : memref<256x1xbf16, #tpu.memory_space<vmem>>, vector<256x1xbf16>
    %76 = vector.broadcast %75 : vector<256x1xbf16> to vector<256x4xbf16>
    %77 = arith.mulf %74, %76 : vector<256x4xbf16>
    %c0_63 = arith.constant 0 : index
    %c0_64 = arith.constant 0 : index
    %78 = vector.load %arg4[%c0_63, %c0_64] : memref<36x8xbf16, #tpu.memory_space<vmem>>, vector<4x8xbf16>
    %cst_65 = arith.constant dense<0.000000e+00> : vector<256x8xf32>
    %79 = tpu.matmul %77, %78, %cst_65 {dimension_numbers = #tpu.dot_dimension_numbers<[1], [0], [0], [1], [0, 0, 1, 1], [], []>} : vector<256x4xbf16>, vector<4x8xbf16>, vector<256x8xf32> -> vector<256x8xf32>
    %80 = arith.addf %73, %79 : vector<256x8xf32>
    %c16_66 = arith.constant 16 : index
    %c0_67 = arith.constant 0 : index
    %81 = vector.load %arg10[%c16_66, %c0_67] : memref<320x4xbf16, #tpu.memory_space<vmem>>, vector<256x4xbf16>
    %c4 = arith.constant 4 : index
    %c0_68 = arith.constant 0 : index
    %82 = vector.load %arg4[%c4, %c0_68] : memref<36x8xbf16, #tpu.memory_space<vmem>>, vector<4x8xbf16>
    %cst_69 = arith.constant dense<0.000000e+00> : vector<256x8xf32>
    %83 = tpu.matmul %81, %82, %cst_69 {dimension_numbers = #tpu.dot_dimension_numbers<[1], [0], [0], [1], [0, 0, 1, 1], [], []>} : vector<256x4xbf16>, vector<4x8xbf16>, vector<256x8xf32> -> vector<256x8xf32>
    %84 = arith.addf %80, %83 : vector<256x8xf32>
    %c17_70 = arith.constant 17 : index
    %c0_71 = arith.constant 0 : index
    %85 = vector.load %arg10[%c17_70, %c0_71] : memref<320x4xbf16, #tpu.memory_space<vmem>>, vector<256x4xbf16>
    %c0_72 = arith.constant 0 : index
    %c0_73 = arith.constant 0 : index
    %86 = vector.load %arg7[%c0_72, %c0_73] : memref<256x1xbf16, #tpu.memory_space<vmem>>, vector<256x1xbf16>
    %87 = vector.broadcast %86 : vector<256x1xbf16> to vector<256x4xbf16>
    %88 = arith.mulf %85, %87 : vector<256x4xbf16>
    %c8_74 = arith.constant 8 : index
    %c0_75 = arith.constant 0 : index
    %89 = vector.load %arg4[%c8_74, %c0_75] : memref<36x8xbf16, #tpu.memory_space<vmem>>, vector<4x8xbf16>
    %cst_76 = arith.constant dense<0.000000e+00> : vector<256x8xf32>
    %90 = tpu.matmul %88, %89, %cst_76 {dimension_numbers = #tpu.dot_dimension_numbers<[1], [0], [0], [1], [0, 0, 1, 1], [], []>} : vector<256x4xbf16>, vector<4x8xbf16>, vector<256x8xf32> -> vector<256x8xf32>
    %91 = arith.addf %84, %90 : vector<256x8xf32>
    %c31_77 = arith.constant 31 : index
    %c0_78 = arith.constant 0 : index
    %92 = vector.load %arg10[%c31_77, %c0_78] : memref<320x4xbf16, #tpu.memory_space<vmem>>, vector<256x4xbf16>
    %c0_79 = arith.constant 0 : index
    %c0_80 = arith.constant 0 : index
    %93 = vector.load %arg6[%c0_79, %c0_80] : memref<256x1xbf16, #tpu.memory_space<vmem>>, vector<256x1xbf16>
    %94 = vector.broadcast %93 : vector<256x1xbf16> to vector<256x4xbf16>
    %95 = arith.mulf %92, %94 : vector<256x4xbf16>
    %c12 = arith.constant 12 : index
    %c0_81 = arith.constant 0 : index
    %96 = vector.load %arg4[%c12, %c0_81] : memref<36x8xbf16, #tpu.memory_space<vmem>>, vector<4x8xbf16>
    %cst_82 = arith.constant dense<0.000000e+00> : vector<256x8xf32>
    %97 = tpu.matmul %95, %96, %cst_82 {dimension_numbers = #tpu.dot_dimension_numbers<[1], [0], [0], [1], [0, 0, 1, 1], [], []>} : vector<256x4xbf16>, vector<4x8xbf16>, vector<256x8xf32> -> vector<256x8xf32>
    %98 = arith.addf %91, %97 : vector<256x8xf32>
    %c32_83 = arith.constant 32 : index
    %c0_84 = arith.constant 0 : index
    %99 = vector.load %arg10[%c32_83, %c0_84] : memref<320x4xbf16, #tpu.memory_space<vmem>>, vector<256x4xbf16>
    %c16_85 = arith.constant 16 : index
    %c0_86 = arith.constant 0 : index
    %100 = vector.load %arg4[%c16_85, %c0_86] : memref<36x8xbf16, #tpu.memory_space<vmem>>, vector<4x8xbf16>
    %cst_87 = arith.constant dense<0.000000e+00> : vector<256x8xf32>
    %101 = tpu.matmul %99, %100, %cst_87 {dimension_numbers = #tpu.dot_dimension_numbers<[1], [0], [0], [1], [0, 0, 1, 1], [], []>} : vector<256x4xbf16>, vector<4x8xbf16>, vector<256x8xf32> -> vector<256x8xf32>
    %102 = arith.addf %98, %101 : vector<256x8xf32>
    %c33_88 = arith.constant 33 : index
    %c0_89 = arith.constant 0 : index
    %103 = vector.load %arg10[%c33_88, %c0_89] : memref<320x4xbf16, #tpu.memory_space<vmem>>, vector<256x4xbf16>
    %c0_90 = arith.constant 0 : index
    %c0_91 = arith.constant 0 : index
    %104 = vector.load %arg7[%c0_90, %c0_91] : memref<256x1xbf16, #tpu.memory_space<vmem>>, vector<256x1xbf16>
    %105 = vector.broadcast %104 : vector<256x1xbf16> to vector<256x4xbf16>
    %106 = arith.mulf %103, %105 : vector<256x4xbf16>
    %c20 = arith.constant 20 : index
    %c0_92 = arith.constant 0 : index
    %107 = vector.load %arg4[%c20, %c0_92] : memref<36x8xbf16, #tpu.memory_space<vmem>>, vector<4x8xbf16>
    %cst_93 = arith.constant dense<0.000000e+00> : vector<256x8xf32>
    %108 = tpu.matmul %106, %107, %cst_93 {dimension_numbers = #tpu.dot_dimension_numbers<[1], [0], [0], [1], [0, 0, 1, 1], [], []>} : vector<256x4xbf16>, vector<4x8xbf16>, vector<256x8xf32> -> vector<256x8xf32>
    %109 = arith.addf %102, %108 : vector<256x8xf32>
    %c47_94 = arith.constant 47 : index
    %c0_95 = arith.constant 0 : index
    %110 = vector.load %arg10[%c47_94, %c0_95] : memref<320x4xbf16, #tpu.memory_space<vmem>>, vector<256x4xbf16>
    %c0_96 = arith.constant 0 : index
    %c0_97 = arith.constant 0 : index
    %111 = vector.load %arg6[%c0_96, %c0_97] : memref<256x1xbf16, #tpu.memory_space<vmem>>, vector<256x1xbf16>
    %112 = vector.broadcast %111 : vector<256x1xbf16> to vector<256x4xbf16>
    %113 = arith.mulf %110, %112 : vector<256x4xbf16>
    %c24_98 = arith.constant 24 : index
    %c0_99 = arith.constant 0 : index
    %114 = vector.load %arg4[%c24_98, %c0_99] : memref<36x8xbf16, #tpu.memory_space<vmem>>, vector<4x8xbf16>
    %cst_100 = arith.constant dense<0.000000e+00> : vector<256x8xf32>
    %115 = tpu.matmul %113, %114, %cst_100 {dimension_numbers = #tpu.dot_dimension_numbers<[1], [0], [0], [1], [0, 0, 1, 1], [], []>} : vector<256x4xbf16>, vector<4x8xbf16>, vector<256x8xf32> -> vector<256x8xf32>
    %116 = arith.addf %109, %115 : vector<256x8xf32>
    %c48_101 = arith.constant 48 : index
    %c0_102 = arith.constant 0 : index
    %117 = vector.load %arg10[%c48_101, %c0_102] : memref<320x4xbf16, #tpu.memory_space<vmem>>, vector<256x4xbf16>
    %c28 = arith.constant 28 : index
    %c0_103 = arith.constant 0 : index
    %118 = vector.load %arg4[%c28, %c0_103] : memref<36x8xbf16, #tpu.memory_space<vmem>>, vector<4x8xbf16>
    %cst_104 = arith.constant dense<0.000000e+00> : vector<256x8xf32>
    %119 = tpu.matmul %117, %118, %cst_104 {dimension_numbers = #tpu.dot_dimension_numbers<[1], [0], [0], [1], [0, 0, 1, 1], [], []>} : vector<256x4xbf16>, vector<4x8xbf16>, vector<256x8xf32> -> vector<256x8xf32>
    %120 = arith.addf %116, %119 : vector<256x8xf32>
    %c49_105 = arith.constant 49 : index
    %c0_106 = arith.constant 0 : index
    %121 = vector.load %arg10[%c49_105, %c0_106] : memref<320x4xbf16, #tpu.memory_space<vmem>>, vector<256x4xbf16>
    %c0_107 = arith.constant 0 : index
    %c0_108 = arith.constant 0 : index
    %122 = vector.load %arg7[%c0_107, %c0_108] : memref<256x1xbf16, #tpu.memory_space<vmem>>, vector<256x1xbf16>
    %123 = vector.broadcast %122 : vector<256x1xbf16> to vector<256x4xbf16>
    %124 = arith.mulf %121, %123 : vector<256x4xbf16>
    %c32_109 = arith.constant 32 : index
    %c0_110 = arith.constant 0 : index
    %125 = vector.load %arg4[%c32_109, %c0_110] : memref<36x8xbf16, #tpu.memory_space<vmem>>, vector<4x8xbf16>
    %cst_111 = arith.constant dense<0.000000e+00> : vector<256x8xf32>
    %126 = tpu.matmul %124, %125, %cst_111 {dimension_numbers = #tpu.dot_dimension_numbers<[1], [0], [0], [1], [0, 0, 1, 1], [], []>} : vector<256x4xbf16>, vector<4x8xbf16>, vector<256x8xf32> -> vector<256x8xf32>
    %127 = arith.addf %120, %126 : vector<256x8xf32>
    %c0_112 = arith.constant 0 : index
    %c0_113 = arith.constant 0 : index
    %128 = vector.load %arg5[%c0_112, %c0_113] : memref<1x8xf32, #tpu.memory_space<vmem>>, vector<1x8xf32>
    %129 = vector.broadcast %128 : vector<1x8xf32> to vector<256x8xf32>
    %130 = arith.addf %127, %129 : vector<256x8xf32>
    %131 = arith.negf %130 : vector<256x8xf32>
    %132 = math.exp %131 : vector<256x8xf32>
    %cst_114 = arith.constant 1.000000e+00 : f32
    %133 = vector.broadcast %cst_114 : f32 to vector<256x8xf32>
    %134 = arith.addf %133, %132 : vector<256x8xf32>
    %135 = arith.divf %133, %134 : vector<256x8xf32>
    %136 = arith.mulf %130, %135 : vector<256x8xf32>
    %c0_115 = arith.constant 0 : index
    %c0_116 = arith.constant 0 : index
    %c0_117 = arith.constant 0 : index
    %137 = vector.load %arg1[%c0_115, %c0_116, %c0_117] : memref<1x256x8xbf16, #tpu.memory_space<vmem>>, vector<1x256x8xbf16>
    %138 = vector.shape_cast %137 : vector<1x256x8xbf16> to vector<256x8xbf16>
    %139 = arith.extf %138 : vector<256x8xbf16> to vector<256x8xf32>
    %140 = arith.addf %136, %139 : vector<256x8xf32>
    %c0_118 = arith.constant 0 : index
    %c0_119 = arith.constant 0 : index
    %c0_120 = arith.constant 0 : index
    %141 = vector.load %arg8[%c0_118, %c0_119, %c0_120] : memref<1x256x8xf32, #tpu.memory_space<vmem>>, vector<1x256x8xf32>
    %142 = vector.shape_cast %141 : vector<1x256x8xf32> to vector<256x8xf32>
    %143 = vector.shape_cast %140 : vector<256x8xf32> to vector<1x256x8xf32>
    tpu.vector_store %arg8[%c0_118, %c0_119, %c0_120], %143 {strides = array<i32>} : memref<1x256x8xf32, #tpu.memory_space<vmem>>, vector<1x256x8xf32>,
    return
  }
  func.func @transform_0(%arg0: i32) -> (i32, i32, i32) {
    %c0_i32 = arith.constant 0 : i32
    %c0_i32_0 = arith.constant 0 : i32
    %c0_i32_1 = arith.constant 0 : i32
    return %arg0, %c0_i32, %c0_i32_0 : i32, i32, i32
  }
  func.func @transform_1(%arg0: i32) -> (i32, i32) {
    %c0_i32 = arith.constant 0 : i32
    %c0_i32_0 = arith.constant 0 : i32
    %c0_i32_1 = arith.constant 0 : i32
    return %c0_i32, %c0_i32_0 : i32, i32
  }
  func.func @transform_2(%arg0: i32) -> (i32, i32) {
    %c0_i32 = arith.constant 0 : i32
    %c0_i32_0 = arith.constant 0 : i32
    %c0_i32_1 = arith.constant 0 : i32
    return %c0_i32, %c0_i32_0 : i32, i32
  }
  func.func @transform_3(%arg0: i32) -> (i32, i32) {
    %c0_i32 = arith.constant 0 : i32
    %c0_i32_0 = arith.constant 0 : i32
    %c0_i32_1 = arith.constant 0 : i32
    return %c0_i32, %c0_i32_0 : i32, i32
  }
  func.func @transform_4(%arg0: i32) -> (i32, i32) {
    %c0_i32 = arith.constant 0 : i32
    %c0_i32_0 = arith.constant 0 : i32
    %c0_i32_1 = arith.constant 0 : i32
    return %c0_i32, %c0_i32_0 : i32, i32
  }
  func.func @transform_5(%arg0: i32) -> (i32, i32) {
    %c0_i32 = arith.constant 0 : i32
    %c0_i32_0 = arith.constant 0 : i32
    %c0_i32_1 = arith.constant 0 : i32
    return %c0_i32, %c0_i32_0 : i32, i32
  }
  func.func @transform_6(%arg0: i32) -> (i32, i32) {
    %c0_i32 = arith.constant 0 : i32
    %c0_i32_0 = arith.constant 0 : i32
    %c0_i32_1 = arith.constant 0 : i32
    return %c0_i32, %c0_i32_0 : i32, i32
  }
  func.func @transform_7(%arg0: i32) -> (i32, i32, i32) {
    %c0_i32 = arith.constant 0 : i32
    %c0_i32_0 = arith.constant 0 : i32
    %c0_i32_1 = arith.constant 0 : i32
    return %arg0, %c0_i32, %c0_i32_0 : i32, i32, i32
  }
}

</mosaic_0001>

<bundles_post_ra>
// kernel: tpu_custom_call.1
= control target key start
LH: loop header
LB: loop body
LE: loop exit
PB: predicated region body
PF: predicated region fallthrough
CT: control target
= control target key end

     0   :  { %s12340_s24 = smov 0   ;;  %s15582_s0 = inlined_call_operand.vmem [shape: bf16[2,256,8], index: 0, kind: input, shape index: {}]   ;;  %s15583_s1 = inlined_call_operand.vmem [shape: bf16[72,4], index: 1, kind: input, shape index: {}]   ;;  %s15584_s2 = inlined_call_operand.vmem [shape: f32[1,4], index: 2, kind: input, shape index: {}]   ;;  %s15585_s3 = inlined_call_operand.vmem [shape: bf16[36,8], index: 3, kind: input, shape index: {}]   ;;  %s15586_s4 = inlined_call_operand.vmem [shape: f32[1,8], index: 4, kind: input, shape index: {}]   ;;  %s15587_s5 = inlined_call_operand.vmem [shape: bf16[256,1], index: 5, kind: input, shape index: {}]   ;;  %s15588_s6 = inlined_call_operand.vmem [shape: bf16[256,1], index: 6, kind: input, shape index: {}]   ;;  %s15589_s7 = inlined_call_operand.vmem [shape: f32[2,256,8], index: 7, kind: output, shape index: {}]  }
   0x1 LB: > { %s10001_s25 = sadd.s32 4294967295, %s12296_s24   ;;  %p10005_p0 = scmp.ge.s32.totalorder %s12296_s24, 1  ;;  %s12296_s24 = sphi %s12340_s24, %s17_s24  }
   0x2   : > { %p237_p1 = scmp.lt.s32.totalorder %s12296_s24, 3 }
   0x4   : > { %p238_p2 = pnand %p10005_p0, %p237_p1 }
   0x6   : > { %241 = sbr.rel (%p238_p2) target bundleno = 1705 (0x6a9), region = 48 }
   0xd   : > { %v464_v0 = vld [vmem:[%s15587_s5 + $0x8] sm:$0xf]  ;;  %v462_v1 = vld [vmem:[%s15587_s5] sm:$0xf]  ;;  %v12298_v2 = vmov 0   ;;  %vm1170_vm0 = vcmask 1043456  }
   0xe   : > { %11990 = vset.pattern.permute.xlu1 %v12298_v2  ;;  %11989 = vset.pattern.permute.xlu0 %v12298_v2  ;;  %v465_v3 = vld [vmem:[%s15587_s5 + $0xc] sm:$0xf]  ;;  %v463_v4 = vld [vmem:[%s15587_s5 + $0x4] sm:$0xf]  ;;  %v467_v5 = vld [vmem:[%s15587_s5 + $0x14] sm:$0xf] }
   0xf   : > { %520 = vperm.xlu1 %11990, %v464_v0   ;;  %496 = vperm.xlu0 %11989, %v462_v1   ;;  %v466_v6 = vld [vmem:[%s15587_s5 + $0x10] sm:$0xf]  ;;  %v469_v7 = vld [vmem:[%s15587_s5 + $0x1c] sm:$0xf]  ;;  %v468_v8 = vld [vmem:[%s15587_s5 + $0x18] sm:$0xf] }
  0x10   : > { %v471_v9 = vld [vmem:[%s15587_s5 + $0x24] sm:$0xf]  ;;  %v470_v10 = vld [vmem:[%s15587_s5 + $0x20] sm:$0xf]  ;;  %vm280_vm1 = vcmask 64512   ;;  %p12390_p3 = scmp.lt.s32.totalorder %s10001_s25, 1 }
  0x11   : > { %v1121_v11 = vld [vmem:[%s15583_s1 + $0x4] sm:$0xf]  ;;  %v1120_v13 = vld [vmem:[%s15583_s1] sm:$0xf]  ;;  %282 = vst.msk [vmem:[#allocation2 + $0x8] sm:$0xff] %vm280_vm1, %v12298_v2  ;;  %281 = vst.msk [vmem:[#allocation2] sm:$0xff] %vm280_vm1, %v12298_v2 }
  0x12   : > { %11961 = vmatprep.subr.msk.bf16.mxu0 %vm1170_vm0, %v1121_v11  ;;  %v1172_v12 = vsel %vm1170_vm0, %v1121_v11, 0  ;;  %283 = vst.msk [vmem:[#allocation2 + $0x10] sm:$0xff] %vm280_vm1, %v12298_v2  ;;  %284 = vst.msk [vmem:[#allocation2 + $0x18] sm:$0xff] %vm280_vm1, %v12298_v2  ;;  %s15851_s25 = smov (!%p12390_p3, %s10001_s25), 1  ;;  %v473_v14 = vld [vmem:[%s15587_s5 + $0x2c] sm:$0xf] }
  0x13   : > { %532 = vperm.xlu1 %11990, %v465_v3   ;;  %508 = vperm.xlu0 %11989, %v463_v4   ;;  %285 = vst.msk [vmem:[#allocation2 + $0x20] sm:$0xff] %vm280_vm1, %v12298_v2  ;;  %286 = vst.msk [vmem:[#allocation2 + $0x28] sm:$0xff] %vm280_vm1, %v12298_v2  ;;  %v472_v15 = vld [vmem:[%s15587_s5 + $0x28] sm:$0xf]  ;;  %s10450_s11 = sshll.u32 %s15851_s25, 7  ;;  %v1517_v30 = vsel %vm1170_vm0, %v1120_v13, 0 }
  0x14   : > { %10838 = vmatpush3.bf16.msra.mxu0 %v1172_v12  ;;  %287 = vst.msk [vmem:[#allocation2 + $0x30] sm:$0xff] %vm280_vm1, %v12298_v2  ;;  %288 = vst.msk [vmem:[#allocation2 + $0x38] sm:$0xff] %vm280_vm1, %v12298_v2  ;;  %v475_v16 = vld [vmem:[%s15587_s5 + $0x34] sm:$0xf]  ;;  %v474_v17 = vld [vmem:[%s15587_s5 + $0x30] sm:$0xf]  ;;  %s12457_s18 = scalar_lea.vmem %s15582_s0, %s10450_s11 }
  0x15   : > { %289 = vst.msk [vmem:[#allocation2 + $0x40] sm:$0xff] %vm280_vm1, %v12298_v2  ;;  %290 = vst.msk [vmem:[#allocation2 + $0x48] sm:$0xff] %vm280_vm1, %v12298_v2  ;;  %11962 = vmatprep.subr.msk.bf16.mxu0 %vm1170_vm0, %v1120_v13  ;;  %v11991_v18 = vld [vmem:[%s12457_s18] sm:$0xff]   ;;  %v11992_v19 = vld [vmem:[%s12457_s18 + $0x8] sm:$0xff]   ;;  %vm958_vm2 = vsmask.f32 7424 }
  0x16   : > { %291 = vst.msk [vmem:[#allocation2 + $0x50] sm:$0xff] %vm280_vm1, %v12298_v2  ;;  %292 = vst.msk [vmem:[#allocation2 + $0x58] sm:$0xff] %vm280_vm1, %v12298_v2  ;;  %v477_v21 = vld [vmem:[%s15587_s5 + $0x3c] sm:$0xf]  ;;  %v476_v22 = vld [vmem:[%s15587_s5 + $0x38] sm:$0xf] }
  0x17   : > { %556 = vperm.xlu1 %11990, %v467_v5   ;;  %544 = vperm.xlu0 %11989, %v466_v6   ;;  %293 = vst.msk [vmem:[#allocation2 + $0x60] sm:$0xff] %vm280_vm1, %v12298_v2  ;;  %294 = vst.msk [vmem:[#allocation2 + $0x68] sm:$0xff] %vm280_vm1, %v12298_v2  ;;  %v11993_v23 = vld [vmem:[%s12457_s18 + $0x10] sm:$0xff]   ;;  %v11994_v24 = vld [vmem:[%s12457_s18 + $0x18] sm:$0xff]   ;;  %vm1335_vm3 = vsmask.f32 256 }
  0x18   : > { %295 = vst.msk [vmem:[#allocation2 + $0x70] sm:$0xff] %vm280_vm1, %v12298_v2  ;;  %296 = vst.msk [vmem:[#allocation2 + $0x78] sm:$0xff] %vm280_vm1, %v12298_v2  ;;  %v12461_v20 = vld [vmem:[#allocation2 + $0x8] sm:$0xff]  ;;  %v11995_v25 = vld [vmem:[%s12457_s18 + $0x20] sm:$0xff]   ;;  %vm5098_vm4 = vcmask 31744   ;;  %vm5879_vm5 = vcmask 1041408  }
  0x19   : > { %297 = vst.msk [vmem:[#allocation2 + $0x80] sm:$0xff] %vm280_vm1, %v12298_v2  ;;  %298 = vst.msk [vmem:[#allocation2 + $0x88] sm:$0xff] %vm280_vm1, %v12298_v2  ;;  %10839 = vmatprep.mubr.msk.bf16.mxu0 %vm280_vm1, %v12461_v20  ;;  %v11996_v26 = vld [vmem:[%s12457_s18 + $0x28] sm:$0xff]   ;;  %v479_v27 = vld [vmem:[%s15587_s5 + $0x44] sm:$0xf]  ;;  %s10451_s23 = sshll.u32 %s15851_s25, 8 }
  0x1a   : > { %299 = vst.msk [vmem:[#allocation2 + $0x90] sm:$0xff] %vm280_vm1, %v12298_v2  ;;  %300 = vst.msk [vmem:[#allocation2 + $0x98] sm:$0xff] %vm280_vm1, %v12298_v2  ;;  %v11997_v28 = vld [vmem:[%s12457_s18 + $0x30] sm:$0xff]   ;;  %v478_v29 = vld [vmem:[%s15587_s5 + $0x40] sm:$0xf]  ;;  %s15394_s27 = scalar_lea.vmem %s15589_s7, %s10451_s23 }
  0x1b   : > { %580 = vperm.xlu1 %11990, %v469_v7   ;;  %568 = vperm.xlu0 %11989, %v468_v8   ;;  %429 = vst.msk [vmem:[#allocation2 + $0x10] sm:$0xff] %vm280_vm1, %v11991_v18  ;;  %430 = vst.msk [vmem:[#allocation2 + $0x18] sm:$0xff] %vm280_vm1, %v11992_v19  ;;  %v11998_v32 = vld [vmem:[%s12457_s18 + $0x38] sm:$0xff]   ;;  %v11999_v34 = vld [vmem:[%s12457_s18 + $0x40] sm:$0xff]  }
  0x1c   : > { %431 = vst.msk [vmem:[#allocation2 + $0x20] sm:$0xff] %vm280_vm1, %v11993_v23  ;;  %432 = vst.msk [vmem:[#allocation2 + $0x28] sm:$0xff] %vm280_vm1, %v11994_v24  ;;  %v481_v35 = vld [vmem:[%s15587_s5 + $0x4c] sm:$0xf]  ;;  %v480_v36 = vld [vmem:[%s15587_s5 + $0x48] sm:$0xf] }
  0x1d   : > { %433 = vst.msk [vmem:[#allocation2 + $0x30] sm:$0xff] %vm280_vm1, %v11995_v25  ;;  %434 = vst.msk [vmem:[#allocation2 + $0x38] sm:$0xff] %vm280_vm1, %v11996_v26  ;;  %v12000_v37 = vld [vmem:[%s12457_s18 + $0x48] sm:$0xff]   ;;  %v12001_v39 = vld [vmem:[%s12457_s18 + $0x50] sm:$0xff]  }
  0x1e   : > { %435 = vst.msk [vmem:[#allocation2 + $0x40] sm:$0xff] %vm280_vm1, %v11997_v28  ;;  %436 = vst.msk [vmem:[#allocation2 + $0x48] sm:$0xff] %vm280_vm1, %v11998_v32  ;;  %v483_v41 = vld [vmem:[%s15587_s5 + $0x54] sm:$0xf]  ;;  %v482_v42 = vld [vmem:[%s15587_s5 + $0x50] sm:$0xf] }
  0x1f   : > { %604 = vperm.xlu1 %11990, %v471_v9   ;;  %592 = vperm.xlu0 %11989, %v470_v10   ;;  %437 = vst.msk [vmem:[#allocation2 + $0x50] sm:$0xff] %vm280_vm1, %v11999_v34  ;;  %438 = vst.msk [vmem:[#allocation2 + $0x58] sm:$0xff] %vm280_vm1, %v12000_v37  ;;  %v12002_v43 = vld [vmem:[%s12457_s18 + $0x58] sm:$0xff]   ;;  %v12003_v44 = vld [vmem:[%s12457_s18 + $0x60] sm:$0xff]  }
  0x20   : > { %439 = vst.msk [vmem:[#allocation2 + $0x60] sm:$0xff] %vm280_vm1, %v12001_v39  ;;  %440 = vst.msk [vmem:[#allocation2 + $0x68] sm:$0xff] %vm280_vm1, %v12002_v43  ;;  %v485_v45 = vld [vmem:[%s15587_s5 + $0x5c] sm:$0xf]  ;;  %v484_v46 = vld [vmem:[%s15587_s5 + $0x58] sm:$0xf] }
  0x21   : > { %441 = vst.msk [vmem:[#allocation2 + $0x70] sm:$0xff] %vm280_vm1, %v12003_v44  ;;  %v12004_v47 = vld [vmem:[%s12457_s18 + $0x68] sm:$0xff]   ;;  %v12005_v49 = vld [vmem:[%s12457_s18 + $0x70] sm:$0xff]   ;;  %v487_v51 = vld [vmem:[%s15587_s5 + $0x64] sm:$0xf]  ;;  %v502_v44 = vlaneseq }
  0x22   : > { %v12489_v31 = vld [vmem:[#allocation2 + $0x10] sm:$0xff]  ;;  %v12495_v33 = vld [vmem:[#allocation2 + $0x18] sm:$0xff]  ;;  %442 = vst.msk [vmem:[#allocation2 + $0x78] sm:$0xff] %vm280_vm1, %v12004_v47  ;;  %v486_v52 = vld [vmem:[%s15587_s5 + $0x60] sm:$0xf] }
  0x23   : > { %628 = vperm.xlu1 %11990, %v473_v14   ;;  %616 = vperm.xlu0 %11989, %v472_v15   ;;  %v12509_v38 = vld [vmem:[#allocation2 + $0x20] sm:$0xff]  ;;  %v12512_v40 = vld [vmem:[#allocation2 + $0x28] sm:$0xff]  ;;  %443 = vst.msk [vmem:[#allocation2 + $0x80] sm:$0xff] %vm280_vm1, %v12005_v49  ;;  %v491_v58 = vld [vmem:[%s15587_s5 + $0x74] sm:$0xf]  ;;  %v503_v49 = vshrl.u32 %v502_v44, 7 }
  0x24   : > { %10840 = vmatmul.mubr.msk.bf16.vlgmr.msra.gmra.mrb[0].mxu0 %vm280_vm1, %v12489_v31  ;;  %v12537_v48 = vld [vmem:[#allocation2 + $0x30] sm:$0xff]  ;;  %v12540_v50 = vld [vmem:[#allocation2 + $0x38] sm:$0xff]  ;;  %v12555_v53 = vld [vmem:[%s15583_s1 + $0x8] sm:$0xf]  ;;  %5117 = vst.msk [vmem:[#allocation3 + $0x90] sm:$0xff] %vm5098_vm4, %v12298_v2 }
  0x25   : > { %10872 = vmatpush3.bf16.msra.mxu0 %v1517_v30  ;;  %10843 = vmatprep.mubr.msk.bf16.mxu0 %vm280_vm1, %v12495_v33  ;;  %v489_v54 = vld [vmem:[%s15587_s5 + $0x6c] sm:$0xf]  ;;  %v488_v55 = vld [vmem:[%s15587_s5 + $0x68] sm:$0xf]  ;;  %v12567_v56 = vld [vmem:[#allocation2 + $0x40] sm:$0xff]  ;;  %5099 = vst.msk [vmem:[#allocation3] sm:$0xff] %vm5098_vm4, %v12298_v2 }
  0x26   : > { %11963 = vmatprep.subr.msk.bf16.mxu0 %vm1170_vm0, %v12555_v53  ;;  %v12569_v57 = vld [vmem:[#allocation2 + $0x48] sm:$0xff]  ;;  %v490_v59 = vld [vmem:[%s15587_s5 + $0x70] sm:$0xf]  ;;  %v493_v60 = vld [vmem:[%s15587_s5 + $0x7c] sm:$0xf]  ;;  %5100 = vst.msk [vmem:[#allocation3 + $0x8] sm:$0xff] %vm5098_vm4, %v12298_v2 }
  0x27   : > { %652 = vperm.xlu1 %11990, %v475_v16   ;;  %640 = vperm.xlu0 %11989, %v474_v17   ;;  %v492_v61 = vld [vmem:[%s15587_s5 + $0x78] sm:$0xf]  ;;  %v12587_v62 = vld [vmem:[#allocation2 + $0x50] sm:$0xff]  ;;  %v1698_v0 = vld [vmem:[%s15588_s6 + $0x4] sm:$0xf]  ;;  %5101 = vst.msk [vmem:[#allocation3 + $0x10] sm:$0xff] %vm5098_vm4, %v12298_v2 }
  0x28   : > { %v12589_v63 = vld [vmem:[#allocation2 + $0x58] sm:$0xff]  ;;  %v1697_v1 = vld [vmem:[%s15588_s6] sm:$0xf]  ;;  %v1700_v4 = vld [vmem:[%s15588_s6 + $0xc] sm:$0xf]  ;;  %5102 = vst.msk [vmem:[#allocation3 + $0x18] sm:$0xff] %vm5098_vm4, %v12298_v2 }
  0x29   : > { %v12006_v3 = vld [vmem:[%s12457_s18 + $0x78] sm:$0xff]   ;;  %v1699_v5 = vld [vmem:[%s15588_s6 + $0x8] sm:$0xf]  ;;  %v12609_v6 = vld [vmem:[#allocation2 + $0x60] sm:$0xff]  ;;  %5103 = vst.msk [vmem:[#allocation3 + $0x20] sm:$0xff] %vm5098_vm4, %v12298_v2 }
  0x2a   : > { %444 = vst.msk [vmem:[#allocation2 + $0x88] sm:$0xff] %vm280_vm1, %v12006_v3  ;;  %v12611_v7 = vld [vmem:[#allocation2 + $0x68] sm:$0xff]  ;;  %v1702_v8 = vld [vmem:[%s15588_s6 + $0x14] sm:$0xf]  ;;  %v1701_v9 = vld [vmem:[%s15588_s6 + $0x10] sm:$0xf] }
  0x2b   : > { %676 = vperm.xlu1 %11990, %v477_v21   ;;  %664 = vperm.xlu0 %11989, %v476_v22   ;;  %v1704_v10 = vld [vmem:[%s15588_s6 + $0x1c] sm:$0xf]  ;;  %v1703_v11 = vld [vmem:[%s15588_s6 + $0x18] sm:$0xf]  ;;  %v12629_v12 = vld [vmem:[#allocation2 + $0x70] sm:$0xff]  ;;  %5104 = vst.msk [vmem:[#allocation3 + $0x28] sm:$0xff] %vm5098_vm4, %v12298_v2 }
  0x2c   : > { %10844 = vmatmul.mubr.msk.bf16.gmra.mrb[4].mxu0 %vm280_vm1, %v12509_v38  ;;  %v12631_v13 = vld [vmem:[#allocation2 + $0x78] sm:$0xff]  ;;  %v1706_v14 = vld [vmem:[%s15588_s6 + $0x24] sm:$0xf]  ;;  %v1705_v15 = vld [vmem:[%s15588_s6 + $0x20] sm:$0xf]  ;;  %5105 = vst.msk [vmem:[#allocation3 + $0x30] sm:$0xff] %vm5098_vm4, %v12298_v2 }
  0x2d   : > { %10847 = vmatprep.mubr.msk.bf16.mxu0 %vm280_vm1, %v12512_v40  ;;  %v1708_v16 = vld [vmem:[%s15588_s6 + $0x2c] sm:$0xf]  ;;  %v1707_v17 = vld [vmem:[%s15588_s6 + $0x28] sm:$0xf]  ;;  %v12649_v18 = vld [vmem:[#allocation2 + $0x80] sm:$0xff]  ;;  %5106 = vst.msk [vmem:[#allocation3 + $0x38] sm:$0xff] %vm5098_vm4, %v12298_v2 }
  0x2e   : > { %v1710_v19 = vld [vmem:[%s15588_s6 + $0x34] sm:$0xf]  ;;  %v1709_v21 = vld [vmem:[%s15588_s6 + $0x30] sm:$0xf]  ;;  %v1712_v22 = vld [vmem:[%s15588_s6 + $0x3c] sm:$0xf] }
  0x2f   : > { %700 = vperm.xlu1 %11990, %v479_v27   ;;  %688 = vperm.xlu0 %11989, %v478_v29   ;;  %v1711_v23 = vld [vmem:[%s15588_s6 + $0x38] sm:$0xf]  ;;  %v1714_v24 = vld [vmem:[%s15588_s6 + $0x44] sm:$0xf]  ;;  %v1713_v25 = vld [vmem:[%s15588_s6 + $0x40] sm:$0xf] }
  0x30   : > { %v1716_v26 = vld [vmem:[%s15588_s6 + $0x4c] sm:$0xf]  ;;  %v1715_v27 = vld [vmem:[%s15588_s6 + $0x48] sm:$0xf]  ;;  %v1718_v28 = vld [vmem:[%s15588_s6 + $0x54] sm:$0xf] }
  0x31   : > { %v1717_v29 = vld [vmem:[%s15588_s6 + $0x50] sm:$0xf]  ;;  %v1720_v30 = vld [vmem:[%s15588_s6 + $0x5c] sm:$0xf]  ;;  %v1719_v32 = vld [vmem:[%s15588_s6 + $0x58] sm:$0xf] }
  0x32   : > { %v1722_v34 = vld [vmem:[%s15588_s6 + $0x64] sm:$0xf]  ;;  %v1723_v37 = vld [vmem:[%s15588_s6 + $0x68] sm:$0xf]  ;;  %v1726_v39 = vld [vmem:[%s15588_s6 + $0x74] sm:$0xf] }
  0x33   : > { %724 = vperm.xlu1 %11990, %v481_v35   ;;  %712 = vperm.xlu0 %11989, %v480_v36   ;;  %v1721_v35 = vld [vmem:[%s15588_s6 + $0x60] sm:$0xf]  ;;  %v1724_v36 = vld [vmem:[%s15588_s6 + $0x6c] sm:$0xf]  ;;  %5107 = vst.msk [vmem:[#allocation3 + $0x40] sm:$0xff] %vm5098_vm4, %v12298_v2  ;;  %5108 = vst.msk [vmem:[#allocation3 + $0x48] sm:$0xff] %vm5098_vm4, %v12298_v2 }
  0x34   : > { %10848 = vmatmul.mubr.msk.bf16.gmra.mrb[8].mxu0 %vm280_vm1, %v12537_v48  ;;  %v5176_v44 = vld [vmem:[%s15587_s5 + $0x20] sm:$0xf]  ;;  %5109 = vst.msk [vmem:[#allocation3 + $0x50] sm:$0xff] %vm5098_vm4, %v12298_v2  ;;  %5110 = vst.msk [vmem:[#allocation3 + $0x58] sm:$0xff] %vm5098_vm4, %v12298_v2 }
  0x35   : > { %10851 = vmatprep.mubr.msk.bf16.mxu0 %vm280_vm1, %v12540_v50  ;;  %5111 = vst.msk [vmem:[#allocation3 + $0x60] sm:$0xff] %vm5098_vm4, %v12298_v2  ;;  %5112 = vst.msk [vmem:[#allocation3 + $0x68] sm:$0xff] %vm5098_vm4, %v12298_v2 }
  0x36   : > { %5113 = vst.msk [vmem:[#allocation3 + $0x70] sm:$0xff] %vm5098_vm4, %v12298_v2  ;;  %5114 = vst.msk [vmem:[#allocation3 + $0x78] sm:$0xff] %vm5098_vm4, %v12298_v2 }
  0x37   : > { %748 = vperm.xlu1 %11990, %v483_v41   ;;  %736 = vperm.xlu0 %11989, %v482_v42   ;;  %v1725_v41 = vld [vmem:[%s15588_s6 + $0x70] sm:$0xf]  ;;  %v12299_v42 = vmov 839922192   ;;  %5115 = vst.msk [vmem:[#allocation3 + $0x80] sm:$0xff] %vm5098_vm4, %v12298_v2  ;;  %5116 = vst.msk [vmem:[#allocation3 + $0x88] sm:$0xff] %vm5098_vm4, %v12298_v2 }
  0x38   : > { %v500_v43 = vunpack.c.l.s4 %v12299_v42  ;;  %5118 = vst.msk [vmem:[#allocation3 + $0x98] sm:$0xff] %vm5098_vm4, %v12298_v2 }
  0x3a   : > { %v501_v47 = vunpack.c.0.s8 %v500_v43 }
  0x3b   : > { %772 = vperm.xlu1 %11990, %v485_v45   ;;  %760 = vperm.xlu0 %11989, %v484_v46   ;;  %v1728_v45 = vld [vmem:[%s15588_s6 + $0x7c] sm:$0xf]  ;;  %v1727_v46 = vld [vmem:[%s15588_s6 + $0x78] sm:$0xf] }
  0x3c   : > { %10852 = vmatmul.mubr.msk.bf16.gmra.mrb[12].mxu0 %vm280_vm1, %v12567_v56 }
  0x3d   : > { %10855 = vmatprep.mubr.msk.bf16.mxu0 %vm280_vm1, %v12569_v57 }
  0x3f   : > { %796 = vperm.xlu1 %11990, %v487_v51   ;;  %784 = vperm.xlu0 %11989, %v486_v52   ;;  %v5169_v51 = vld [vmem:[%s15587_s5 + $0x4] sm:$0xf]  ;;  %v5168_v52 = vld [vmem:[%s15587_s5] sm:$0xf] }
  0x43   : > { %820 = vperm.xlu1 %11990, %v489_v54   ;;  %808 = vperm.xlu0 %11989, %v488_v55   ;;  %v12719_v54 = vsub.s32 %v501_v47, %v503_v49 }
  0x44   : > { %10856 = vmatmul.mubr.msk.bf16.gmra.mrb[16].mxu0 %vm280_vm1, %v12587_v62 }
  0x45   : > { %10859 = vmatprep.mubr.msk.bf16.mxu0 %vm280_vm1, %v12589_v63  ;;  %15670 = vst [vmem:[#allocation4_spill] sm:$0xff] %v12719_v54 }
  0x47   : > { %844 = vperm.xlu1 %11990, %v491_v58   ;;  %832 = vperm.xlu0 %11989, %v490_v59   ;;  %v5171_v59 = vld [vmem:[%s15587_s5 + $0xc] sm:$0xf] }
  0x4b   : > { %868 = vperm.xlu1 %11990, %v493_v60   ;;  %856 = vperm.xlu0 %11989, %v492_v61   ;;  %v5170_v60 = vld [vmem:[%s15587_s5 + $0x8] sm:$0xf] }
  0x4c   : > { %10860 = vmatmul.mubr.msk.bf16.gmra.mrb[20].mxu0 %vm280_vm1, %v12609_v6 }
  0x4d   : > { %10863 = vmatprep.mubr.msk.bf16.mxu0 %vm280_vm1, %v12611_v7 }
  0x4f   : > { %1743 = vperm.xlu1 %11990, %v1698_v0   ;;  %1731 = vperm.xlu0 %11989, %v1697_v1  }
  0x53   : > { %1767 = vperm.xlu1 %11990, %v1700_v4   ;;  %1755 = vperm.xlu0 %11989, %v1699_v5  }
  0x54   : > { %10864 = vmatmul.mubr.msk.bf16.gmra.mrb[24].mxu0 %vm280_vm1, %v12629_v12 }
  0x55   : > { %10867 = vmatprep.mubr.msk.bf16.mxu0 %vm280_vm1, %v12631_v13 }
  0x57   : > { %1791 = vperm.xlu1 %11990, %v1702_v8   ;;  %1779 = vperm.xlu0 %11989, %v1701_v9   ;;  %v5173_v8 = vld [vmem:[%s15587_s5 + $0x14] sm:$0xf]  ;;  %v5172_v9 = vld [vmem:[%s15587_s5 + $0x10] sm:$0xf] }
  0x5b   : > { %1815 = vperm.xlu1 %11990, %v1704_v10   ;;  %1803 = vperm.xlu0 %11989, %v1703_v11  }
  0x5c   : > { %10868 = vmatmul.mubr.msk.bf16.gmra.mrb[28].mxu0 %vm280_vm1, %v12649_v18 }
  0x5f   : > { %1839 = vperm.xlu1 %11990, %v1706_v14   ;;  %1827 = vperm.xlu0 %11989, %v1705_v15  }
  0x63   : > { %1863 = vperm.xlu1 %11990, %v1708_v16   ;;  %1851 = vperm.xlu0 %11989, %v1707_v17  }
  0x67   : > { %1887 = vperm.xlu1 %11990, %v1710_v19   ;;  %1875 = vperm.xlu0 %11989, %v1709_v21  }
  0x6b   : > { %1911 = vperm.xlu1 %11990, %v1712_v22   ;;  %1899 = vperm.xlu0 %11989, %v1711_v23   ;;  %v5175_v22 = vld [vmem:[%s15587_s5 + $0x1c] sm:$0xf] }
  0x6f   : > { %1935 = vperm.xlu1 %11990, %v1714_v24   ;;  %1923 = vperm.xlu0 %11989, %v1713_v25   ;;  %v5174_v25 = vld [vmem:[%s15587_s5 + $0x18] sm:$0xf] }
  0x73   : > { %1959 = vperm.xlu1 %11990, %v1716_v26   ;;  %1947 = vperm.xlu0 %11989, %v1715_v27   ;;  %v445_v26 = vld [vmem:[#allocation2] sm:$0x80] }
  0x77   : > { %1983 = vperm.xlu1 %11990, %v1718_v28   ;;  %1971 = vperm.xlu0 %11989, %v1717_v29  }
  0x7b   : > { %2007 = vperm.xlu1 %11990, %v1720_v30   ;;  %1995 = vperm.xlu0 %11989, %v1719_v32  }
  0x7f   : > { %2031 = vperm.xlu1 %11990, %v1722_v34   ;;  %2019 = vperm.xlu0 %11989, %v1721_v35  }
  0x83   : > { %2055 = vperm.xlu1 %11990, %v1724_v36   ;;  %2043 = vperm.xlu0 %11989, %v1723_v37  }
  0x87   : > { %2079 = vperm.xlu1 %11990, %v1726_v39   ;;  %2067 = vperm.xlu0 %11989, %v1725_v41   ;;  %v5177_v39 = vld [vmem:[%s15587_s5 + $0x24] sm:$0xf] }
  0x8b   : > { %2103 = vperm.xlu1 %11990, %v1728_v45   ;;  %2091 = vperm.xlu0 %11989, %v1727_v46  }
  0x8e   : > { %v521_v55 = vpop.permute.xlu1 %520  ;;  %v497_v58 = vpop.permute.xlu0 %496 }
  0x8f   : > { %5214 = vperm.xlu1 %11990, %v5169_v51   ;;  %5202 = vperm.xlu0 %11989, %v5168_v52   ;;  %v529_v61 = vrot.slane %v521_v55, %v12719_v54  ;;  %v505_v3 = vrot.slane %v497_v58, %v12719_v54 }
  0x92   : > { %v533_v0 = vpop.permute.xlu1 %532  ;;  %v509_v1 = vpop.permute.xlu0 %508 }
  0x93   : > { %v541_v4 = vrot.slane %v533_v0, %v12719_v54  ;;  %v517_v5 = vrot.slane %v509_v1, %v12719_v54  ;;  %5238 = vperm.xlu1 %11990, %v5171_v59   ;;  %5226 = vperm.xlu0 %11989, %v5170_v60  }
  0x95   : > { %v10027_v10 = vcombine.low %v529_v61, %v541_v4  ;;  %v10026_v11 = vcombine.low %v505_v3, %v517_v5  ;;  %v5179_v61 = vld [vmem:[%s15587_s5 + $0x2c] sm:$0xf]  ;;  %v5178_v5 = vld [vmem:[%s15587_s5 + $0x28] sm:$0xf] }
  0x96   : > { %v557_v14 = vpop.permute.xlu1 %556  ;;  %v545_v15 = vpop.permute.xlu0 %544 }
  0x97   : > { %v967_v16 = vshll.u32 %v10027_v10, 16  ;;  %v960_v17 = vshll.u32 %v10026_v11, 16  ;;  %5262 = vperm.xlu1 %11990, %v5173_v8   ;;  %5250 = vperm.xlu0 %11989, %v5172_v9   ;;  %v565_v19 = vrot.slane %v557_v14, %v12719_v54  ;;  %v553_v21 = vrot.slane %v545_v15, %v12719_v54 }
  0x98   : > { %v963_v24 = vshrl.u32 %v10026_v11, 16  ;;  %v971_v36 = vshrl.u32 %v10027_v10, 16 }
  0x99   : > { %v12742_v23 = vrot.slane %v960_v17, 1  ;;  %v969_v27 = vrot.slane %v967_v16, 1  ;;  %v10028_v28 = vcombine.low %v553_v21, %v565_v19 }
  0x9a   : > { %v581_v29 = vpop.permute.xlu1 %580  ;;  %v569_v30 = vpop.permute.xlu0 %568 }
  0x9b   : > { %15671 = vst [vmem:[#allocation5_spill] sm:$0xff] %v12742_v23  ;;  %v965_v32 = vor.u32 %v963_v24, %v12742_v23  ;;  %v589_v34 = vrot.slane %v581_v29, %v12719_v54  ;;  %v577_v35 = vrot.slane %v569_v30, %v12719_v54  ;;  %5286 = vperm.xlu1 %11990, %v5175_v22   ;;  %v975_v37 = vshll.u32 %v10028_v28, 16 }
  0x9c   : > { %5274 = vperm.xlu0 %11989, %v5174_v25   ;;  %v1103_v41 = vmul.bf16 %v12742_v23, %v445_v26  ;;  %v973_v45 = vor.u32 %v971_v36, %v969_v27  ;;  %v979_v52 = vshrl.u32 %v10028_v28, 16  ;;  %v5180_v26 = vld [vmem:[%s15587_s5 + $0x30] sm:$0xf] }
  0x9d   : > { %v12755_v42 = vsel %vm958_vm2, %v965_v32, %v969_v27  ;;  %v10029_v43 = vcombine.low %v577_v35, %v589_v34  ;;  %v977_v46 = vrot.slane %v975_v37, 1 }
  0x9e   : > { %v605_v47 = vpop.permute.xlu1 %604  ;;  %v593_v49 = vpop.permute.xlu0 %592  ;;  %v1104_v51 = vmul.bf16 %v12755_v42, %v12461_v20  ;;  %v1337_v0 = vshrl.u32 %v1103_v41, 16 }
  0x9f   : > { %v983_v55 = vshll.u32 %v10029_v43, 16  ;;  %v613_v58 = vrot.slane %v605_v47, %v12719_v54  ;;  %v601_v59 = vrot.slane %v593_v49, %v12719_v54  ;;  %5310 = vperm.xlu1 %11990, %v5177_v39   ;;  %v12765_v60 = vsel %vm958_vm2, %v973_v45, %v977_v46 }
  0xa0   : > { %15672 = vst [vmem:[#allocation6_spill] sm:$0xff] %v12765_v60  ;;  %5298 = vperm.xlu0 %11989, %v5176_v44   ;;  %v1341_v1 = vshrl.u32 %v1104_v51, 16  ;;  %v981_v3 = vor.u32 %v979_v52, %v977_v46  ;;  %v1105_v20 = vmul.bf16 %v12765_v60, %v12489_v31  ;;  %v987_v16 = vshrl.u32 %v10029_v43, 16  ;;  %v5181_v31 = vld [vmem:[%s15587_s5 + $0x34] sm:$0xf] }
  0xa1   : > { %v985_v4 = vrot.slane %v983_v55, 1  ;;  %v10030_v8 = vcombine.low %v601_v59, %v613_v58  ;;  %v1344_v17 = vshll.u32 %v1104_v51, 16  ;;  %v1339_v22 = vrot.slane %v1337_v0, 7  ;;  %v5183_v46 = vld [vmem:[%s15587_s5 + $0x3c] sm:$0xf] }
  0xa2   : > { %v629_v9 = vpop.permute.xlu1 %628  ;;  %v617_v10 = vpop.permute.xlu0 %616  ;;  %v1343_v11 = vrot.slane %v1341_v1, 7  ;;  %v1349_v14 = vshrl.u32 %v1105_v20, 16  ;;  %v1352_v35 = vshll.u32 %v1105_v20, 16  ;;  %v2536_v52 = vsel %vm1170_vm0, %v12555_v53, 0  ;;  %v5182_v55 = vld [vmem:[%s15587_s5 + $0x38] sm:$0xf] }
  0xa3   : > { %v12776_v15 = vsel %vm958_vm2, %v981_v3, %v985_v4  ;;  %5334 = vperm.xlu1 %11990, %v5179_v61   ;;  %v991_v19 = vshll.u32 %v10030_v8, 16  ;;  %v637_v21 = vrot.slane %v629_v9, %v12719_v54  ;;  %v989_v24 = vor.u32 %v987_v16, %v985_v4  ;;  %v12809_v20 = vld [vmem:[%s15583_s1 + $0xc] sm:$0xf] }
  0xa4   : > { %5322 = vperm.xlu0 %11989, %v5178_v5   ;;  %v625_v25 = vrot.slane %v617_v10, %v12719_v54  ;;  %v1346_v27 = vor.u32 %v1344_v17, %v1343_v11  ;;  %v1351_v28 = vrot.slane %v1349_v14, 7  ;;  %v995_v30 = vshrl.u32 %v10030_v8, 16  ;;  %v5185_v17 = vld [vmem:[%s15587_s5 + $0x44] sm:$0xf] }
  0xa5   : > { %v993_v29 = vrot.slane %v991_v19, 1  ;;  %v1106_v36 = vmul.bf16 %v12776_v15, %v12495_v33  ;;  %v5184_v19 = vld [vmem:[%s15587_s5 + $0x40] sm:$0xf] }
  0xa6   : > { %v653_v32 = vpop.permute.xlu1 %652  ;;  %v641_v34 = vpop.permute.xlu0 %640  ;;  %v10031_v37 = vcombine.low %v625_v25, %v637_v21  ;;  %v1347_v43 = vsel %vm1335_vm3, %v1339_v22, %v1346_v27  ;;  %v1354_v45 = vor.u32 %v1352_v35, %v1351_v28 }
  0xa7   : > { %v661_v39 = vrot.slane %v653_v32, %v12719_v54  ;;  %v649_v41 = vrot.slane %v641_v34, %v12719_v54  ;;  %5358 = vperm.xlu1 %11990, %v5181_v31   ;;  %v12792_v44 = vsel %vm958_vm2, %v989_v24, %v993_v29  ;;  %10873 = vmatprep.mubr.msk.bf16.mxu0 %vm280_vm1, %v1347_v43  ;;  %v1357_v33 = vshrl.u32 %v1106_v36, 16 }
  0xa8   : > { %5346 = vperm.xlu0 %11989, %v5180_v26   ;;  %v997_v47 = vor.u32 %v995_v30, %v993_v29  ;;  %v999_v49 = vshll.u32 %v10031_v37, 16  ;;  %v1355_v58 = vsel %vm1335_vm3, %v1343_v11, %v1354_v45  ;;  %v1360_v1 = vshll.u32 %v1106_v36, 16 }
  0xa9   : > { %v10032_v51 = vcombine.low %v649_v41, %v661_v39  ;;  %v1359_v0 = vrot.slane %v1357_v33, 7  ;;  %v1107_v3 = vmul.bf16 %v12792_v44, %v12509_v38  ;;  %v1003_v53 = vshrl.u32 %v10031_v37, 16  ;;  %10874 = vmatmul.mubr.msk.bf16.vlgmr.msra.gmra.mrb[0].mxu0 %vm280_vm1, %v1355_v58  ;;  %v5186_v41 = vld [vmem:[%s15587_s5 + $0x48] sm:$0xf] }
  0xaa   : > { %v677_v59 = vpop.permute.xlu1 %676  ;;  %v665_v61 = vpop.permute.xlu0 %664  ;;  %v1001_v4 = vrot.slane %v999_v49, 1  ;;  %10906 = vmatpush3.bf16.msra.mxu0 %v2536_v52 }
  0xab   : > { %v1007_v5 = vshll.u32 %v10032_v51, 16  ;;  %v685_v8 = vrot.slane %v677_v59, %v12719_v54  ;;  %5382 = vperm.xlu1 %11990, %v5183_v46   ;;  %v673_v9 = vrot.slane %v665_v61, %v12719_v54  ;;  %v1362_v10 = vor.u32 %v1360_v1, %v1359_v0  ;;  %11964 = vmatprep.subr.msk.bf16.mxu0 %vm1170_vm0, %v12809_v20 }
  0xac   : > { %5370 = vperm.xlu0 %11989, %v5182_v55   ;;  %v1365_v11 = vshrl.u32 %v1107_v3, 16  ;;  %v12815_v38 = vsel %vm958_vm2, %v997_v47, %v1001_v4  ;;  %v1005_v14 = vor.u32 %v1003_v53, %v1001_v4  ;;  %v1368_v21 = vshll.u32 %v1107_v3, 16  ;;  %v5189_v53 = vld [vmem:[%s15587_s5 + $0x54] sm:$0xf] }
  0xad   : > { %v1009_v16 = vrot.slane %v1007_v5, 1  ;;  %v10033_v31 = vcombine.low %v673_v9, %v685_v8  ;;  %v1363_v22 = vsel %vm1335_vm3, %v1351_v28, %v1362_v10  ;;  %v1108_v27 = vmul.bf16 %v12815_v38, %v12512_v40  ;;  %v5187_v40 = vld [vmem:[%s15587_s5 + $0x4c] sm:$0xf]  ;;  %v5188_v5 = vld [vmem:[%s15587_s5 + $0x50] sm:$0xf] }
  0xae   : > { %v701_v24 = vpop.permute.xlu1 %700  ;;  %v689_v25 = vpop.permute.xlu0 %688  ;;  %v1367_v26 = vrot.slane %v1365_v11, 7  ;;  %v1011_v30 = vshrl.u32 %v10032_v51, 16  ;;  %10877 = vmatprep.mubr.msk.bf16.mxu0 %vm280_vm1, %v1363_v22 }
  0xaf   : > { %v12829_v29 = vsel %vm958_vm2, %v1005_v14, %v1009_v16  ;;  %v709_v32 = vrot.slane %v701_v24, %v12719_v54  ;;  %v697_v34 = vrot.slane %v689_v25, %v12719_v54  ;;  %v1015_v35 = vshll.u32 %v10033_v31, 16  ;;  %5406 = vperm.xlu1 %11990, %v5185_v17  }
  0xb0   : > { %15673 = vst [vmem:[#allocation7_spill] sm:$0xff] %v12829_v29  ;;  %5394 = vperm.xlu0 %11989, %v5184_v19   ;;  %v1370_v28 = vor.u32 %v1368_v21, %v1367_v26  ;;  %v1373_v36 = vshrl.u32 %v1108_v27, 16  ;;  %v1013_v37 = vor.u32 %v1011_v30, %v1009_v16  ;;  %v1109_v43 = vmul.bf16 %v12829_v29, %v12537_v48  ;;  %v5190_v30 = vld [vmem:[%s15587_s5 + $0x58] sm:$0xf] }
  0xb1   : > { %v10034_v39 = vcombine.low %v697_v34, %v709_v32  ;;  %v1017_v45 = vrot.slane %v1015_v35, 1  ;;  %v1376_v51 = vshll.u32 %v1108_v27, 16  ;;  %v1019_v52 = vshrl.u32 %v10033_v31, 16  ;;  %v5191_v27 = vld [vmem:[%s15587_s5 + $0x5c] sm:$0xf] }
  0xb2   : > { %v1371_v46 = vsel %vm1335_vm3, %v1359_v0, %v1370_v28  ;;  %v725_v33 = vpop.permute.xlu1 %724  ;;  %v713_v47 = vpop.permute.xlu0 %712  ;;  %v1375_v49 = vrot.slane %v1373_v36, 7  ;;  %v1381_v1 = vshrl.u32 %v1109_v43, 16  ;;  %v1384_v16 = vshll.u32 %v1109_v43, 16 }
  0xb3   : > { %v1023_v55 = vshll.u32 %v10034_v39, 16  ;;  %10878 = vmatmul.mubr.msk.bf16.gmra.mrb[4].mxu0 %vm280_vm1, %v1371_v46  ;;  %v733_v58 = vrot.slane %v725_v33, %v12719_v54  ;;  %v721_v59 = vrot.slane %v713_v47, %v12719_v54  ;;  %v12847_v61 = vsel %vm958_vm2, %v1013_v37, %v1017_v45  ;;  %5430 = vperm.xlu1 %11990, %v5187_v40  }
  0xb4   : > { %15674 = vst [vmem:[#allocation8_spill] sm:$0xff] %v12847_v61  ;;  %5418 = vperm.xlu0 %11989, %v5186_v41   ;;  %v1378_v48 = vor.u32 %v1376_v51, %v1375_v49  ;;  %v1021_v0 = vor.u32 %v1019_v52, %v1017_v45  ;;  %v1110_v8 = vmul.bf16 %v12847_v61, %v12540_v50  ;;  %v1383_v14 = vrot.slane %v1381_v1, 7  ;;  %v5193_v51 = vld [vmem:[%s15587_s5 + $0x64] sm:$0xf]  ;;  %v5192_v52 = vld [vmem:[%s15587_s5 + $0x60] sm:$0xf] }
  0xb5   : > { %v1025_v3 = vrot.slane %v1023_v55, 1  ;;  %v10035_v4 = vcombine.low %v721_v59, %v733_v58  ;;  %v1027_v19 = vshrl.u32 %v10034_v39, 16 }
  0xb6   : > { %v1379_v9 = vsel %vm1335_vm3, %v1367_v26, %v1378_v48  ;;  %v749_v10 = vpop.permute.xlu1 %748  ;;  %v737_v11 = vpop.permute.xlu0 %736  ;;  %v1386_v50 = vor.u32 %v1384_v16, %v1383_v14  ;;  %v1389_v24 = vshrl.u32 %v1110_v8, 16  ;;  %v1392_v39 = vshll.u32 %v1110_v8, 16 }
  0xb7   : > { %v12859_v17 = vsel %vm958_vm2, %v1021_v0, %v1025_v3  ;;  %v1031_v21 = vshll.u32 %v10035_v4, 16  ;;  %10881 = vmatprep.mubr.msk.bf16.mxu0 %vm280_vm1, %v1379_v9  ;;  %v757_v31 = vrot.slane %v749_v10, %v12719_v54  ;;  %v745_v22 = vrot.slane %v737_v11, %v12719_v54  ;;  %5454 = vperm.xlu1 %11990, %v5189_v53  }
  0xb8   : > { %5442 = vperm.xlu0 %11989, %v5188_v5   ;;  %v1029_v25 = vor.u32 %v1027_v19, %v1025_v3  ;;  %v1111_v32 = vmul.bf16 %v12859_v17, %v12567_v56  ;;  %v1387_v35 = vsel %vm1335_vm3, %v1375_v49, %v1386_v50  ;;  %v1391_v37 = vrot.slane %v1389_v24, 7  ;;  %v5195_v19 = vld [vmem:[%s15587_s5 + $0x6c] sm:$0xf] }
  0xb9   : > { %v1033_v26 = vrot.slane %v1031_v21, 1  ;;  %v10036_v34 = vcombine.low %v745_v22, %v757_v31  ;;  %v1035_v41 = vshrl.u32 %v10035_v4, 16  ;;  %v5194_v21 = vld [vmem:[%s15587_s5 + $0x68] sm:$0xf] }
  0xba   : > { %v773_v28 = vpop.permute.xlu1 %772  ;;  %v761_v36 = vpop.permute.xlu0 %760  ;;  %v1394_v56 = vor.u32 %v1392_v39, %v1391_v37  ;;  %v1397_v33 = vshrl.u32 %v1111_v32, 16  ;;  %v1400_v3 = vshll.u32 %v1111_v32, 16  ;;  %v5197_v39 = vld [vmem:[%s15587_s5 + $0x74] sm:$0xf] }
  0xbb   : > { %v12874_v40 = vsel %vm958_vm2, %v1029_v25, %v1033_v26  ;;  %10882 = vmatmul.mubr.msk.bf16.gmra.mrb[8].mxu0 %vm280_vm1, %v1387_v35  ;;  %v781_v43 = vrot.slane %v773_v28, %v12719_v54  ;;  %v769_v45 = vrot.slane %v761_v36, %v12719_v54  ;;  %v1039_v46 = vshll.u32 %v10036_v34, 16  ;;  %5478 = vperm.xlu1 %11990, %v5191_v27  }
  0xbc   : > { %5466 = vperm.xlu0 %11989, %v5190_v30   ;;  %v1037_v47 = vor.u32 %v1035_v41, %v1033_v26  ;;  %v1112_v55 = vmul.bf16 %v12874_v40, %v12569_v57  ;;  %v1395_v59 = vsel %vm1335_vm3, %v1383_v14, %v1394_v56  ;;  %v1399_v0 = vrot.slane %v1397_v33, 7  ;;  %v5196_v41 = vld [vmem:[%s15587_s5 + $0x70] sm:$0xf] }
  0xbd   : > { %v10037_v49 = vcombine.low %v769_v45, %v781_v43  ;;  %v1041_v58 = vrot.slane %v1039_v46, 1  ;;  %v1043_v4 = vshrl.u32 %v10036_v34, 16  ;;  %10885 = vmatprep.mubr.msk.bf16.mxu0 %vm280_vm1, %v1395_v59 }
  0xbe   : > { %v797_v48 = vpop.permute.xlu1 %796  ;;  %v785_v1 = vpop.permute.xlu0 %784  ;;  %v1402_v57 = vor.u32 %v1400_v3, %v1399_v0  ;;  %v1405_v10 = vshrl.u32 %v1112_v55, 16  ;;  %v1408_v26 = vshll.u32 %v1112_v55, 16  ;;  %v5199_v3 = vld [vmem:[%s15587_s5 + $0x7c] sm:$0xf] }
  0xbf   : > { %v1047_v53 = vshll.u32 %v10037_v49, 16  ;;  %v805_v5 = vrot.slane %v797_v48, %v12719_v54  ;;  %v793_v8 = vrot.slane %v785_v1, %v12719_v54  ;;  %v12892_v9 = vsel %vm958_vm2, %v1037_v47, %v1041_v58  ;;  %5502 = vperm.xlu1 %11990, %v5193_v51  }
  0xc0   : > { %5490 = vperm.xlu0 %11989, %v5192_v52   ;;  %v1045_v11 = vor.u32 %v1043_v4, %v1041_v58  ;;  %v1113_v31 = vmul.bf16 %v12892_v9, %v12587_v62  ;;  %v1403_v22 = vsel %vm1335_vm3, %v1391_v37, %v1402_v57  ;;  %v1407_v25 = vrot.slane %v1405_v10, 7  ;;  %v5198_v4 = vld [vmem:[%s15587_s5 + $0x78] sm:$0xf] }
  0xc1   : > { %v1049_v14 = vrot.slane %v1047_v53, 1  ;;  %v10038_v16 = vcombine.low %v793_v8, %v805_v5  ;;  %v1051_v30 = vshrl.u32 %v10037_v49, 16 }
  0xc2   : > { %v821_v50 = vpop.permute.xlu1 %820  ;;  %v809_v24 = vpop.permute.xlu0 %808  ;;  %v1410_v62 = vor.u32 %v1408_v26, %v1407_v25  ;;  %v1413_v28 = vshrl.u32 %v1113_v31, 16  ;;  %v1416_v49 = vshll.u32 %v1113_v31, 16 }
  0xc3   : > { %v12904_v27 = vsel %vm958_vm2, %v1045_v11, %v1049_v14  ;;  %v1055_v32 = vshll.u32 %v10038_v16, 16  ;;  %10886 = vmatmul.mubr.msk.bf16.gmra.mrb[12].mxu0 %vm280_vm1, %v1403_v22  ;;  %v829_v34 = vrot.slane %v821_v50, %v12719_v54  ;;  %v817_v35 = vrot.slane %v809_v24, %v12719_v54  ;;  %5526 = vperm.xlu1 %11990, %v5195_v19  }
  0xc4   : > { %5514 = vperm.xlu0 %11989, %v5194_v21   ;;  %v1053_v36 = vor.u32 %v1051_v30, %v1049_v14  ;;  %v1114_v43 = vmul.bf16 %v12904_v27, %v12589_v63  ;;  %v1411_v46 = vsel %vm1335_vm3, %v1399_v0, %v1410_v62  ;;  %v1415_v47 = vrot.slane %v1413_v28, 7  ;;  %v6406_v30 = vld [vmem:[%s15588_s6 + $0x4] sm:$0xf] }
  0xc5   : > { %v1057_v37 = vrot.slane %v1055_v32, 1  ;;  %v10039_v45 = vcombine.low %v817_v35, %v829_v34  ;;  %v1059_v52 = vshrl.u32 %v10038_v16, 16  ;;  %10889 = vmatprep.mubr.msk.bf16.mxu0 %vm280_vm1, %v1411_v46  ;;  %v6405_v32 = vld [vmem:[%s15588_s6] sm:$0xf] }
  0xc6   : > { %v845_v56 = vpop.permute.xlu1 %844  ;;  %v833_v33 = vpop.permute.xlu0 %832  ;;  %v1418_v63 = vor.u32 %v1416_v49, %v1415_v47  ;;  %v1421_v48 = vshrl.u32 %v1114_v43, 16  ;;  %v1424_v14 = vshll.u32 %v1114_v43, 16 }
  0xc7   : > { %v12919_v51 = vsel %vm958_vm2, %v1053_v36, %v1057_v37  ;;  %v853_v55 = vrot.slane %v845_v56, %v12719_v54  ;;  %v841_v58 = vrot.slane %v833_v33, %v12719_v54  ;;  %v1063_v59 = vshll.u32 %v10039_v45, 16  ;;  %5550 = vperm.xlu1 %11990, %v5197_v39  }
  0xc8   : > { %5538 = vperm.xlu0 %11989, %v5196_v41   ;;  %v1061_v1 = vor.u32 %v1059_v52, %v1057_v37  ;;  %v1115_v53 = vmul.bf16 %v12919_v51, %v12609_v6  ;;  %v1419_v8 = vsel %vm1335_vm3, %v1407_v25, %v1418_v63  ;;  %v1423_v11 = vrot.slane %v1421_v48, 7  ;;  %v6408_v52 = vld [vmem:[%s15588_s6 + $0xc] sm:$0xf] }
  0xc9   : > { %v10040_v0 = vcombine.low %v841_v58, %v853_v55  ;;  %v1065_v5 = vrot.slane %v1063_v59, 1  ;;  %v1067_v16 = vshrl.u32 %v10039_v45, 16  ;;  %v6407_v55 = vld [vmem:[%s15588_s6 + $0x8] sm:$0xf] }
  0xca   : > { %v869_v57 = vpop.permute.xlu1 %868  ;;  %v857_v10 = vpop.permute.xlu0 %856  ;;  %v1426_v6 = vor.u32 %v1424_v14, %v1423_v11  ;;  %v1429_v50 = vshrl.u32 %v1115_v53, 16  ;;  %v1432_v37 = vshll.u32 %v1115_v53, 16  ;;  %v6409_v14 = vld [vmem:[%s15588_s6 + $0x10] sm:$0xf] }
  0xcb   : > { %v1071_v19 = vshll.u32 %v10040_v0, 16  ;;  %10890 = vmatmul.mubr.msk.bf16.gmra.mrb[16].mxu0 %vm280_vm1, %v1419_v8  ;;  %v877_v21 = vrot.slane %v869_v57, %v12719_v54  ;;  %v865_v31 = vrot.slane %v857_v10, %v12719_v54  ;;  %v12937_v22 = vsel %vm958_vm2, %v1061_v1, %v1065_v5  ;;  %5574 = vperm.xlu1 %11990, %v5199_v3  }
  0xcc   : > { %5562 = vperm.xlu0 %11989, %v5198_v4   ;;  %v1069_v24 = vor.u32 %v1067_v16, %v1065_v5  ;;  %v1116_v34 = vmul.bf16 %v12937_v22, %v12611_v7  ;;  %v1427_v35 = vsel %vm1335_vm3, %v1415_v47, %v1426_v6  ;;  %v1431_v36 = vrot.slane %v1429_v50, 7 }
  0xcd   : > { %v1073_v25 = vrot.slane %v1071_v19, 1  ;;  %v10041_v26 = vcombine.low %v865_v31, %v877_v21  ;;  %v1075_v41 = vshrl.u32 %v10040_v0, 16  ;;  %10893 = vmatprep.mubr.msk.bf16.mxu0 %vm280_vm1, %v1427_v35  ;;  %v6412_v35 = vld [vmem:[%s15588_s6 + $0x1c] sm:$0xf] }
  0xce   : > { %v1744_v62 = vpop.permute.xlu1 %1743  ;;  %v1732_v28 = vpop.permute.xlu0 %1731  ;;  %v1434_v7 = vor.u32 %v1432_v37, %v1431_v36  ;;  %v1437_v56 = vshrl.u32 %v1116_v34, 16  ;;  %v1440_v10 = vshll.u32 %v1116_v34, 16 }
  0xcf   : > { %v12949_v39 = vsel %vm958_vm2, %v1069_v24, %v1073_v25  ;;  %v1079_v43 = vshll.u32 %v10041_v26, 16  ;;  %v1752_v45 = vrot.slane %v1744_v62, %v12719_v54  ;;  %v1740_v46 = vrot.slane %v1732_v28, %v12719_v54  ;;  %6451 = vperm.xlu1 %11990, %v6406_v30  }
  0xd0   : > { %6439 = vperm.xlu0 %11989, %v6405_v32   ;;  %v1077_v33 = vor.u32 %v1075_v41, %v1073_v25  ;;  %v1083_v49 = vshrl.u32 %v10041_v26, 16  ;;  %v1435_v59 = vsel %vm1335_vm3, %v1423_v11, %v1434_v7  ;;  %v1439_v1 = vrot.slane %v1437_v56, 7  ;;  %v12267_v56 = vld [vmem:[#allocation2 + $0x8] sm:$0xff] }
  0xd1   : > { %v1081_v47 = vrot.slane %v1079_v43, 1  ;;  %v10074_v58 = vcombine.low %v1740_v46, %v1752_v45  ;;  %v1117_v0 = vmul.bf16 %v12949_v39, %v12629_v12  ;;  %v6410_v12 = vld [vmem:[%s15588_s6 + $0x14] sm:$0xf] }
  0xd2   : > { %v1768_v63 = vpop.permute.xlu1 %1767  ;;  %v1756_v48 = vpop.permute.xlu0 %1755  ;;  %v1442_v21 = vor.u32 %v1440_v10, %v1439_v1 }
  0xd3   : > { %v12964_v3 = vsel %vm958_vm2, %v1077_v33, %v1081_v47  ;;  %10894 = vmatmul.mubr.msk.bf16.gmra.mrb[20].mxu0 %vm280_vm1, %v1435_v59  ;;  %v1776_v4 = vrot.slane %v1768_v63, %v12719_v54  ;;  %v1764_v53 = vrot.slane %v1756_v48, %v12719_v54  ;;  %v12969_v5 = vor.u32 %v1083_v49, %v1081_v47  ;;  %v6414_v63 = vld [vmem:[%s15588_s6 + $0x24] sm:$0xf] }
  0xd4   : > { %v1118_v8 = vmul.bf16 %v12964_v3, %v12631_v13  ;;  %v2194_v57 = vshrl.u32 %v10074_v58, 16  ;;  %6475 = vperm.xlu1 %11990, %v6408_v52   ;;  %6463 = vperm.xlu0 %11989, %v6407_v55   ;;  %v2197_v11 = vshll.u32 %v10074_v58, 16  ;;  %v1445_v50 = vshrl.u32 %v1117_v0, 16 }
  0xd5   : > { %v10075_v19 = vcombine.low %v1764_v53, %v1776_v4  ;;  %v1119_v26 = vmul.bf16 %v12969_v5, %v12649_v18  ;;  %v1443_v34 = vsel %vm1335_vm3, %v1431_v36, %v1442_v21  ;;  %v1448_v37 = vshll.u32 %v1117_v0, 16  ;;  %v6411_v18 = vld [vmem:[%s15588_s6 + $0x18] sm:$0xf] }
  0xd6   : > { %v2196_v16 = vrot.slane %v2194_v57, 7  ;;  %v1792_v31 = vpop.permute.xlu1 %1791  ;;  %v1780_v6 = vpop.permute.xlu0 %1779  ;;  %v1453_v25 = vshrl.u32 %v1118_v8, 16  ;;  %10897 = vmatprep.mubr.msk.bf16.mxu0 %vm280_vm1, %v1443_v34  ;;  %v1447_v28 = vrot.slane %v1445_v50, 7  ;;  %v1456_v7 = vshll.u32 %v1118_v8, 16  ;;  %v6413_v8 = vld [vmem:[%s15588_s6 + $0x20] sm:$0xf] }
  0xd7   : > { %v1800_v13 = vrot.slane %v1792_v31, %v12719_v54  ;;  %v1788_v24 = vrot.slane %v1780_v6, %v12719_v54  ;;  %v2201_v32 = vshrl.u32 %v10075_v19, 16  ;;  %v2204_v45 = vshll.u32 %v10075_v19, 16  ;;  %v13013_v31 = vld [vmem:[#allocation2 + $0x10] sm:$0xff]  ;;  %v6416_v34 = vld [vmem:[%s15588_s6 + $0x2c] sm:$0xf] }
  0xd8   : > { %v12983_v30 = vor.u32 %v2197_v11, %v2196_v16  ;;  %6499 = vperm.xlu1 %11990, %v6410_v12   ;;  %6487 = vperm.xlu0 %11989, %v6409_v14   ;;  %v12993_v41 = vrot.slane %v1453_v25, 7  ;;  %v1450_v49 = vor.u32 %v1448_v37, %v1447_v28  ;;  %v1461_v48 = vshrl.u32 %v1119_v26, 16 }
  0xd9   : > { %v10076_v62 = vcombine.low %v1788_v24, %v1800_v13  ;;  %v2203_v43 = vrot.slane %v2201_v32, 7  ;;  %v1464_v57 = vshll.u32 %v1119_v26, 16 }
  0xda   : > { %v1816_v36 = vpop.permute.xlu1 %1815  ;;  %v1804_v46 = vpop.permute.xlu0 %1803  ;;  %v12996_v33 = vmul.bf16 %v12267_v56, %v12983_v30  ;;  %v1458_v59 = vor.u32 %v1456_v7, %v12993_v41  ;;  %v1451_v53 = vsel %vm1335_vm3, %v1439_v1, %v1450_v49  ;;  %v1463_v21 = vrot.slane %v1461_v48, 7 }
  0xdb   : > { %v2209_v47 = vshrl.u32 %v10076_v62, 16  ;;  %v1824_v52 = vrot.slane %v1816_v36, %v12719_v54  ;;  %v2206_v55 = vor.u32 %v2204_v45, %v2203_v43  ;;  %v1812_v58 = vrot.slane %v1804_v46, %v12719_v54  ;;  %10898 = vmatmul.mubr.msk.bf16.gmra.mrb[24].mxu0 %vm280_vm1, %v1451_v53 }
  0xdc   : > { %6523 = vperm.xlu1 %11990, %v6412_v35   ;;  %6511 = vperm.xlu0 %11989, %v6411_v18   ;;  %v2212_v4 = vshll.u32 %v10076_v62, 16  ;;  %v1459_v12 = vsel %vm1335_vm3, %v1447_v28, %v1458_v59  ;;  %v2358_v24 = vshll.u32 %v12996_v33, 16  ;;  %v1466_v32 = vor.u32 %v1464_v57, %v1463_v21  ;;  %v6415_v35 = vld [vmem:[%s15588_s6 + $0x28] sm:$0xf]  ;;  %v13030_v28 = vld [vmem:[#allocation2 + $0x18] sm:$0xff] }
  0xdd   : > { %v2211_v0 = vrot.slane %v2209_v47, 7  ;;  %v13009_v10 = vsel %vm1335_vm3, %v2196_v16, %v2206_v55  ;;  %v10077_v11 = vcombine.low %v1812_v58, %v1824_v52  ;;  %10901 = vmatprep.mubr.msk.bf16.mxu0 %vm280_vm1, %v1459_v12  ;;  %v2356_v56 = vshrl.u32 %v12996_v33, 16  ;;  %v6418_v58 = vld [vmem:[%s15588_s6 + $0x34] sm:$0xf]  ;;  %v6417_v33 = vld [vmem:[%s15588_s6 + $0x30] sm:$0xf] }
  0xde   : > { %v1840_v14 = vpop.permute.xlu1 %1839  ;;  %v1828_v19 = vpop.permute.xlu0 %1827  ;;  %v2338_v16 = vmul.bf16 %v13009_v10, %v13013_v31  ;;  %v2360_v52 = vrot.slane %v2358_v24, 1  ;;  %v1467_v48 = vsel %vm1335_vm3, %v12993_v41, %v1466_v32 }
  0xdf   : > { %v2214_v6 = vor.u32 %v2212_v4, %v2211_v0  ;;  %v1848_v1 = vrot.slane %v1840_v14, %v12719_v54  ;;  %v1836_v50 = vrot.slane %v1828_v19, %v12719_v54  ;;  %v2217_v13 = vshrl.u32 %v10077_v11, 16 }
  0xe0   : > { %6547 = vperm.xlu1 %11990, %v6414_v63   ;;  %6535 = vperm.xlu0 %11989, %v6413_v8   ;;  %v2363_v62 = vshll.u32 %v2338_v16, 16  ;;  %v2220_v45 = vshll.u32 %v10077_v11, 16  ;;  %v2361_v57 = vor.u32 %v2360_v52, %v2356_v56  ;;  %v2367_v11 = vshrl.u32 %v2338_v16, 16 }
  0xe1   : > { %v13022_v25 = vsel %vm1335_vm3, %v2203_v43, %v2214_v6  ;;  %v10078_v26 = vcombine.low %v1836_v50, %v1848_v1  ;;  %v2219_v18 = vrot.slane %v2217_v13, 7  ;;  %v13051_v1 = vld [vmem:[#allocation2 + $0x20] sm:$0xff] }
  0xe2   : > { %v2339_v37 = vmul.bf16 %v13030_v28, %v13022_v25  ;;  %v1864_v43 = vpop.permute.xlu1 %1863  ;;  %v1852_v36 = vpop.permute.xlu0 %1851  ;;  %v2365_v55 = vrot.slane %v2363_v62, 1 }
  0xe3   : > { %v2225_v46 = vshrl.u32 %v10078_v26, 16  ;;  %v1872_v7 = vrot.slane %v1864_v43, %v12719_v54  ;;  %v2222_v47 = vor.u32 %v2220_v45, %v2219_v18  ;;  %v1860_v49 = vrot.slane %v1852_v36, %v12719_v54  ;;  %10902 = vmatmul.mubr.msk.bf16.gmra.mrb[28].mxu0 %vm280_vm1, %v1467_v48 }
  0xe4   : > { %6571 = vperm.xlu1 %11990, %v6416_v34   ;;  %6559 = vperm.xlu0 %11989, %v6415_v35   ;;  %v2228_v63 = vshll.u32 %v10078_v26, 16  ;;  %v2371_v4 = vshll.u32 %v2339_v37, 16  ;;  %v2366_v13 = vsel %vm958_vm2, %v2361_v57, %v2365_v55  ;;  %v2369_v26 = vor.u32 %v2367_v11, %v2365_v55  ;;  %v6420_v34 = vld [vmem:[%s15588_s6 + $0x3c] sm:$0xf]  ;;  %v6419_v35 = vld [vmem:[%s15588_s6 + $0x38] sm:$0xf] }
  0xe5   : > { %v2227_v59 = vrot.slane %v2225_v46, 7  ;;  %v13046_v53 = vsel %vm1335_vm3, %v2211_v0, %v2222_v47  ;;  %v10079_v8 = vcombine.low %v1860_v49, %v1872_v7  ;;  %v2932_v0 = vsel %vm1170_vm0, %v12809_v20, 0  ;;  %10907 = vmatprep.mubr.msk.bf16.mxu0 %vm280_vm1, %v2366_v13  ;;  %v13068_v20 = vld [vmem:[#allocation2 + $0x28] sm:$0xff]  ;;  %v6421_v57 = vld [vmem:[%s15588_s6 + $0x40] sm:$0xf] }
  0xe6   : > { %v1888_v12 = vpop.permute.xlu1 %1887  ;;  %v1876_v14 = vpop.permute.xlu0 %1875  ;;  %v2373_v6 = vrot.slane %v2371_v4, 1  ;;  %v2340_v16 = vmul.bf16 %v13046_v53, %v13051_v1  ;;  %v2375_v62 = vshrl.u32 %v2339_v37, 16 }
  0xe7   : > { %v2230_v19 = vor.u32 %v2228_v63, %v2227_v59  ;;  %v1896_v21 = vrot.slane %v1888_v12, %v12719_v54  ;;  %v1884_v41 = vrot.slane %v1876_v14, %v12719_v54  ;;  %v2233_v50 = vshrl.u32 %v10079_v8, 16 }
  0xe8   : > { %6595 = vperm.xlu1 %11990, %v6418_v58   ;;  %6583 = vperm.xlu0 %11989, %v6417_v33   ;;  %v2236_v43 = vshll.u32 %v10079_v8, 16  ;;  %v2379_v46 = vshll.u32 %v2340_v16, 16  ;;  %v2374_v47 = vsel %vm958_vm2, %v2369_v26, %v2373_v6  ;;  %v2377_v37 = vor.u32 %v2375_v62, %v2373_v6  ;;  %v6422_v8 = vld [vmem:[%s15588_s6 + $0x44] sm:$0xf]  ;;  %v13093_v26 = vld [vmem:[#allocation2 + $0x30] sm:$0xff] }
  0xe9   : > { %v13059_v24 = vsel %vm1335_vm3, %v2219_v18, %v2230_v19  ;;  %v10080_v32 = vcombine.low %v1884_v41, %v1896_v21  ;;  %v2235_v45 = vrot.slane %v2233_v50, 7  ;;  %v2383_v21 = vshrl.u32 %v2340_v16, 16  ;;  %v13089_v41 = vld [vmem:[%s15583_s1 + $0x10] sm:$0xf] }
  0xea   : > { %v1912_v36 = vpop.permute.xlu1 %1911  ;;  %v1900_v18 = vpop.permute.xlu0 %1899  ;;  %v2341_v7 = vmul.bf16 %v13059_v24, %v13068_v20  ;;  %v2381_v58 = vrot.slane %v2379_v46, 1 }
  0xeb   : > { %v2241_v56 = vshrl.u32 %v10080_v32, 16  ;;  %v1920_v49 = vrot.slane %v1912_v36, %v12719_v54  ;;  %v1908_v52 = vrot.slane %v1900_v18, %v12719_v54  ;;  %v2238_v55 = vor.u32 %v2236_v43, %v2235_v45  ;;  %10908 = vmatmul.mubr.msk.bf16.vlgmr.msra.gmra.mrb[0].mxu0 %vm280_vm1, %v2374_v47  ;;  %v6424_v36 = vld [vmem:[%s15588_s6 + $0x4c] sm:$0xf]  ;;  %v6423_v18 = vld [vmem:[%s15588_s6 + $0x48] sm:$0xf] }
  0xec   : > { %6619 = vperm.xlu1 %11990, %v6420_v34   ;;  %6607 = vperm.xlu0 %11989, %v6419_v35   ;;  %v2387_v63 = vshll.u32 %v2341_v7, 16  ;;  %v2244_v33 = vshll.u32 %v10080_v32, 16  ;;  %v2382_v12 = vsel %vm958_vm2, %v2377_v37, %v2381_v58  ;;  %v13098_v34 = vld [vmem:[#allocation2 + $0x38] sm:$0xff]  ;;  %v2385_v43 = vor.u32 %v2383_v21, %v2381_v58 }
  0xed   : > { %v2243_v48 = vrot.slane %v2241_v56, 7  ;;  %v10081_v4 = vcombine.low %v1908_v52, %v1920_v49  ;;  %v13082_v11 = vsel %vm1335_vm3, %v2227_v59, %v2238_v55  ;;  %10940 = vmatpush3.bf16.msra.mxu0 %v2932_v0  ;;  %10911 = vmatprep.mubr.msk.bf16.mxu0 %vm280_vm1, %v2382_v12 }
  0xee   : > { %v1936_v14 = vpop.permute.xlu1 %1935  ;;  %v1924_v19 = vpop.permute.xlu0 %1923  ;;  %v2389_v13 = vrot.slane %v2387_v63, 1  ;;  %v2342_v16 = vmul.bf16 %v13082_v11, %v13093_v26  ;;  %11965 = vmatprep.subr.msk.bf16.mxu0 %vm1170_vm0, %v13089_v41 }
  0xef   : > { %v2246_v6 = vor.u32 %v2244_v33, %v2243_v48  ;;  %v2249_v50 = vshrl.u32 %v10081_v4, 16  ;;  %v1944_v59 = vrot.slane %v1936_v14, %v12719_v54  ;;  %v1932_v32 = vrot.slane %v1924_v19, %v12719_v54  ;;  %v6426_v14 = vld [vmem:[%s15588_s6 + $0x54] sm:$0xf]  ;;  %v6425_v19 = vld [vmem:[%s15588_s6 + $0x50] sm:$0xf] }
  0xf0   : > { %6643 = vperm.xlu1 %11990, %v6422_v8   ;;  %6631 = vperm.xlu0 %11989, %v6421_v57   ;;  %v2252_v62 = vshll.u32 %v10081_v4, 16  ;;  %v2395_v49 = vshll.u32 %v2342_v16, 16  ;;  %v2390_v37 = vsel %vm958_vm2, %v2385_v43, %v2389_v13 }
  0xf1   : > { %v13101_v35 = vsel %vm1335_vm3, %v2235_v45, %v2246_v6  ;;  %v13103_v0 = vrot.slane %v2249_v50, 7  ;;  %v10082_v46 = vcombine.low %v1932_v32, %v1944_v59  ;;  %v2391_v45 = vshrl.u32 %v2341_v7, 16 }
  0xf2   : > { %15675 = vst [vmem:[#allocation9_spill] sm:$0xff] %v13101_v35  ;;  %v1960_v56 = vpop.permute.xlu1 %1959  ;;  %v1948_v47 = vpop.permute.xlu0 %1947  ;;  %v13115_v52 = vmul.bf16 %v13101_v35, %v13098_v34  ;;  %v2397_v8 = vrot.slane %v2395_v49, 1  ;;  %v2399_v32 = vshrl.u32 %v2342_v16, 16 }
  0xf3   : > { %v2254_v55 = vor.u32 %v2252_v62, %v13103_v0  ;;  %v1968_v58 = vrot.slane %v1960_v56, %v12719_v54  ;;  %v1956_v63 = vrot.slane %v1948_v47, %v12719_v54  ;;  %v2257_v33 = vshrl.u32 %v10082_v46, 16  ;;  %10912 = vmatmul.mubr.msk.bf16.gmra.mrb[4].mxu0 %vm280_vm1, %v2390_v37  ;;  %v6427_v37 = vld [vmem:[%s15588_s6 + $0x58] sm:$0xf] }
  0xf4   : > { %6667 = vperm.xlu1 %11990, %v6424_v36   ;;  %6655 = vperm.xlu0 %11989, %v6423_v18   ;;  %v2393_v4 = vor.u32 %v2391_v45, %v2389_v13  ;;  %v2403_v7 = vshll.u32 %v13115_v52, 16  ;;  %v2260_v6 = vshll.u32 %v10082_v46, 16  ;;  %v13136_v18 = vld [vmem:[#allocation2 + $0x40] sm:$0xff]  ;;  %v2401_v49 = vor.u32 %v2399_v32, %v2397_v8 }
  0xf5   : > { %v13123_v57 = vsel %vm1335_vm3, %v2243_v48, %v2254_v55  ;;  %v10083_v12 = vcombine.low %v1956_v63, %v1968_v58  ;;  %v2259_v21 = vrot.slane %v2257_v33, 7  ;;  %v6428_v55 = vld [vmem:[%s15588_s6 + $0x5c] sm:$0xf] }
  0xf6   : > { %15676 = vst [vmem:[#allocation10_spill] sm:$0xff] %v13123_v57  ;;  %v2398_v50 = vsel %vm958_vm2, %v2393_v4, %v2397_v8  ;;  %v1984_v59 = vpop.permute.xlu1 %1983  ;;  %v1972_v13 = vpop.permute.xlu0 %1971  ;;  %v2405_v36 = vrot.slane %v2403_v7, 1  ;;  %v13140_v46 = vmul.bf16 %v13123_v57, %v13136_v18  ;;  %v2407_v4 = vshrl.u32 %v13115_v52, 16 }
  0xf7   : > { %v2265_v48 = vshrl.u32 %v10083_v12, 16  ;;  %10915 = vmatprep.mubr.msk.bf16.mxu0 %vm280_vm1, %v2398_v50  ;;  %v1992_v62 = vrot.slane %v1984_v59, %v12719_v54  ;;  %v1980_v43 = vrot.slane %v1972_v13, %v12719_v54  ;;  %v2262_v56 = vor.u32 %v2260_v6, %v2259_v21  ;;  %v13199_v6 = vld [vmem:[#allocation2 + $0x48] sm:$0xff] }
  0xf8   : > { %6691 = vperm.xlu1 %11990, %v6426_v14   ;;  %6679 = vperm.xlu0 %11989, %v6425_v19   ;;  %v2268_v16 = vshll.u32 %v10083_v12, 16  ;;  %v2411_v8 = vshll.u32 %v13140_v46, 16  ;;  %v2406_v14 = vsel %vm958_vm2, %v2401_v49, %v2405_v36 }
  0xf9   : > { %v13142_v47 = vrot.slane %v2265_v48, 7  ;;  %v10084_v45 = vcombine.low %v1980_v43, %v1992_v62  ;;  %v13192_v58 = vsel %vm1335_vm3, %v13103_v0, %v2262_v56  ;;  %v2409_v0 = vor.u32 %v2407_v4, %v2405_v36  ;;  %v6430_v48 = vld [vmem:[%s15588_s6 + $0x64] sm:$0xf]  ;;  %v6429_v62 = vld [vmem:[%s15588_s6 + $0x60] sm:$0xf] }
  0xfa   : > { %15677 = vst [vmem:[#allocation11_spill] sm:$0xff] %v13192_v58  ;;  %v2008_v63 = vpop.permute.xlu1 %2007  ;;  %v1996_v33 = vpop.permute.xlu0 %1995  ;;  %v2413_v50 = vrot.slane %v2411_v8, 1  ;;  %v2345_v52 = vmul.bf16 %v13192_v58, %v13199_v6 }
  0xfb   : > { %v2270_v7 = vor.u32 %v2268_v16, %v13142_v47  ;;  %v2273_v12 = vshrl.u32 %v10084_v45, 16  ;;  %v2016_v19 = vrot.slane %v2008_v63, %v12719_v54  ;;  %v2004_v2 = vrot.slane %v1996_v33, %v12719_v54  ;;  %10916 = vmatmul.mubr.msk.bf16.gmra.mrb[8].mxu0 %vm280_vm1, %v2406_v14  ;;  %v6432_v14 = vld [vmem:[%s15588_s6 + $0x6c] sm:$0xf] }
  0xfc   : > { %6715 = vperm.xlu1 %11990, %v6428_v55   ;;  %6703 = vperm.xlu0 %11989, %v6427_v37   ;;  %v2276_v32 = vshll.u32 %v10084_v45, 16  ;;  %v2414_v36 = vsel %vm958_vm2, %v2409_v0, %v2413_v50  ;;  %v2419_v49 = vshll.u32 %v2345_v52, 16  ;;  %v13216_v55 = vld [vmem:[#allocation2 + $0x50] sm:$0xff]  ;;  %v13233_v0 = vld [vmem:[#allocation2 + $0x58] sm:$0xff] }
  0xfd   : > { %v13205_v59 = vsel %vm1335_vm3, %v2259_v21, %v2270_v7  ;;  %v2275_v13 = vrot.slane %v2273_v12, 7  ;;  %v10085_v43 = vcombine.low %v2004_v2, %v2016_v19  ;;  %v2415_v21 = vshrl.u32 %v13140_v46, 16  ;;  %10919 = vmatprep.mubr.msk.bf16.mxu0 %vm280_vm1, %v2414_v36  ;;  %v6431_v19 = vld [vmem:[%s15588_s6 + $0x68] sm:$0xf] }
  0xfe   : > { %15678 = vst [vmem:[#allocation12_spill] sm:$0xff] %v13205_v59  ;;  %v2032_v56 = vpop.permute.xlu1 %2031  ;;  %v2020_v16 = vpop.permute.xlu0 %2019  ;;  %v2346_v33 = vmul.bf16 %v13205_v59, %v13216_v55  ;;  %v2421_v8 = vrot.slane %v2419_v49, 1 }
  0xff   : > { %v2278_v45 = vor.u32 %v2276_v32, %v2275_v13  ;;  %v2040_v37 = vrot.slane %v2032_v56, %v12719_v54  ;;  %v2028_v63 = vrot.slane %v2020_v16, %v12719_v54  ;;  %v2281_v4 = vshrl.u32 %v10085_v43, 16 }
 0x100   : > { %6739 = vperm.xlu1 %11990, %v6430_v48   ;;  %6727 = vperm.xlu0 %11989, %v6429_v62   ;;  %v2417_v12 = vor.u32 %v2415_v21, %v2413_v50  ;;  %v2427_v2 = vshll.u32 %v2346_v33, 16  ;;  %v2284_v48 = vshll.u32 %v10085_v43, 16  ;;  %v2423_v56 = vshrl.u32 %v2345_v52, 16  ;;  %v6434_v52 = vld [vmem:[%s15588_s6 + $0x74] sm:$0xf] }
 0x101   : > { %v13225_v46 = vsel %vm1335_vm3, %v13142_v47, %v2278_v45  ;;  %v10086_v7 = vcombine.low %v2028_v63, %v2040_v37  ;;  %v2283_v32 = vrot.slane %v2281_v4, 7 }
 0x102   : > { %15679 = vst [vmem:[#allocation13_spill] sm:$0xff] %v13225_v46  ;;  %v2056_v62 = vpop.permute.xlu1 %2055  ;;  %v2044_v36 = vpop.permute.xlu0 %2043  ;;  %v2347_v47 = vmul.bf16 %v13225_v46, %v13233_v0  ;;  %v2422_v16 = vsel %vm958_vm2, %v2417_v12, %v2421_v8  ;;  %v2425_v37 = vor.u32 %v2423_v56, %v2421_v8  ;;  %v2429_v63 = vrot.slane %v2427_v2, 1  ;;  %v6433_v12 = vld [vmem:[%s15588_s6 + $0x70] sm:$0xf] }
 0x103   : > { %v2289_v50 = vshrl.u32 %v10086_v7, 16  ;;  %v2064_v21 = vrot.slane %v2056_v62, %v12719_v54  ;;  %v2052_v49 = vrot.slane %v2044_v36, %v12719_v54  ;;  %v2286_v45 = vor.u32 %v2284_v48, %v2283_v32  ;;  %10920 = vmatmul.mubr.msk.bf16.gmra.mrb[12].mxu0 %vm280_vm1, %v2422_v16  ;;  %v13258_v16 = vld [vmem:[#allocation2 + $0x68] sm:$0xff] }
 0x104   : > { %6763 = vperm.xlu1 %11990, %v6432_v14   ;;  %6751 = vperm.xlu0 %11989, %v6431_v19   ;;  %v2435_v4 = vshll.u32 %v2347_v47, 16  ;;  %v2292_v59 = vshll.u32 %v10086_v7, 16  ;;  %v2430_v8 = vsel %vm958_vm2, %v2425_v37, %v2429_v63  ;;  %v2431_v2 = vshrl.u32 %v2346_v33, 16  ;;  %v6436_v37 = vld [vmem:[%s15588_s6 + $0x7c] sm:$0xf] }
 0x105   : > { %v2291_v43 = vrot.slane %v2289_v50, 7  ;;  %v10087_v58 = vcombine.low %v2052_v49, %v2064_v21  ;;  %v13247_v62 = vsel %vm1335_vm3, %v2275_v13, %v2286_v45  ;;  %10923 = vmatprep.mubr.msk.bf16.mxu0 %vm280_vm1, %v2430_v8  ;;  %v13253_v50 = vld [vmem:[#allocation2 + $0x60] sm:$0xff] }
 0x106   : > { %15680 = vst [vmem:[#allocation14_spill] sm:$0xff] %v13247_v62  ;;  %v2080_v14 = vpop.permute.xlu1 %2079  ;;  %v2068_v19 = vpop.permute.xlu0 %2067  ;;  %v2437_v56 = vrot.slane %v2435_v4, 1  ;;  %v2348_v13 = vmul.bf16 %v13247_v62, %v13253_v50  ;;  %v2433_v45 = vor.u32 %v2431_v2, %v2429_v63  ;;  %v6435_v4 = vld [vmem:[%s15588_s6 + $0x78] sm:$0xf] }
 0x107   : > { %v2294_v7 = vor.u32 %v2292_v59, %v2291_v43  ;;  %v2297_v48 = vshrl.u32 %v10087_v58, 16  ;;  %v2088_v36 = vrot.slane %v2080_v14, %v12719_v54  ;;  %v2076_v21 = vrot.slane %v2068_v19, %v12719_v54 }
 0x108   : > { %6787 = vperm.xlu1 %11990, %v6434_v52   ;;  %6775 = vperm.xlu0 %11989, %v6433_v12   ;;  %v2300_v49 = vshll.u32 %v10087_v58, 16  ;;  %v2439_v14 = vshrl.u32 %v2347_v47, 16  ;;  %v2443_v19 = vshll.u32 %v2348_v13, 16  ;;  %v2438_v58 = vsel %vm958_vm2, %v2433_v45, %v2437_v56 }
 0x109   : > { %v13261_v33 = vsel %vm1335_vm3, %v2283_v32, %v2294_v7  ;;  %v2299_v59 = vrot.slane %v2297_v48, 7  ;;  %v10088_v52 = vcombine.low %v2076_v21, %v2088_v36 }
 0x10a   : > { %15681 = vst [vmem:[#allocation15_spill] sm:$0xff] %v13261_v33  ;;  %v2104_v12 = vpop.permute.xlu1 %2103  ;;  %v2092_v8 = vpop.permute.xlu0 %2091  ;;  %v2349_v32 = vmul.bf16 %v13261_v33, %v13258_v16  ;;  %v2441_v62 = vor.u32 %v2439_v14, %v2437_v56  ;;  %v2445_v46 = vrot.slane %v2443_v19, 1 }
 0x10b   : > { %v2302_v7 = vor.u32 %v2300_v49, %v2299_v59  ;;  %v2112_v63 = vrot.slane %v2104_v12, %v12719_v54  ;;  %v2100_v2 = vrot.slane %v2092_v8, %v12719_v54  ;;  %v2305_v48 = vshrl.u32 %v10088_v52, 16  ;;  %10924 = vmatmul.mubr.msk.bf16.gmra.mrb[16].mxu0 %vm280_vm1, %v2438_v58 }
 0x10c   : > { %6811 = vperm.xlu1 %11990, %v6436_v37   ;;  %6799 = vperm.xlu0 %11989, %v6435_v4   ;;  %v2451_v36 = vshll.u32 %v2349_v32, 16  ;;  %v2308_v35 = vshll.u32 %v10088_v52, 16  ;;  %v2446_v49 = vsel %vm958_vm2, %v2441_v62, %v2445_v46  ;;  %v2447_v12 = vshrl.u32 %v2348_v13, 16  ;;  %v13280_v37 = vld [vmem:[#allocation2 + $0x70] sm:$0xff] }
 0x10d   : > { %v13275_v21 = vsel %vm1335_vm3, %v2291_v43, %v2302_v7  ;;  %v10089_v47 = vcombine.low %v2100_v2, %v2112_v63  ;;  %v2307_v57 = vrot.slane %v2305_v48, 7  ;;  %10927 = vmatprep.mubr.msk.bf16.mxu0 %vm280_vm1, %v2446_v49  ;;  %v2455_v7 = vshrl.u32 %v2349_v32, 16  ;;  %v13291_v63 = vld [vmem:[#allocation2 + $0x78] sm:$0xff]  ;;  %v13303_v49 = vld [vmem:[#allocation2 + $0x80] sm:$0xff] }
 0x10e   : > { %15682 = vst [vmem:[#allocation16_spill] sm:$0xff] %v13275_v21  ;;  %v2453_v8 = vrot.slane %v2451_v36, 1  ;;  %v2350_v4 = vmul.bf16 %v13275_v21, %v13280_v37  ;;  %v2449_v19 = vor.u32 %v2447_v12, %v2445_v46  ;;  %v2734_v32 = vmul.bf16 %v13013_v31, %v12755_v42 }
 0x10f   : > { %v2313_v45 = vshrl.u32 %v10089_v47, 16  ;;  %v2310_v56 = vor.u32 %v2308_v35, %v2307_v57  ;;  %v2316_v14 = vshll.u32 %v10089_v47, 16 }
 0x110   : > { %v2459_v62 = vshll.u32 %v2350_v4, 16  ;;  %v2454_v13 = vsel %vm958_vm2, %v2449_v19, %v2453_v8  ;;  %v2457_v2 = vor.u32 %v2455_v7, %v2453_v8  ;;  %v2463_v47 = vshrl.u32 %v2350_v4, 16  ;;  %v1696_v8 = vld [vmem:[#allocation2 + $0x88] sm:$0x1]  ;;  %v2731_v19 = vld [vmem:[#allocation2 + $0x8] sm:$0x80] }
 0x111   : > { %v13284_v43 = vrot.slane %v2313_v45, 7  ;;  %v13287_v52 = vsel %vm1335_vm3, %v2299_v59, %v2310_v56  ;;  %v2756_v7 = vshrl.u32 %v2734_v32, 16  ;;  %v2733_v4 = vmul.bf16 %v2731_v19, %v12742_v23 }
 0x112   : > { %15684 = vst [vmem:[#allocation18_spill] sm:$0xff] %v13287_v52  ;;  %v2461_v35 = vrot.slane %v2459_v62, 1  ;;  %v2351_v48 = vmul.bf16 %v13287_v52, %v13291_v63 }
 0x113   : > { %15683 = vst [vmem:[#allocation17_spill] sm:$0xff] %v13284_v43  ;;  %v2318_v58 = vor.u32 %v2316_v14, %v13284_v43  ;;  %10928 = vmatmul.mubr.msk.bf16.gmra.mrb[20].mxu0 %vm280_vm1, %v2454_v13 }
 0x114   : > { %v2462_v46 = vsel %vm958_vm2, %v2457_v2, %v2461_v35  ;;  %v2467_v59 = vshll.u32 %v2351_v48, 16  ;;  %v2471_v56 = vshrl.u32 %v2351_v48, 16  ;;  %v2353_v2 = vmul.bf16 %v13284_v43, %v1696_v8 }
 0x115   : > { %v13296_v36 = vsel %vm1335_vm3, %v2307_v57, %v2318_v58  ;;  %10931 = vmatprep.mubr.msk.bf16.mxu0 %vm280_vm1, %v2462_v46  ;;  %v2465_v57 = vor.u32 %v2463_v47, %v2461_v35  ;;  %v2735_v46 = vmul.bf16 %v13030_v28, %v12765_v60  ;;  %v2758_v35 = vrot.slane %v2756_v7, 7 }
 0x116   : > { %15685 = vst [vmem:[#allocation19_spill] sm:$0xff] %v13296_v36  ;;  %v2352_v45 = vmul.bf16 %v13303_v49, %v13296_v36  ;;  %v2469_v12 = vrot.slane %v2467_v59, 1  ;;  %v2736_v48 = vmul.bf16 %v13051_v1, %v12776_v15  ;;  %v2483_v47 = vshll.u32 %v2353_v2, 16 }
 0x117   : > { %v2764_v8 = vshrl.u32 %v2735_v46, 16  ;;  %v2737_v7 = vmul.bf16 %v13068_v20, %v12792_v44 }
 0x118   : > { %v2475_v14 = vshll.u32 %v2352_v45, 16  ;;  %v2470_v62 = vsel %vm958_vm2, %v2465_v57, %v2469_v12  ;;  %v2473_v58 = vor.u32 %v2471_v56, %v2469_v12  ;;  %v2479_v59 = vshrl.u32 %v2352_v45, 16 }
 0x119   : > { %v2752_v12 = vshrl.u32 %v2733_v4, 16  ;;  %v2759_v57 = vshll.u32 %v2734_v32, 16  ;;  %v2772_v19 = vshrl.u32 %v2736_v48, 16  ;;  %v2485_v23 = vrot.slane %v2483_v47, 1 }
 0x11a   : > { %v2477_v13 = vrot.slane %v2475_v14, 1  ;;  %v2766_v43 = vrot.slane %v2764_v8, 7  ;;  %v2738_v32 = vmul.bf16 %v13093_v26, %v12815_v38  ;;  %v2775_v2 = vshll.u32 %v2736_v48, 16  ;;  %v13341_v48 = vld [vmem:[%s15583_s1 + $0x14] sm:$0xf] }
 0x11b   : > { %10932 = vmatmul.mubr.msk.bf16.gmra.mrb[24].mxu0 %vm280_vm1, %v2470_v62  ;;  %v2761_v14 = vor.u32 %v2759_v57, %v2758_v35  ;;  %v2754_v60 = vrot.slane %v2752_v12, 7  ;;  %v2774_v45 = vrot.slane %v2772_v19, 7  ;;  %v13324_v62 = vld [vmem:[#allocation2 + $0x88] sm:$0xff]  ;;  %v3177_v57 = vsel %vm1170_vm0, %v13089_v41, 0 }
 0x11c   : > { %v2478_v54 = vsel %vm958_vm2, %v2473_v58, %v2477_v13  ;;  %v2481_v56 = vor.u32 %v2479_v59, %v2477_v13  ;;  %v2767_v13 = vshll.u32 %v2735_v46, 16  ;;  %v2749_v59 = vmul.bf16 %v13324_v62, %v12969_v5 }
 0x11d   : > { %10935 = vmatprep.mubr.msk.bf16.mxu0 %vm280_vm1, %v2478_v54  ;;  %v2762_v54 = vsel %vm1335_vm3, %v2754_v60, %v2761_v14  ;;  %v2777_v47 = vor.u32 %v2775_v2, %v2774_v45  ;;  %v2788_v12 = vshrl.u32 %v2738_v32, 16  ;;  %v13331_v60 = vmul.bf16 %v13303_v49, %v12964_v3 }
 0x11e   : > { %v2486_v58 = vsel %vm958_vm2, %v2481_v56, %v2485_v23  ;;  %v2769_v4 = vor.u32 %v2767_v13, %v2766_v43  ;;  %v2780_v23 = vshrl.u32 %v2737_v7, 16  ;;  %v2739_v46 = vmul.bf16 %v13098_v34, %v12829_v29 }
 0x11f   : > { %v2778_v14 = vsel %vm1335_vm3, %v2766_v43, %v2777_v47  ;;  %v2790_v19 = vrot.slane %v2788_v12, 7  ;;  %v2876_v41 = vshrl.u32 %v2749_v59, 16  ;;  %v2791_v13 = vshll.u32 %v2738_v32, 16 }
 0x120   : > { %v2770_v8 = vsel %vm1335_vm3, %v2758_v35, %v2769_v4  ;;  %v2782_v56 = vrot.slane %v2780_v23, 7  ;;  %v2783_v35 = vshll.u32 %v2737_v7, 16  ;;  %v2796_v4 = vshrl.u32 %v2739_v46, 16 }
 0x121   : > { %v2878_v23 = vrot.slane %v2876_v41, 7  ;;  %v2793_v43 = vor.u32 %v2791_v13, %v2790_v19  ;;  %v2741_v7 = vmul.bf16 %v13199_v6, %v12859_v17  ;;  %v2742_v41 = vmul.bf16 %v13216_v55, %v12874_v40 }
 0x122   : > { %v2785_v2 = vor.u32 %v2783_v35, %v2782_v56  ;;  %v2798_v29 = vrot.slane %v2796_v4, 7  ;;  %v2799_v35 = vshll.u32 %v2739_v46, 16 }
 0x123   : > { %10936 = vmatmul.mubr.msk.bf16.gmra.mrb[28].mxu0 %vm280_vm1, %v2486_v58  ;;  %v2740_v58 = vmul.bf16 %v13136_v18, %v12847_v61  ;;  %v2812_v13 = vshrl.u32 %v2741_v7, 16  ;;  %v2820_v4 = vshrl.u32 %v2742_v41, 16  ;;  %v2815_v46 = vshll.u32 %v2741_v7, 16 }
 0x124   : > { %10941 = vmatprep.mubr.msk.bf16.mxu0 %vm280_vm1, %v2762_v54  ;;  %v2868_v54 = vshrl.u32 %v13331_v60, 16 }
 0x125   : > { %v2804_v47 = vshrl.u32 %v2740_v58, 16 }
 0x126   : > { %v13351_v12 = vrot.slane %v2868_v54, 7  ;;  %v2801_v54 = vor.u32 %v2799_v35, %v2798_v29 }
 0x12b   : > { %10942 = vmatmul.mubr.msk.bf16.vlgmr.msra.gmra.mrb[0].mxu0 %vm280_vm1, %v2770_v8  ;;  %v2879_v8 = vshll.u32 %v2749_v59, 16  ;;  %v2806_v59 = vrot.slane %v2804_v47, 7  ;;  %v2744_v47 = vmul.bf16 %v13253_v50, %v12904_v27 }
 0x12c   : > { %10974 = vmatpush3.bf16.msra.mxu0 %v3177_v57  ;;  %10945 = vmatprep.mubr.msk.bf16.mxu0 %vm280_vm1, %v2778_v14  ;;  %v2786_v57 = vsel %vm1335_vm3, %v2774_v45, %v2785_v2  ;;  %v2794_v14 = vsel %vm1335_vm3, %v2782_v56, %v2793_v43  ;;  %v2807_v45 = vshll.u32 %v2740_v58, 16  ;;  %v2822_v43 = vrot.slane %v2820_v4, 7 }
 0x12d   : > { %11966 = vmatprep.subr.msk.bf16.mxu0 %vm1170_vm0, %v13341_v48  ;;  %v2881_v61 = vor.u32 %v2879_v8, %v2878_v23  ;;  %v2802_v23 = vsel %vm1335_vm3, %v2790_v19, %v2801_v54  ;;  %v2743_v8 = vmul.bf16 %v13233_v0, %v12892_v9  ;;  %v2823_v58 = vshll.u32 %v2742_v41, 16 }
 0x12e   : > { %v2809_v2 = vor.u32 %v2807_v45, %v2806_v59  ;;  %v2836_v19 = vshrl.u32 %v2744_v47, 16  ;;  %v2746_v4 = vmul.bf16 %v13280_v37, %v12937_v22  ;;  %v2839_v41 = vshll.u32 %v2744_v47, 16 }
 0x12f   : > { %v13358_v32 = vsel %vm1335_vm3, %v13351_v12, %v2881_v61  ;;  %v2814_v61 = vrot.slane %v2812_v13, 7  ;;  %v2825_v35 = vor.u32 %v2823_v58, %v2822_v43  ;;  %v2745_v13 = vmul.bf16 %v13258_v16, %v12919_v51 }
 0x130   : > { %v2810_v56 = vsel %vm1335_vm3, %v2798_v29, %v2809_v2  ;;  %v2838_v2 = vrot.slane %v2836_v19, 7  ;;  %v2831_v7 = vshll.u32 %v2743_v8, 16 }
 0x131   : > { %v2826_v29 = vsel %vm1335_vm3, %v2814_v61, %v2825_v35  ;;  %v2847_v19 = vshll.u32 %v2745_v13, 16 }
 0x133   : > { %10946 = vmatmul.mubr.msk.bf16.gmra.mrb[4].mxu0 %vm280_vm1, %v2786_v57  ;;  %v2817_v57 = vor.u32 %v2815_v46, %v2814_v61  ;;  %v2841_v46 = vor.u32 %v2839_v41, %v2838_v2 }
 0x134   : > { %10949 = vmatprep.mubr.msk.bf16.mxu0 %vm280_vm1, %v2794_v14  ;;  %v2828_v14 = vshrl.u32 %v2743_v8, 16  ;;  %v2855_v8 = vshll.u32 %v2746_v4, 16 }
 0x135   : > { %v2818_v45 = vsel %vm1335_vm3, %v2806_v59, %v2817_v57  ;;  %v2852_v59 = vshrl.u32 %v2746_v4, 16  ;;  %v5152_v4 = vld [vmem:[#allocation3 + $0x8] sm:$0xff] }
 0x136   : > { %v2830_v54 = vrot.slane %v2828_v14, 7  ;;  %v2747_v14 = vmul.bf16 %v13291_v63, %v12949_v39  ;;  %11145 = vmatprep.mubr.msk.bf16.mxu1 %vm5098_vm4, %v5152_v4 }
 0x137   : > { %v2854_v35 = vrot.slane %v2852_v59, 7 }
 0x138   : > { %v2842_v61 = vsel %vm1335_vm3, %v2830_v54, %v2841_v46 }
 0x13b   : > { %10950 = vmatmul.mubr.msk.bf16.gmra.mrb[8].mxu0 %vm280_vm1, %v2802_v23  ;;  %v2833_v23 = vor.u32 %v2831_v7, %v2830_v54  ;;  %v2871_v54 = vshll.u32 %v13331_v60, 16  ;;  %v3588_v60 = vsel %vm1170_vm0, %v13341_v48, 0 }
 0x13c   : > { %10953 = vmatprep.mubr.msk.bf16.mxu0 %vm280_vm1, %v2810_v56  ;;  %v2844_v56 = vshrl.u32 %v2745_v13, 16 }
 0x13d   : > { %v2834_v58 = vsel %vm1335_vm3, %v2822_v43, %v2833_v23  ;;  %v2863_v23 = vshll.u32 %v2747_v14, 16  ;;  %v2873_v46 = vor.u32 %v2871_v54, %v13351_v12  ;;  %v3802_v12 = vld [vmem:[%s15583_s1 + $0x18] sm:$0xf] }
 0x13e   : > { %v2846_v57 = vrot.slane %v2844_v56, 7 }
 0x140   : > { %v2849_v47 = vor.u32 %v2847_v19, %v2846_v57 }
 0x142   : > { %v2850_v7 = vsel %vm1335_vm3, %v2838_v2, %v2849_v47  ;;  %v13468_v47 = vld [vmem:[#allocation2 + $0x30] sm:$0xff] }
 0x143   : > { %10954 = vmatmul.mubr.msk.bf16.gmra.mrb[12].mxu0 %vm280_vm1, %v2818_v45  ;;  %v2860_v45 = vshrl.u32 %v2747_v14, 16 }
 0x144   : > { %10957 = vmatprep.mubr.msk.bf16.mxu0 %vm280_vm1, %v2826_v29  ;;  %v2857_v29 = vor.u32 %v2855_v8, %v2854_v35 }
 0x145   : > { %v2862_v41 = vrot.slane %v2860_v45, 7 }
 0x146   : > { %v2858_v43 = vsel %vm1335_vm3, %v2846_v57, %v2857_v29  ;;  %v13460_v57 = vld [vmem:[#allocation2 + $0x28] sm:$0xff]  ;;  %v3393_v29 = vmul.bf16 %v13468_v47, %v13059_v24 }
 0x147   : > { %v2865_v56 = vor.u32 %v2863_v23, %v2862_v41  ;;  %v2874_v2 = vsel %vm1335_vm3, %v2862_v41, %v2873_v46  ;;  %v13472_v41 = vld [vmem:[#allocation2 + $0x38] sm:$0xff]  ;;  %v3984_v46 = vsel %vm1170_vm0, %v3802_v12, 0 }
 0x148   : > { %v3394_v54 = vmul.bf16 %v13472_v41, %v13082_v11  ;;  %v3439_v4 = vshll.u32 %v3393_v29, 16 }
 0x149   : > { %v2866_v13 = vsel %vm1335_vm3, %v2854_v35, %v2865_v56  ;;  %v3392_v35 = vmul.bf16 %v13460_v57, %v13046_v53 }
 0x14b   : > { %10958 = vmatmul.mubr.msk.bf16.gmra.mrb[16].mxu0 %vm280_vm1, %v2834_v58 }
 0x14c   : > { %10961 = vmatprep.mubr.msk.bf16.mxu0 %vm280_vm1, %v2842_v61 }
 0x153   : > { %10962 = vmatmul.mubr.msk.bf16.gmra.mrb[20].mxu0 %vm280_vm1, %v2850_v7 }
 0x154   : > { %10965 = vmatprep.mubr.msk.bf16.mxu0 %vm280_vm1, %v2858_v43 }
 0x15b   : > { %10966 = vmatmul.mubr.msk.bf16.gmra.mrb[24].mxu0 %vm280_vm1, %v2866_v13 }
 0x15c   : > { %10969 = vmatprep.mubr.msk.bf16.mxu0 %vm280_vm1, %v2874_v2 }
 0x163   : > { %10970 = vmatmul.mubr.msk.bf16.gmra.mrb[28].mxu0 %vm280_vm1, %v13358_v32 }
 0x164   : > { %10975 = vmatprep.mubr.msk.bf16.mxu0 %vm280_vm1, %v13013_v31  ;;  %v13420_v31 = vld [vmem:[#allocation2 + $0x90] sm:$0xff] }
 0x16b   : > { %10976 = vmatmul.mubr.msk.bf16.vlgmr.msra.gmra.mrb[0].mxu0 %vm280_vm1, %v13030_v28  ;;  %v3801_v28 = vmul.bf16 %v13420_v31, %v12969_v5 }
 0x16c   : > { %11008 = vmatpush3.bf16.msra.mxu0 %v3588_v60  ;;  %10979 = vmatprep.mubr.msk.bf16.mxu0 %vm280_vm1, %v13051_v1  ;;  %v13428_v1 = vmul.bf16 %v13324_v62, %v12964_v3  ;;  %v13481_v60 = vld [vmem:[%s15583_s1 + $0x1c] sm:$0xf] }
 0x16d   : > { %11967 = vmatprep.subr.msk.bf16.mxu0 %vm1170_vm0, %v3802_v12  ;;  %v3441_v12 = vrot.slane %v3439_v4, 1 }
 0x173   : > { %10980 = vmatmul.mubr.msk.bf16.gmra.mrb[4].mxu0 %vm280_vm1, %v13068_v20  ;;  %v3928_v20 = vshrl.u32 %v3801_v28, 16 }
 0x174   : > { %10983 = vmatprep.mubr.msk.bf16.mxu0 %vm280_vm1, %v13093_v26  ;;  %v3920_v26 = vshrl.u32 %v13428_v1, 16 }
 0x176   : > { %v13437_v5 = vrot.slane %v3920_v26, 7  ;;  %v13486_v26 = vld [vmem:[#allocation2 + $0x40] sm:$0xff] }
 0x17b   : > { %10984 = vmatmul.mubr.msk.bf16.gmra.mrb[8].mxu0 %vm280_vm1, %v13098_v34  ;;  %v3930_v34 = vrot.slane %v3928_v20, 7  ;;  %v3447_v20 = vshll.u32 %v3394_v54, 16 }
 0x17c   : > { %10987 = vmatprep.mubr.msk.bf16.mxu0 %vm280_vm1, %v13136_v18  ;;  %v3931_v18 = vshll.u32 %v3801_v28, 16 }
 0x183   : > { %10988 = vmatmul.mubr.msk.bf16.gmra.mrb[12].mxu0 %vm280_vm1, %v13199_v6  ;;  %v3933_v6 = vor.u32 %v3931_v18, %v3930_v34  ;;  %v15686_v34 = vld [vmem:[#allocation9_spill] sm:$0xff] }
 0x184   : > { %10991 = vmatprep.mubr.msk.bf16.mxu0 %vm280_vm1, %v13216_v55  ;;  %v12270_v55 = vld [vmem:[#allocation2 + $0x10] sm:$0xff]  ;;  %v3395_v18 = vmul.bf16 %v13486_v26, %v15686_v34 }
 0x185   : > { %v13441_v3 = vsel %vm1335_vm3, %v13437_v5, %v3933_v6  ;;  %v3389_v48 = vmul.bf16 %v12270_v55, %v12983_v30  ;;  %v3435_v6 = vshrl.u32 %v3392_v35, 16  ;;  %v13492_v55 = vld [vmem:[#allocation2 + $0x48] sm:$0xff] }
 0x187   : > { %v3410_v32 = vshll.u32 %v3389_v48, 16  ;;  %v3408_v14 = vshrl.u32 %v3389_v48, 16  ;;  %v3443_v48 = vshrl.u32 %v3393_v29, 16  ;;  %v3451_v29 = vshrl.u32 %v3394_v54, 16  ;;  %v13512_v54 = vld [vmem:[#allocation2 + $0x60] sm:$0xff] }
 0x189   : > { %v3412_v58 = vrot.slane %v3410_v32, 1  ;;  %v15687_v32 = vld [vmem:[#allocation10_spill] sm:$0xff] }
 0x18b   : > { %10992 = vmatmul.mubr.msk.bf16.gmra.mrb[16].mxu0 %vm280_vm1, %v13233_v0  ;;  %v13448_v0 = vld [vmem:[#allocation2 + $0x18] sm:$0xff]  ;;  %v3413_v19 = vor.u32 %v3412_v58, %v3408_v14  ;;  %v3445_v58 = vor.u32 %v3443_v48, %v3441_v12  ;;  %v3455_v14 = vshll.u32 %v3395_v18, 16 }
 0x18c   : > { %10995 = vmatprep.mubr.msk.bf16.mxu0 %vm280_vm1, %v13253_v50  ;;  %v3390_v50 = vmul.bf16 %v13448_v0, %v13009_v10 }
 0x18e   : > { %v3415_v59 = vshll.u32 %v3390_v50, 16  ;;  %v3419_v7 = vshrl.u32 %v3390_v50, 16  ;;  %v3449_v50 = vrot.slane %v3447_v20, 1 }
 0x190   : > { %v3417_v61 = vrot.slane %v3415_v59, 1  ;;  %v3396_v59 = vmul.bf16 %v13492_v55, %v15687_v32 }
 0x192   : > { %v3421_v56 = vor.u32 %v3419_v7, %v3417_v61  ;;  %v13504_v7 = vld [vmem:[#allocation2 + $0x58] sm:$0xff] }
 0x193   : > { %10996 = vmatmul.mubr.msk.bf16.gmra.mrb[20].mxu0 %vm280_vm1, %v13258_v16  ;;  %v13456_v16 = vld [vmem:[#allocation2 + $0x20] sm:$0xff] }
 0x194   : > { %10999 = vmatprep.mubr.msk.bf16.mxu0 %vm280_vm1, %v13280_v37  ;;  %v3391_v37 = vmul.bf16 %v13456_v16, %v13022_v25 }
 0x196   : > { %v3423_v8 = vshll.u32 %v3391_v37, 16  ;;  %v3427_v43 = vshrl.u32 %v3391_v37, 16 }
 0x198   : > { %v3425_v45 = vrot.slane %v3423_v8, 1  ;;  %v3463_v8 = vshll.u32 %v3396_v59, 16 }
 0x19a   : > { %v3429_v13 = vor.u32 %v3427_v43, %v3425_v45  ;;  %v3426_v2 = vsel %vm958_vm2, %v3421_v56, %v3425_v45  ;;  %v3459_v43 = vshrl.u32 %v3395_v18, 16  ;;  %v15689_v56 = vld [vmem:[#allocation12_spill] sm:$0xff]  ;;  %v15690_v18 = vld [vmem:[#allocation13_spill] sm:$0xff] }
 0x19b   : > { %11000 = vmatmul.mubr.msk.bf16.gmra.mrb[24].mxu0 %vm280_vm1, %v13291_v63  ;;  %v3418_v63 = vsel %vm958_vm2, %v3413_v19, %v3417_v61  ;;  %v3450_v19 = vsel %vm958_vm2, %v3445_v58, %v3449_v50  ;;  %v3399_v48 = vmul.bf16 %v13512_v54, %v15690_v18  ;;  %v13516_v58 = vld [vmem:[#allocation2 + $0x68] sm:$0xff] }
 0x19c   : > { %11003 = vmatprep.mubr.msk.bf16.mxu0 %vm280_vm1, %v13303_v49  ;;  %v3431_v49 = vshll.u32 %v3392_v35, 16  ;;  %v13500_v35 = vld [vmem:[#allocation2 + $0x50] sm:$0xff] }
 0x19e   : > { %v3433_v23 = vrot.slane %v3431_v49, 1  ;;  %v15688_v49 = vld [vmem:[#allocation11_spill] sm:$0xff] }
 0x19f   : > { %v3397_v45 = vmul.bf16 %v13500_v35, %v15688_v49 }
 0x1a0   : > { %v3434_v28 = vsel %vm958_vm2, %v3429_v13, %v3433_v23  ;;  %v3437_v37 = vor.u32 %v3435_v6, %v3433_v23  ;;  %v3465_v23 = vrot.slane %v3463_v8, 1  ;;  %v3453_v13 = vor.u32 %v3451_v29, %v3449_v50 }
 0x1a1   : > { %v3475_v50 = vshrl.u32 %v3397_v45, 16  ;;  %v3487_v29 = vshll.u32 %v3399_v48, 16 }
 0x1a2   : > { %v3442_v61 = vsel %vm958_vm2, %v3437_v37, %v3441_v12  ;;  %v3467_v37 = vshrl.u32 %v3396_v59, 16  ;;  %v13524_v59 = vld [vmem:[#allocation2 + $0x70] sm:$0xff] }
 0x1a3   : > { %11004 = vmatmul.mubr.msk.bf16.gmra.mrb[28].mxu0 %vm280_vm1, %v13324_v62 }
 0x1a4   : > { %11009 = vmatprep.mubr.msk.bf16.mxu0 %vm280_vm1, %v3418_v63  ;;  %v3457_v63 = vrot.slane %v3455_v14, 1  ;;  %v3469_v8 = vor.u32 %v3467_v37, %v3465_v23 }
 0x1a6   : > { %v3461_v4 = vor.u32 %v3459_v43, %v3457_v63 }
 0x1a8   : > { %v3466_v20 = vsel %vm958_vm2, %v3461_v4, %v3465_v23  ;;  %v3491_v23 = vshrl.u32 %v3399_v48, 16 }
 0x1ab   : > { %11010 = vmatmul.mubr.msk.bf16.vlgmr.msra.gmra.mrb[0].mxu0 %vm280_vm1, %v3426_v2  ;;  %v3471_v2 = vshll.u32 %v3397_v45, 16  ;;  %v3401_v45 = vmul.bf16 %v13524_v59, %v13261_v33  ;;  %v15692_v33 = vld [vmem:[#allocation17_spill] sm:$0xff] }
 0x1ac   : > { %11042 = vmatpush3.bf16.msra.mxu0 %v3984_v46  ;;  %11013 = vmatprep.mubr.msk.bf16.mxu0 %vm280_vm1, %v3434_v28  ;;  %v3398_v46 = vmul.bf16 %v13504_v7, %v15689_v56  ;;  %v3458_v28 = vsel %vm958_vm2, %v3453_v13, %v3457_v63 }
 0x1ad   : > { %11968 = vmatprep.subr.msk.bf16.mxu0 %vm1170_vm0, %v13481_v60  ;;  %v3473_v6 = vrot.slane %v3471_v2, 1  ;;  %v3489_v2 = vrot.slane %v3487_v29, 1 }
 0x1ae   : > { %v3479_v12 = vshll.u32 %v3398_v46, 16 }
 0x1af   : > { %v3477_v63 = vor.u32 %v3475_v50, %v3473_v6  ;;  %v3474_v43 = vsel %vm958_vm2, %v3469_v8, %v3473_v6  ;;  %v3493_v50 = vor.u32 %v3491_v23, %v3489_v2  ;;  %v3503_v8 = vshll.u32 %v3401_v45, 16 }
 0x1b0   : > { %v3481_v14 = vrot.slane %v3479_v12, 1 }
 0x1b2   : > { %v3482_v13 = vsel %vm958_vm2, %v3477_v63, %v3481_v14 }
 0x1b3   : > { %11014 = vmatmul.mubr.msk.bf16.gmra.mrb[4].mxu0 %vm280_vm1, %v3442_v61  ;;  %v15691_v61 = vld [vmem:[#allocation14_spill] sm:$0xff] }
 0x1b4   : > { %11017 = vmatprep.mubr.msk.bf16.mxu0 %vm280_vm1, %v3450_v19  ;;  %v3400_v19 = vmul.bf16 %v13516_v58, %v15691_v61 }
 0x1b6   : > { %v3495_v4 = vshll.u32 %v3400_v19, 16 }
 0x1b8   : > { %v3497_v12 = vrot.slane %v3495_v4, 1  ;;  %v3499_v4 = vshrl.u32 %v3400_v19, 16 }
 0x1ba   : > { %v3498_v29 = vsel %vm958_vm2, %v3493_v50, %v3497_v12 }
 0x1bb   : > { %11018 = vmatmul.mubr.msk.bf16.gmra.mrb[8].mxu0 %vm280_vm1, %v3458_v28  ;;  %v3483_v28 = vshrl.u32 %v3398_v46, 16  ;;  %v13536_v46 = vld [vmem:[#allocation2 + $0x80] sm:$0xff] }
 0x1bc   : > { %11021 = vmatprep.mubr.msk.bf16.mxu0 %vm280_vm1, %v3466_v20  ;;  %v13528_v20 = vld [vmem:[#allocation2 + $0x78] sm:$0xff]  ;;  %v3403_v48 = vmul.bf16 %v13536_v46, %v13287_v52  ;;  %v3783_v52 = vld [vmem:[#allocation2 + $0x10] sm:$0x80] }
 0x1bd   : > { %v3402_v6 = vmul.bf16 %v13528_v20, %v13275_v21  ;;  %v3485_v37 = vor.u32 %v3483_v28, %v3481_v14  ;;  %v3507_v21 = vshrl.u32 %v3401_v45, 16  ;;  %v3404_v28 = vmul.bf16 %v13324_v62, %v13296_v36  ;;  %v3388_v45 = vld [vmem:[#allocation2 + $0x90] sm:$0x1] }
 0x1be   : > { %v3523_v36 = vshrl.u32 %v3403_v48, 16 }
 0x1bf   : > { %v3490_v63 = vsel %vm958_vm2, %v3485_v37, %v3489_v2  ;;  %v3501_v2 = vor.u32 %v3499_v4, %v3497_v12  ;;  %v3519_v37 = vshll.u32 %v3403_v48, 16  ;;  %v3788_v48 = vmul.bf16 %v13460_v57, %v12776_v15 }
 0x1c1   : > { %v3521_v19 = vrot.slane %v3519_v37, 1 }
 0x1c3   : > { %11022 = vmatmul.mubr.msk.bf16.gmra.mrb[12].mxu0 %vm280_vm1, %v3474_v43  ;;  %v3511_v43 = vshll.u32 %v3402_v6, 16 }
 0x1c4   : > { %11025 = vmatprep.mubr.msk.bf16.mxu0 %vm280_vm1, %v3482_v13  ;;  %v3505_v13 = vrot.slane %v3503_v8, 1  ;;  %v3786_v8 = vmul.bf16 %v13448_v0, %v12755_v42 }
 0x1c5   : > { %v3513_v14 = vrot.slane %v3511_v43, 1  ;;  %v3515_v43 = vshrl.u32 %v3402_v6, 16 }
 0x1c6   : > { %v3509_v23 = vor.u32 %v3507_v21, %v3505_v13  ;;  %v3506_v50 = vsel %vm958_vm2, %v3501_v2, %v3505_v13  ;;  %v3808_v21 = vshrl.u32 %v3786_v8, 16  ;;  %v3405_v13 = vmul.bf16 %v3388_v45, %v15692_v33 }
 0x1c7   : > { %v3517_v4 = vor.u32 %v3515_v43, %v3513_v14  ;;  %v3525_v2 = vor.u32 %v3523_v36, %v3521_v19 }
 0x1c8   : > { %v3810_v6 = vrot.slane %v3808_v21, 7  ;;  %v3789_v21 = vmul.bf16 %v13468_v47, %v12792_v44 }
 0x1c9   : > { %v3522_v42 = vsel %vm958_vm2, %v3517_v4, %v3521_v19 }
 0x1cb   : > { %11026 = vmatmul.mubr.msk.bf16.gmra.mrb[16].mxu0 %vm280_vm1, %v3490_v63  ;;  %v3514_v63 = vsel %vm958_vm2, %v3509_v23, %v3513_v14  ;;  %v15694_v23 = vld [vmem:[#allocation6_spill] sm:$0xff]  ;;  %v3531_v14 = vshrl.u32 %v3404_v28, 16 }
 0x1cc   : > { %11029 = vmatprep.mubr.msk.bf16.mxu0 %vm280_vm1, %v3498_v29  ;;  %v3527_v29 = vshll.u32 %v3404_v28, 16  ;;  %v3787_v18 = vmul.bf16 %v13456_v16, %v15694_v23 }
 0x1ce   : > { %v3529_v12 = vrot.slane %v3527_v29, 1  ;;  %v3811_v29 = vshll.u32 %v3786_v8, 16  ;;  %v3819_v8 = vshll.u32 %v3787_v18, 16 }
 0x1d0   : > { %v3530_v37 = vsel %vm958_vm2, %v3525_v2, %v3529_v12  ;;  %v3533_v45 = vor.u32 %v3531_v14, %v3529_v12  ;;  %v3813_v43 = vor.u32 %v3811_v29, %v3810_v6  ;;  %v3827_v12 = vshll.u32 %v3788_v48, 16  ;;  %v15695_v29 = vld [vmem:[#allocation7_spill] sm:$0xff] }
 0x1d1   : > { %v3832_v2 = vshrl.u32 %v3789_v21, 16 }
 0x1d3   : > { %11030 = vmatmul.mubr.msk.bf16.gmra.mrb[20].mxu0 %vm280_vm1, %v3506_v50  ;;  %v15693_v50 = vld [vmem:[#allocation5_spill] sm:$0xff] }
 0x1d4   : > { %11033 = vmatprep.mubr.msk.bf16.mxu0 %vm280_vm1, %v3514_v63  ;;  %v3785_v61 = vmul.bf16 %v3783_v52, %v15693_v50  ;;  %v3535_v63 = vshll.u32 %v3405_v13, 16  ;;  %v3816_v52 = vshrl.u32 %v3787_v18, 16  ;;  %v3824_v50 = vshrl.u32 %v3788_v48, 16 }
 0x1d6   : > { %v3804_v36 = vshrl.u32 %v3785_v61, 16  ;;  %v3537_v23 = vrot.slane %v3535_v63, 1  ;;  %v3826_v28 = vrot.slane %v3824_v50, 7  ;;  %v3790_v61 = vmul.bf16 %v13472_v41, %v12815_v38  ;;  %v13574_v38 = vld [vmem:[%s15583_s1 + $0x20] sm:$0xf] }
 0x1d7   : > { %v4229_v63 = vsel %vm1170_vm0, %v13481_v60, 0  ;;  %v3835_v60 = vshll.u32 %v3789_v21, 16  ;;  %v3794_v21 = vmul.bf16 %v13504_v7, %v12874_v40  ;;  %v3796_v40 = vmul.bf16 %v13516_v58, %v12904_v27 }
 0x1d8   : > { %v3806_v19 = vrot.slane %v3804_v36, 7  ;;  %v3538_v4 = vsel %vm958_vm2, %v3533_v45, %v3537_v23  ;;  %v3840_v14 = vshrl.u32 %v3790_v61, 16  ;;  %v3834_v36 = vrot.slane %v3832_v2, 7  ;;  %v15696_v45 = vld [vmem:[#allocation8_spill] sm:$0xff] }
 0x1d9   : > { %v3798_v27 = vmul.bf16 %v13528_v20, %v12937_v22 }
 0x1da   : > { %v3814_v15 = vsel %vm1335_vm3, %v3806_v19, %v3813_v43  ;;  %v3842_v48 = vrot.slane %v3840_v14, 7  ;;  %v3792_v43 = vmul.bf16 %v13492_v55, %v15696_v45  ;;  %v3837_v50 = vor.u32 %v3835_v60, %v3834_v36 }
 0x1db   : > { %11034 = vmatmul.mubr.msk.bf16.gmra.mrb[24].mxu0 %vm280_vm1, %v3522_v42  ;;  %v3818_v42 = vrot.slane %v3816_v52, 7  ;;  %v3791_v52 = vmul.bf16 %v13486_v26, %v15695_v29  ;;  %v3875_v45 = vshll.u32 %v3794_v21, 16 }
 0x1dc   : > { %11037 = vmatprep.mubr.msk.bf16.mxu0 %vm280_vm1, %v3530_v37  ;;  %v3829_v37 = vor.u32 %v3827_v12, %v3826_v28  ;;  %v3859_v2 = vshll.u32 %v3792_v43, 16 }
 0x1dd   : > { %v3821_v13 = vor.u32 %v3819_v8, %v3818_v42  ;;  %v3848_v23 = vshrl.u32 %v3791_v52, 16 }
 0x1de   : > { %v3830_v18 = vsel %vm1335_vm3, %v3818_v42, %v3829_v37  ;;  %v3793_v42 = vmul.bf16 %v13500_v35, %v12859_v17  ;;  %v3795_v17 = vmul.bf16 %v13512_v54, %v12892_v9  ;;  %v3797_v9 = vmul.bf16 %v13524_v59, %v12919_v51 }
 0x1df   : > { %v3822_v44 = vsel %vm1335_vm3, %v3810_v6, %v3821_v13  ;;  %v3843_v6 = vshll.u32 %v3790_v61, 16  ;;  %v3850_v8 = vrot.slane %v3848_v23, 7  ;;  %v3851_v61 = vshll.u32 %v3791_v52, 16 }
 0x1e0   : > { %v3864_v14 = vshrl.u32 %v3793_v42, 16  ;;  %v3867_v52 = vshll.u32 %v3793_v42, 16  ;;  %v3880_v60 = vshrl.u32 %v3795_v17, 16  ;;  %v3799_v51 = vmul.bf16 %v13536_v46, %v12949_v39 }
 0x1e1   : > { %v3845_v19 = vor.u32 %v3843_v6, %v3842_v48  ;;  %v3853_v37 = vor.u32 %v3851_v61, %v3850_v8  ;;  %v3899_v22 = vshll.u32 %v3797_v9, 16 }
 0x1e2   : > { %v3866_v29 = vrot.slane %v3864_v14, 7  ;;  %v3882_v23 = vrot.slane %v3880_v60, 7  ;;  %v3915_v39 = vshll.u32 %v3799_v51, 16 }
 0x1e3   : > { %11038 = vmatmul.mubr.msk.bf16.gmra.mrb[28].mxu0 %vm280_vm1, %v3538_v4  ;;  %v3856_v4 = vshrl.u32 %v3792_v43, 16  ;;  %v3846_v12 = vsel %vm1335_vm3, %v3834_v36, %v3845_v19 }
 0x1e4   : > { %11043 = vmatprep.mubr.msk.bf16.mxu0 %vm280_vm1, %v3814_v15  ;;  %v3838_v15 = vsel %vm1335_vm3, %v3826_v28, %v3837_v50  ;;  %v3872_v28 = vshrl.u32 %v3794_v21, 16  ;;  %v3869_v43 = vor.u32 %v3867_v52, %v3866_v29 }
 0x1e5   : > { %v3858_v13 = vrot.slane %v3856_v4, 7 }
 0x1e7   : > { %v3870_v50 = vsel %vm1335_vm3, %v3858_v13, %v3869_v43 }
 0x1eb   : > { %11044 = vmatmul.mubr.msk.bf16.vlgmr.msra.gmra.mrb[0].mxu0 %vm280_vm1, %v3822_v44  ;;  %v3854_v44 = vsel %vm1335_vm3, %v3842_v48, %v3853_v37  ;;  %v3888_v48 = vshrl.u32 %v3796_v40, 16 }
 0x1ec   : > { %11076 = vmatpush3.bf16.msra.mxu0 %v4229_v63  ;;  %11047 = vmatprep.mubr.msk.bf16.mxu0 %vm280_vm1, %v3830_v18  ;;  %v3861_v63 = vor.u32 %v3859_v2, %v3858_v13  ;;  %v3874_v18 = vrot.slane %v3872_v28, 7  ;;  %v3904_v13 = vshrl.u32 %v3798_v27, 16 }
 0x1ed   : > { %11969 = vmatprep.subr.msk.bf16.mxu0 %vm1170_vm0, %v13574_v38  ;;  %v3890_v4 = vrot.slane %v3888_v48, 7 }
 0x1ee   : > { %v3862_v36 = vsel %vm1335_vm3, %v3850_v8, %v3861_v63  ;;  %v3877_v6 = vor.u32 %v3875_v45, %v3874_v18  ;;  %v3891_v8 = vshll.u32 %v3796_v40, 16  ;;  %v3906_v14 = vrot.slane %v3904_v13, 7 }
 0x1ef   : > { %v3907_v63 = vshll.u32 %v3798_v27, 16  ;;  %v3923_v40 = vshll.u32 %v13428_v1, 16  ;;  %v4640_v1 = vsel %vm1170_vm0, %v13574_v38, 0 }
 0x1f0   : > { %v3878_v19 = vsel %vm1335_vm3, %v3866_v29, %v3877_v6  ;;  %v3893_v21 = vor.u32 %v3891_v8, %v3890_v4  ;;  %v12273_v6 = vld [vmem:[#allocation2 + $0x28] sm:$0xff] }
 0x1f1   : > { %v3909_v29 = vor.u32 %v3907_v63, %v3906_v14  ;;  %v3925_v45 = vor.u32 %v3923_v40, %v13437_v5  ;;  %v4425_v5 = vld [vmem:[#allocation2 + $0x20] sm:$0xff]  ;;  %v4443_v48 = vmul.bf16 %v12273_v6, %v13022_v25  ;;  %v4445_v25 = vmul.bf16 %v13472_v41, %v13059_v24 }
 0x1f2   : > { %v3894_v37 = vsel %vm1335_vm3, %v3882_v23, %v3893_v21  ;;  %v4447_v24 = vmul.bf16 %v13492_v55, %v15686_v34  ;;  %v4449_v34 = vmul.bf16 %v13504_v7, %v15688_v49  ;;  %v15697_v49 = vld [vmem:[#allocation13_spill] sm:$0xff] }
 0x1f3   : > { %11048 = vmatmul.mubr.msk.bf16.gmra.mrb[4].mxu0 %vm280_vm1, %v3838_v15  ;;  %v3883_v15 = vshll.u32 %v3795_v17, 16  ;;  %v4479_v8 = vshrl.u32 %v4443_v48, 16  ;;  %v4491_v21 = vshll.u32 %v4445_v25, 16 }
 0x1f4   : > { %11051 = vmatprep.mubr.msk.bf16.mxu0 %vm280_vm1, %v3846_v12  ;;  %v3896_v12 = vshrl.u32 %v3797_v9, 16 }
 0x1f5   : > { %v3885_v42 = vor.u32 %v3883_v15, %v3882_v23 }
 0x1f6   : > { %v3898_v2 = vrot.slane %v3896_v12, 7 }
 0x1f7   : > { %v3886_v61 = vsel %vm1335_vm3, %v3874_v18, %v3885_v42 }
 0x1f8   : > { %v3901_v28 = vor.u32 %v3899_v22, %v3898_v2  ;;  %v3910_v18 = vsel %vm1335_vm3, %v3898_v2, %v3909_v29  ;;  %v4493_v2 = vrot.slane %v4491_v21, 1  ;;  %v4507_v22 = vshll.u32 %v4447_v24, 16 }
 0x1fa   : > { %v3902_v17 = vsel %vm1335_vm3, %v3890_v4, %v3901_v28  ;;  %v4475_v4 = vshll.u32 %v4443_v48, 16  ;;  %v4509_v29 = vrot.slane %v4507_v22, 1 }
 0x1fb   : > { %11052 = vmatmul.mubr.msk.bf16.gmra.mrb[8].mxu0 %vm280_vm1, %v3854_v44  ;;  %v3912_v44 = vshrl.u32 %v3799_v51, 16  ;;  %v4495_v51 = vshrl.u32 %v4445_v25, 16  ;;  %v4438_v25 = vld [vmem:[#allocation2 + $0x88] sm:$0xff] }
 0x1fc   : > { %11055 = vmatprep.mubr.msk.bf16.mxu0 %vm280_vm1, %v3862_v36 }
 0x1fd   : > { %v3914_v36 = vrot.slane %v3912_v44, 7 }
 0x1ff   : > { %v3917_v52 = vor.u32 %v3915_v39, %v3914_v36  ;;  %v3926_v60 = vsel %vm1335_vm3, %v3914_v36, %v3925_v45  ;;  %v4523_v39 = vshll.u32 %v4449_v34, 16 }
 0x201   : > { %v3918_v43 = vsel %vm1335_vm3, %v3906_v14, %v3917_v52  ;;  %v4497_v14 = vor.u32 %v4495_v51, %v4493_v2 }
 0x203   : > { %11056 = vmatmul.mubr.msk.bf16.gmra.mrb[12].mxu0 %vm280_vm1, %v3870_v50 }
 0x204   : > { %11059 = vmatprep.mubr.msk.bf16.mxu0 %vm280_vm1, %v3878_v19  ;;  %v4444_v19 = vmul.bf16 %v13468_v47, %v13046_v53  ;;  %v4446_v53 = vmul.bf16 %v13486_v26, %v13082_v11  ;;  %v4448_v11 = vmul.bf16 %v13500_v35, %v15687_v32  ;;  %v4450_v32 = vmul.bf16 %v13512_v54, %v15689_v56  ;;  %v15698_v56 = vld [vmem:[#allocation14_spill] sm:$0xff] }
 0x206   : > { %v4483_v27 = vshll.u32 %v4444_v19, 16  ;;  %v4515_v44 = vshll.u32 %v4448_v11, 16  ;;  %v4531_v45 = vshll.u32 %v4450_v32, 16 }
 0x208   : > { %v4485_v42 = vrot.slane %v4483_v27, 1  ;;  %v4517_v36 = vrot.slane %v4515_v44, 1 }
 0x20b   : > { %11060 = vmatmul.mubr.msk.bf16.gmra.mrb[16].mxu0 %vm280_vm1, %v3886_v61  ;;  %v4499_v61 = vshll.u32 %v4446_v53, 16 }
 0x20c   : > { %11063 = vmatprep.mubr.msk.bf16.mxu0 %vm280_vm1, %v3894_v37 }
 0x20d   : > { %v4501_v37 = vrot.slane %v4499_v61, 1 }
 0x20f   : > { %v4502_v28 = vsel %vm958_vm2, %v4497_v14, %v4501_v37 }
 0x213   : > { %11064 = vmatmul.mubr.msk.bf16.gmra.mrb[20].mxu0 %vm280_vm1, %v3902_v17  ;;  %v4511_v17 = vshrl.u32 %v4447_v24, 16 }
 0x214   : > { %11067 = vmatprep.mubr.msk.bf16.mxu0 %vm280_vm1, %v3910_v18 }
 0x215   : > { %v4513_v18 = vor.u32 %v4511_v17, %v4509_v29 }
 0x217   : > { %v4518_v52 = vsel %vm958_vm2, %v4513_v18, %v4517_v36 }
 0x21b   : > { %11068 = vmatmul.mubr.msk.bf16.gmra.mrb[24].mxu0 %vm280_vm1, %v3918_v43  ;;  %v4525_v43 = vrot.slane %v4523_v39, 1 }
 0x21c   : > { %11071 = vmatprep.mubr.msk.bf16.mxu0 %vm280_vm1, %v3926_v60  ;;  %v4519_v60 = vshrl.u32 %v4448_v11, 16 }
 0x223   : > { %11072 = vmatmul.mubr.msk.bf16.gmra.mrb[28].mxu0 %vm280_vm1, %v13441_v3  ;;  %v12272_v3 = vld [vmem:[#allocation2 + $0x18] sm:$0xff] }
 0x224   : > { %11077 = vmatprep.mubr.msk.bf16.mxu0 %vm280_vm1, %v13448_v0  ;;  %v4441_v0 = vmul.bf16 %v12272_v3, %v12983_v30  ;;  %v4521_v3 = vor.u32 %v4519_v60, %v4517_v36 }
 0x226   : > { %v4460_v23 = vshrl.u32 %v4441_v0, 16 }
 0x22b   : > { %11078 = vmatmul.mubr.msk.bf16.vlgmr.msra.gmra.mrb[0].mxu0 %vm280_vm1, %v13456_v16  ;;  %v4442_v16 = vmul.bf16 %v4425_v5, %v13009_v10  ;;  %v4533_v5 = vrot.slane %v4531_v45, 1  ;;  %v5215_v45 = vpop.permute.xlu1 %5214 }
 0x22c   : > { %11110 = vmatpush3.bf16.msra.mxu0 %v4640_v1  ;;  %11081 = vmatprep.mubr.msk.bf16.mxu0 %vm280_vm1, %v13460_v57  ;;  %v4462_v57 = vshll.u32 %v4441_v0, 16  ;;  %v4527_v1 = vshrl.u32 %v4449_v34, 16 }
 0x22d   : > { %v4467_v38 = vshll.u32 %v4442_v16, 16  ;;  %v4471_v15 = vshrl.u32 %v4442_v16, 16 }
 0x22e   : > { %v4464_v50 = vrot.slane %v4462_v57, 1  ;;  %v4529_v0 = vor.u32 %v4527_v1, %v4525_v43  ;;  %v4526_v57 = vsel %vm958_vm2, %v4521_v3, %v4525_v43  ;;  %v5203_v43 = vpop.permute.xlu0 %5202 }
 0x22f   : > { %v4469_v9 = vrot.slane %v4467_v38, 1 }
 0x230   : > { %v4465_v30 = vor.u32 %v4464_v50, %v4460_v23  ;;  %v4534_v38 = vsel %vm958_vm2, %v4529_v0, %v4533_v5  ;;  %v4535_v23 = vshrl.u32 %v4450_v32, 16 }
 0x232   : > { %v4470_v10 = vsel %vm958_vm2, %v4465_v30, %v4469_v9 }
 0x233   : > { %11082 = vmatmul.mubr.msk.bf16.gmra.mrb[4].mxu0 %vm280_vm1, %v13468_v47  ;;  %v4473_v47 = vor.u32 %v4471_v15, %v4469_v9 }
 0x234   : > { %11085 = vmatprep.mubr.msk.bf16.mxu0 %vm280_vm1, %v13472_v41  ;;  %v4487_v41 = vshrl.u32 %v4444_v19, 16 }
 0x23b   : > { %11086 = vmatmul.mubr.msk.bf16.gmra.mrb[8].mxu0 %vm280_vm1, %v13486_v26  ;;  %v4489_v26 = vor.u32 %v4487_v41, %v4485_v42 }
 0x23c   : > { %11089 = vmatprep.mubr.msk.bf16.mxu0 %vm280_vm1, %v13492_v55  ;;  %v4503_v55 = vshrl.u32 %v4446_v53, 16  ;;  %v15701_v53 = vld [vmem:[#allocation18_spill] sm:$0xff] }
 0x23d   : > { %v4494_v63 = vsel %vm958_vm2, %v4489_v26, %v4493_v2  ;;  %v4440_v26 = vld [vmem:[#allocation2 + $0x98] sm:$0x1] }
 0x23e   : > { %v4457_v44 = vmul.bf16 %v4440_v26, %v15692_v33  ;;  %v12007_v33 = vld [vmem:[%s15585_s3] ss:$0 sps:$4 sm:$0xcc]  }
 0x23f   : > { %v5830_v39 = vrot.slane %v12007_v33, 2 }
 0x240   : > { %v4587_v36 = vshll.u32 %v4457_v44, 16 }
 0x241   : > { %11970 = vmatprep.subr.msk.bf16.mxu1 %vm5879_vm5, %v5830_v39 }
 0x243   : > { %11090 = vmatmul.mubr.msk.bf16.gmra.mrb[12].mxu0 %vm280_vm1, %v13500_v35  ;;  %v4505_v35 = vor.u32 %v4503_v55, %v4501_v37 }
 0x244   : > { %11093 = vmatprep.mubr.msk.bf16.mxu0 %vm280_vm1, %v13504_v7  ;;  %v4451_v7 = vmul.bf16 %v13516_v58, %v15697_v49  ;;  %v13731_v49 = vpop.permute.xlu1 %5238 }
 0x245   : > { %v4510_v40 = vsel %vm958_vm2, %v4505_v35, %v4509_v29  ;;  %v4589_v35 = vrot.slane %v4587_v36, 1 }
 0x246   : > { %v4539_v16 = vshll.u32 %v4451_v7, 16  ;;  %v4543_v9 = vshrl.u32 %v4451_v7, 16  ;;  %v13733_v7 = vpop.permute.xlu0 %5226 }
 0x248   : > { %v4541_v48 = vrot.slane %v4539_v16, 1  ;;  %v13735_v60 = vpop.permute.xlu1 %5262 }
 0x24a   : > { %v13737_v1 = vpop.permute.xlu0 %5250 }
 0x24b   : > { %11094 = vmatmul.mubr.msk.bf16.gmra.mrb[16].mxu0 %vm280_vm1, %v13512_v54  ;;  %v4452_v54 = vmul.bf16 %v13524_v59, %v15698_v56 }
 0x24c   : > { %11097 = vmatprep.mubr.msk.bf16.mxu0 %vm280_vm1, %v13516_v58  ;;  %v15699_v58 = vld [vmem:[#allocation15_spill] sm:$0xff] }
 0x24d   : > { %v4547_v6 = vshll.u32 %v4452_v54, 16  ;;  %v4453_v50 = vmul.bf16 %v13528_v20, %v15699_v58  ;;  %v13762_v58 = vld [vmem:[%s15584_s2] ss:$0 sm:$0xff] }
 0x24e   : > { %v13741_v56 = vpop.permute.xlu0 %5274 }
 0x24f   : > { %v4549_v19 = vrot.slane %v4547_v6, 1  ;;  %v4555_v27 = vshll.u32 %v4453_v50, 16  ;;  %v4559_v21 = vshrl.u32 %v4453_v50, 16 }
 0x252   : > { %v13745_v3 = vpop.permute.xlu0 %5298 }
 0x253   : > { %11098 = vmatmul.mubr.msk.bf16.gmra.mrb[20].mxu0 %vm280_vm1, %v13524_v59  ;;  %v15700_v59 = vld [vmem:[#allocation16_spill] sm:$0xff] }
 0x254   : > { %11101 = vmatprep.mubr.msk.bf16.mxu0 %vm280_vm1, %v13528_v20  ;;  %v4454_v30 = vmul.bf16 %v13536_v46, %v15700_v59  ;;  %v4439_v20 = vld [vmem:[#allocation2 + $0x90] sm:$0xff] }
 0x256   : > { %v4567_v14 = vshrl.u32 %v4454_v30, 16  ;;  %v13749_v16 = vpop.permute.xlu0 %5322 }
 0x25b   : > { %11102 = vmatmul.mubr.msk.bf16.gmra.mrb[24].mxu0 %vm280_vm1, %v13536_v46 }
 0x25c   : > { %11105 = vmatprep.mubr.msk.bf16.mxu0 %vm280_vm1, %v13324_v62  ;;  %v4477_v62 = vrot.slane %v4475_v4, 1  ;;  %v4537_v4 = vor.u32 %v4535_v23, %v4533_v5  ;;  %v13739_v5 = vpop.permute.xlu1 %5286 }
 0x25e   : > { %v4481_v12 = vor.u32 %v4479_v8, %v4477_v62  ;;  %v4563_v8 = vshll.u32 %v4454_v30, 16 }
 0x260   : > { %v4486_v13 = vsel %vm958_vm2, %v4481_v12, %v4485_v42  ;;  %v4557_v42 = vrot.slane %v4555_v27, 1  ;;  %v4551_v12 = vshrl.u32 %v4452_v54, 16  ;;  %v4565_v46 = vrot.slane %v4563_v8, 1  ;;  %v13743_v54 = vpop.permute.xlu1 %5310 }
 0x262   : > { %v4553_v61 = vor.u32 %v4551_v12, %v4549_v19  ;;  %v4561_v2 = vor.u32 %v4559_v21, %v4557_v42 }
 0x263   : > { %11106 = vmatmul.mubr.msk.bf16.gmra.mrb[28].mxu0 %vm280_vm1, %v13420_v31  ;;  %v4478_v31 = vsel %vm958_vm2, %v4473_v47, %v4477_v62  ;;  %v4542_v62 = vsel %vm958_vm2, %v4537_v4, %v4541_v48  ;;  %v4455_v47 = vmul.bf16 %v4438_v25, %v15701_v53  ;;  %v15703_v25 = vld [vmem:[#allocation4_spill] sm:$0xff] }
 0x264   : > { %11111 = vmatprep.mubr.msk.bf16.mxu0 %vm280_vm1, %v4470_v10  ;;  %v4545_v10 = vor.u32 %v4543_v9, %v4541_v48  ;;  %v4558_v41 = vsel %vm958_vm2, %v4553_v61, %v4557_v42  ;;  %v4566_v51 = vsel %vm958_vm2, %v4561_v2, %v4565_v46  ;;  %v13747_v0 = vpop.permute.xlu1 %5334  ;;  %v5211_v8 = vrot.slane %v5203_v43, %v15703_v25 }
 0x265   : > { %v4571_v24 = vshll.u32 %v4455_v47, 16  ;;  %v4575_v22 = vshrl.u32 %v4455_v47, 16 }
 0x266   : > { %v4550_v15 = vsel %vm958_vm2, %v4545_v10, %v4549_v19 }
 0x267   : > { %v4573_v11 = vrot.slane %v4571_v24, 1 }
 0x269   : > { %v4577_v29 = vor.u32 %v4575_v22, %v4573_v11 }
 0x26b   : > { %11112 = vmatmul.mubr.msk.bf16.vlgmr.msra.gmra.mrb[0].mxu0 %vm280_vm1, %v4478_v31  ;;  %v15702_v31 = vld [vmem:[#allocation19_spill] sm:$0xff] }
 0x26c   : > { %11115 = vmatprep.mubr.msk.bf16.mxu0 %vm280_vm1, %v4486_v13  ;;  %v4456_v13 = vmul.bf16 %v4439_v20, %v15702_v31 }
 0x26e   : > { %v4579_v37 = vshll.u32 %v4456_v13, 16  ;;  %v4583_v17 = vshrl.u32 %v4456_v13, 16 }
 0x273   : > { %11116 = vmatmul.mubr.msk.bf16.gmra.mrb[4].mxu0 %vm280_vm1, %v4494_v63  ;;  %v4581_v63 = vrot.slane %v4579_v37, 1 }
 0x274   : > { %11119 = vmatprep.mubr.msk.bf16.mxu0 %vm280_vm1, %v4502_v28  ;;  %v4569_v28 = vor.u32 %v4567_v14, %v4565_v46 }
 0x275   : > { %v4582_v55 = vsel %vm958_vm2, %v4577_v29, %v4581_v63  ;;  %v4585_v32 = vor.u32 %v4583_v17, %v4581_v63  ;;  %v5247_v63 = vrot.slane %v13731_v49, %v15703_v25  ;;  %v5271_v49 = vrot.slane %v13735_v60, %v15703_v25 }
 0x276   : > { %v4574_v34 = vsel %vm958_vm2, %v4569_v28, %v4573_v11  ;;  %v5235_v28 = vrot.slane %v13733_v7, %v15703_v25  ;;  %v5259_v60 = vrot.slane %v13737_v1, %v15703_v25 }
 0x277   : > { %v4590_v18 = vsel %vm958_vm2, %v4585_v32, %v4589_v35 }
 0x278   : > { %v13816_v33 = vcombine.low %v5235_v28, %v5247_v63  ;;  %v13847_v63 = vcombine.low %v5259_v60, %v5271_v49 }
 0x27b   : > { %11120 = vmatmul.mubr.msk.bf16.gmra.mrb[8].mxu0 %vm280_vm1, %v4510_v40  ;;  %v5881_v40 = vsel %vm5879_vm5, %v5830_v39, 0 }
 0x27c   : > { %11123 = vmatprep.mubr.msk.bf16.mxu0 %vm280_vm1, %v4518_v52  ;;  %11144 = vmatpush3.bf16.msra.mxu1 %v5881_v40  ;;  %v13727_v52 = vld [vmem:[%s15585_s3] sm:$0x3] }
 0x27d   : > { %11971 = vmatprep.subr.msk.bf16.mxu1 %vm5879_vm5, %v13727_v52 }
 0x283   : > { %11124 = vmatmul.mubr.msk.bf16.gmra.mrb[12].mxu0 %vm280_vm1, %v4526_v57  ;;  %v13751_v57 = vpop.permute.xlu1 %5358 }
 0x284   : > { %11127 = vmatprep.mubr.msk.bf16.mxu0 %vm280_vm1, %v4534_v38  ;;  %v13753_v38 = vpop.permute.xlu0 %5346 }
 0x287   : > { %v13755_v6 = vpop.permute.xlu1 %5382 }
 0x288   : > { %v13757_v48 = vpop.permute.xlu0 %5370 }
 0x28b   : > { %11128 = vmatmul.mubr.msk.bf16.gmra.mrb[16].mxu0 %vm280_vm1, %v4542_v62  ;;  %v13764_v50 = vpop.permute.xlu1 %5406 }
 0x28c   : > { %11131 = vmatprep.mubr.msk.bf16.mxu0 %vm280_vm1, %v4550_v15  ;;  %v13766_v9 = vpop.permute.xlu0 %5394  ;;  %v5223_v15 = vrot.slane %v5215_v45, %v15703_v25 }
 0x28e   : > { %v10235_v46 = vcombine.low %v5211_v8, %v5223_v15 }
 0x28f   : > { %v13785_v47 = vpop.permute.xlu1 %5430 }
 0x290   : > { %v13788_v21 = vpop.permute.xlu0 %5418  ;;  %v5665_v11 = vshll.u32 %v10235_v46, 16 }
 0x293   : > { %11132 = vmatmul.mubr.msk.bf16.gmra.mrb[20].mxu0 %vm280_vm1, %v4558_v41  ;;  %v13800_v26 = vpop.permute.xlu1 %5454 }
 0x294   : > { %11135 = vmatprep.mubr.msk.bf16.mxu0 %vm280_vm1, %v4566_v51  ;;  %v13810_v44 = vpop.permute.xlu0 %5442 }
 0x297   : > { %v13823_v7 = vpop.permute.xlu1 %5478 }
 0x29b   : > { %11136 = vmatmul.mubr.msk.bf16.gmra.mrb[24].mxu0 %vm280_vm1, %v4574_v34  ;;  %v13849_v28 = vpop.permute.xlu1 %5502 }
 0x29c   : > { %11139 = vmatprep.mubr.msk.bf16.mxu0 %vm280_vm1, %v4582_v55 }
 0x2a3   : > { %11140 = vmatmul.mubr.msk.bf16.gmra.mrb[28].mxu0 %vm280_vm1, %v4590_v18  ;;  %v13814_v18 = vrot.slane %v5665_v11, 1  ;;  %v5672_v11 = vshll.u32 %v13816_v33, 16 }
 0x2a5   : > { %15704 = vst [vmem:[#allocation9_spill] sm:$0xff] %v13814_v18  ;;  %v13867_v60 = vrot.slane %v5672_v11, 1  ;;  %v5319_v11 = vrot.slane %v13743_v54, %v15703_v25  ;;  %v5343_v54 = vrot.slane %v13747_v0, %v15703_v25 }
 0x2a7   : > { %15706 = vst [vmem:[#allocation11_spill] sm:$0xff] %v13867_v60 }
 0x33e   : > { %v11113_v23 = vpop.f32.mrb[0].mxu0 }
 0x33f   : > { %v13769_v19 = vadd.f32 %v11113_v23, %v13762_v58  ;;  %v4676_v59 = vpop.f32.mrb[1].mxu0 }
 0x340   : > { %v13772_v30 = vadd.f32 %v13762_v58, %v4676_v59  ;;  %v11114_v4 = vpop.f32.mrb[2].mxu0 }
 0x341   : > { %v10205_v10 = vmul.f32 -1.442695, %v13769_v19  ;;  %v13776_v27 = vadd.f32 %v11114_v4, %v13762_v58  ;;  %v4679_v62 = vpop.f32.mrb[3].mxu0 }
 0x342   : > { %v10203_v20 = vmul.f32 -1.442695, %v13772_v30  ;;  %v13782_v42 = vadd.f32 %v13762_v58, %v4679_v62 }
 0x343   : > { %12011 = vpow2.f32 %v10205_v10  ;;  %v10206_v53 = vmul.f32 -1.442695, %v13776_v27  ;;  %v13828_v10 = vpop.permute.xlu0 %5466 }
 0x344   : > { %12013 = vpow2.f32 %v10203_v20  ;;  %v10204_v12 = vmul.f32 -1.442695, %v13782_v42 }
 0x345   : > { %12015 = vpow2.f32 %v10206_v53 }
 0x346   : > { %12017 = vpow2.f32 %v10204_v12  ;;  %v11117_v31 = vpop.f32.mrb[4].mxu0 }
 0x347   : > { %v13791_v13 = vadd.f32 %v11117_v31, %v13762_v58  ;;  %v4692_v61 = vpop.f32.mrb[5].mxu0  ;;  %v5668_v31 = vshrl.u32 %v10235_v46, 16 }
 0x348   : > { %v13794_v2 = vadd.f32 %v13762_v58, %v4692_v61  ;;  %v11118_v24 = vpop.f32.mrb[6].mxu0 }
 0x349   : > { %v10209_v41 = vmul.f32 -1.442695, %v13791_v13  ;;  %v13798_v51 = vadd.f32 %v11118_v24, %v13762_v58  ;;  %v4695_v37 = vpop.f32.mrb[7].mxu0 }
 0x34a   : > { %v10207_v14 = vmul.f32 -1.442695, %v13794_v2  ;;  %v13804_v22 = vadd.f32 %v13762_v58, %v4695_v37  ;;  %v13843_v37 = vor.u32 %v5668_v31, %v13814_v18 }
 0x34b   : > { %12019 = vpow2.f32 %v10209_v41  ;;  %v10210_v29 = vmul.f32 -1.442695, %v13798_v51 }
 0x34c   : > { %12021 = vpow2.f32 %v10207_v14  ;;  %v10208_v34 = vmul.f32 -1.442695, %v13804_v22  ;;  %15705 = vst [vmem:[#allocation10_spill] sm:$0xff] %v13843_v37 }
 0x34d   : > { %v12012_v55 = vpop.eup %12011  ;;  %12023 = vpow2.f32 %v10210_v29 }
 0x34e   : > { %v12014_v17 = vpop.eup %12013  ;;  %v4972_v36 = vadd.f32 1.0, %v12012_v55  ;;  %12025 = vpow2.f32 %v10208_v34  ;;  %v11121_v32 = vpop.f32.mrb[8].mxu0  ;;  %v5295_v55 = vrot.slane %v13739_v5, %v15703_v25 }
 0x34f   : > { %v12016_v35 = vpop.eup %12015  ;;  %v4970_v39 = vadd.f32 1.0, %v12014_v17  ;;  %v13819_v40 = vadd.f32 %v11121_v32, %v13762_v58  ;;  %v4708_v45 = vpop.f32.mrb[9].mxu0 }
 0x350   : > { %v12018_v43 = vpop.eup %12017  ;;  %12027 = vrcp.f32 %v4972_v36  ;;  %v4973_v23 = vadd.f32 1.0, %v12016_v35  ;;  %v13826_v59 = vadd.f32 %v13762_v58, %v4708_v45  ;;  %v11122_v4 = vpop.f32.mrb[10].mxu0  ;;  %v5283_v45 = vrot.slane %v13741_v56, %v15703_v25 }
 0x351   : > { %12029 = vrcp.f32 %v4970_v39  ;;  %v4971_v62 = vadd.f32 1.0, %v12018_v43  ;;  %v10213_v15 = vmul.f32 -1.442695, %v13819_v40  ;;  %v13832_v8 = vadd.f32 %v11122_v4, %v13762_v58  ;;  %v4711_v20 = vpop.f32.mrb[11].mxu0  ;;  %v13853_v17 = vpop.permute.xlu0 %5490 }
 0x352   : > { %12031 = vrcp.f32 %v4973_v23  ;;  %v10211_v53 = vmul.f32 -1.442695, %v13826_v59  ;;  %v13838_v12 = vadd.f32 %v13762_v58, %v4711_v20 }
 0x353   : > { %12033 = vrcp.f32 %v4971_v62  ;;  %v10214_v61 = vmul.f32 -1.442695, %v13832_v8 }
 0x354   : > { %12035 = vpow2.f32 %v10213_v15  ;;  %v10212_v24 = vmul.f32 -1.442695, %v13838_v12 }
 0x355   : > { %v12020_v41 = vpop.eup %12019  ;;  %12037 = vpow2.f32 %v10211_v53 }
 0x356   : > { %v12022_v1 = vpop.eup %12021  ;;  %v4976_v46 = vadd.f32 1.0, %v12020_v41  ;;  %12039 = vpow2.f32 %v10214_v61  ;;  %v11125_v29 = vpop.f32.mrb[12].mxu0  ;;  %v5680_v61 = vshll.u32 %v13847_v63, 16 }
 0x357   : > { %v12024_v34 = vpop.eup %12023  ;;  %v4974_v36 = vadd.f32 1.0, %v12022_v1  ;;  %12041 = vpow2.f32 %v10212_v24  ;;  %v13856_v32 = vadd.f32 %v11125_v29, %v13762_v58  ;;  %v4724_v35 = vpop.f32.mrb[13].mxu0 }
 0x358   : > { %v12026_v39 = vpop.eup %12025  ;;  %12043 = vrcp.f32 %v4976_v46  ;;  %v4977_v43 = vadd.f32 1.0, %v12024_v34  ;;  %v13861_v49 = vadd.f32 %v13762_v58, %v4724_v35  ;;  %v11126_v23 = vpop.f32.mrb[14].mxu0  ;;  %v13876_v46 = vcombine.low %v5283_v45, %v5295_v55 }
 0x359   : > { %12045 = vrcp.f32 %v4974_v36  ;;  %v4975_v5 = vadd.f32 1.0, %v12026_v39  ;;  %v10217_v4 = vmul.f32 -1.442695, %v13856_v32  ;;  %v13865_v62 = vadd.f32 %v11126_v23, %v13762_v58  ;;  %v4727_v15 = vpop.f32.mrb[15].mxu0  ;;  %v13880_v29 = vpop.permute.xlu1 %5526 }
 0x35a   : > { %v12028_v20 = vpop.eup %12027  ;;  %12047 = vrcp.f32 %v4977_v43  ;;  %v10215_v56 = vmul.f32 -1.442695, %v13861_v49  ;;  %v13871_v53 = vadd.f32 %v13762_v58, %v4727_v15  ;;  %v5307_v35 = vrot.slane %v13745_v3, %v15703_v25  ;;  %v13885_v39 = vpop.permute.xlu0 %5514 }
 0x35b   : > { %v12030_v31 = vpop.eup %12029  ;;  %12049 = vrcp.f32 %v4975_v5  ;;  %v10218_v41 = vmul.f32 -1.442695, %v13865_v62  ;;  %v5068_v43 = vmul.f32 %v12028_v20, %v13769_v19  ;;  %v5331_v20 = vrot.slane %v13749_v16, %v15703_v25 }
 0x35c   : > { %v12032_v1 = vpop.eup %12031  ;;  %12051 = vpow2.f32 %v10217_v4  ;;  %v10216_v34 = vmul.f32 -1.442695, %v13871_v53  ;;  %v5066_v45 = vmul.f32 %v12030_v31, %v13772_v30 }
 0x35d   : > { %v12034_v36 = vpop.eup %12033  ;;  %v5069_v23 = vmul.f32 %v12032_v1, %v13776_v27  ;;  %12053 = vpow2.f32 %v10215_v56 }
 0x35e   : > { %v12036_v55 = vpop.eup %12035  ;;  %v5067_v5 = vmul.f32 %v12034_v36, %v13782_v42  ;;  %12055 = vpow2.f32 %v10218_v41  ;;  %v11129_v4 = vpop.f32.mrb[16].mxu0 }
 0x35f   : > { %v12038_v15 = vpop.eup %12037  ;;  %v5120_v24 = vpack.c.bf16 %v5069_v23, %v5068_v43  ;;  %v4980_v3 = vadd.f32 1.0, %v12036_v55  ;;  %12057 = vpow2.f32 %v10216_v34  ;;  %v13894_v14 = vadd.f32 %v11129_v4, %v13762_v58  ;;  %v4740_v19 = vpop.f32.mrb[17].mxu0 }
 0x360   : > { %v12040_v27 = vpop.eup %12039  ;;  %v5119_v56 = vpack.c.bf16 %v5067_v5, %v5066_v45  ;;  %v4978_v0 = vadd.f32 1.0, %v12038_v15  ;;  %v13899_v30 = vadd.f32 %v13762_v58, %v4740_v19  ;;  %v11130_v42 = vpop.f32.mrb[18].mxu0  ;;  %v15707_v5 = vshrl.u32 %v13816_v33, 16 }
 0x361   : > { %v12042_v31 = vpop.eup %12041  ;;  %5136 = vst.msk [vmem:[#allocation3 + $0x18] sm:$0xff] %vm5098_vm4, %v5120_v24  ;;  %12059 = vrcp.f32 %v4980_v3  ;;  %v4981_v41 = vadd.f32 1.0, %v12040_v27  ;;  %v10221_v1 = vmul.f32 -1.442695, %v13894_v14  ;;  %v13904_v34 = vadd.f32 %v11130_v42, %v13762_v58  ;;  %v4743_v36 = vpop.f32.mrb[19].mxu0 }
 0x362   : > { %v12044_v43 = vpop.eup %12043  ;;  %v13906_v23 = vpop.permute.xlu1 %5550  ;;  %5135 = vst.msk [vmem:[#allocation3 + $0x10] sm:$0xff] %vm5098_vm4, %v5119_v56  ;;  %12061 = vrcp.f32 %v4978_v0  ;;  %v4979_v16 = vadd.f32 1.0, %v12042_v31  ;;  %v10219_v55 = vmul.f32 -1.442695, %v13899_v30  ;;  %v13911_v45 = vadd.f32 %v13762_v58, %v4743_v36 }
 0x363   : > { %v12046_v24 = vpop.eup %12045  ;;  %v13916_v4 = vor.u32 %v15707_v5, %v13867_v60  ;;  %v13918_v15 = vrot.slane %v5680_v61, 1  ;;  %v13920_v3 = vpop.permute.xlu0 %5538  ;;  %12063 = vrcp.f32 %v4981_v41  ;;  %v10222_v19 = vmul.f32 -1.442695, %v13904_v34 }
 0x364   : > { %v12048_v27 = vpop.eup %12047  ;;  %v5688_v56 = vshll.u32 %v13876_v46, 16  ;;  %v13924_v0 = vcombine.low %v5307_v35, %v5319_v11  ;;  %12065 = vrcp.f32 %v4979_v16  ;;  %v10220_v42 = vmul.f32 -1.442695, %v13911_v45 }
 0x365   : > { %15708 = vst [vmem:[#allocation12_spill] sm:$0xff] %v13916_v4  ;;  %v12050_v31 = vpop.eup %12049  ;;  %v13927_v36 = vcombine.low %v5331_v20, %v5343_v54  ;;  %v5072_v33 = vmul.f32 %v12044_v43, %v13791_v13  ;;  %v5073_v61 = vmul.f32 %v12048_v27, %v13798_v51  ;;  %12067 = vpow2.f32 %v10221_v1 }
 0x366   : > { %v12052_v5 = vpop.eup %12051  ;;  %v5070_v41 = vmul.f32 %v12046_v24, %v13794_v2  ;;  %v5071_v18 = vmul.f32 %v12050_v31, %v13804_v22  ;;  %12069 = vpow2.f32 %v10219_v55  ;;  %v11133_v4 = vpop.f32.mrb[20].mxu0  ;;  %v6225_v11 = vsel %vm5879_vm5, %v13727_v52, 0  ;;  %v13946_v52 = vld [vmem:[%s15585_s3 + $0x4] sm:$0x3] }
 0x367   : > { %v12054_v35 = vpop.eup %12053  ;;  %v5122_v16 = vpack.c.bf16 %v5073_v61, %v5072_v33  ;;  %v4984_v37 = vadd.f32 1.0, %v12052_v5  ;;  %12071 = vpow2.f32 %v10222_v19  ;;  %v13936_v54 = vadd.f32 %v11133_v4, %v13762_v58  ;;  %v4756_v13 = vpop.f32.mrb[21].mxu0  ;;  %15710 = vst [vmem:[#allocation5_spill] sm:$0xff] %v13946_v52 }
 0x368   : > { %v12056_v51 = vpop.eup %12055  ;;  %v13938_v20 = vpop.permute.xlu1 %5574  ;;  %v5121_v1 = vpack.c.bf16 %v5071_v18, %v5070_v41  ;;  %v4982_v2 = vadd.f32 1.0, %v12054_v35  ;;  %12073 = vpow2.f32 %v10220_v42  ;;  %v13941_v22 = vadd.f32 %v13762_v58, %v4756_v13  ;;  %v13962_v5 = vld [vmem:[#allocation3 + $0x18] sm:$0xff] }
 0x369   : > { %15709 = vst [vmem:[#allocation17_spill] sm:$0xff] %v13938_v20  ;;  %v11134_v43 = vpop.f32.mrb[22].mxu0  ;;  %v12058_v55 = vpop.eup %12057  ;;  %5138 = vst.msk [vmem:[#allocation3 + $0x28] sm:$0xff] %vm5098_vm4, %v5122_v16  ;;  %12075 = vrcp.f32 %v4984_v37  ;;  %v4985_v4 = vadd.f32 1.0, %v12056_v51  ;;  %v10225_v18 = vmul.f32 -1.442695, %v13936_v54 }
 0x36a   : > { %v13948_v24 = vpop.permute.xlu0 %5562  ;;  %v13953_v19 = vadd.f32 %v11134_v43, %v13762_v58  ;;  %v4759_v27 = vpop.f32.mrb[23].mxu0  ;;  %v13955_v42 = vld [vmem:[#allocation3 + $0x10] sm:$0xff]  ;;  %5137 = vst.msk [vmem:[#allocation3 + $0x20] sm:$0xff] %vm5098_vm4, %v5121_v1  ;;  %12077 = vrcp.f32 %v4982_v2  ;;  %v4983_v31 = vadd.f32 1.0, %v12058_v55  ;;  %v10223_v33 = vmul.f32 -1.442695, %v13941_v22 }
 0x36b   : > { %15711 = vst [vmem:[#allocation6_spill] sm:$0xff] %v13948_v24  ;;  %15712 = vst [vmem:[#allocation7_spill] sm:$0xff] %v13955_v42  ;;  %v13960_v61 = vadd.f32 %v13762_v58, %v4759_v27  ;;  %11146 = vmatmul.mubr.msk.bf16.vlgmr.msra.gmra.mrb[0].mxu1 %vm5098_vm4, %v13955_v42  ;;  %v12060_v37 = vpop.eup %12059  ;;  %v13966_v41 = vrot.slane %v5688_v56, 1  ;;  %12079 = vrcp.f32 %v4985_v4  ;;  %v5696_v51 = vshll.u32 %v13924_v0, 16 }
 0x36c   : > { %15713 = vst [vmem:[#allocation8_spill] sm:$0xff] %v13962_v5  ;;  %v10226_v16 = vmul.f32 -1.442695, %v13953_v19  ;;  %11178 = vmatpush3.bf16.msra.mxu1 %v6225_v11  ;;  %11149 = vmatprep.mubr.msk.bf16.mxu1 %vm5098_vm4, %v13962_v5  ;;  %v12062_v13 = vpop.eup %12061  ;;  %v5367_v1 = vrot.slane %v13751_v57, %v15703_v25  ;;  %12081 = vrcp.f32 %v4983_v31  ;;  %v5704_v43 = vshll.u32 %v13927_v36, 16  ;;  %v13985_v27 = vpop.permute.xlu1 %6451 }
 0x36d   : > { %v10224_v2 = vmul.f32 -1.442695, %v13960_v61  ;;  %11972 = vmatprep.subr.msk.bf16.mxu1 %vm5879_vm5, %v13946_v52  ;;  %v12064_v56 = vpop.eup %12063  ;;  %v5355_v11 = vrot.slane %v13753_v38, %v15703_v25  ;;  %v5391_v55 = vrot.slane %v13755_v6, %v15703_v25  ;;  %12083 = vpow2.f32 %v10225_v18 }
 0x36e   : > { %v12066_v4 = vpop.eup %12065  ;;  %v5379_v57 = vrot.slane %v13757_v48, %v15703_v25  ;;  %v5076_v31 = vmul.f32 %v12060_v37, %v13819_v40  ;;  %v5077_v35 = vmul.f32 %v12064_v56, %v13832_v8  ;;  %12085 = vpow2.f32 %v10223_v33  ;;  %v13989_v52 = vpop.f32.mrb[24].mxu0 }
 0x36f   : > { %v12068_v5 = vpop.eup %12067  ;;  %v5700_v38 = vshrl.u32 %v13924_v0, 16  ;;  %v13992_v42 = vpop.permute.xlu0 %6439  ;;  %v5074_v6 = vmul.f32 %v12062_v13, %v13826_v59  ;;  %v5075_v18 = vmul.f32 %v12066_v4, %v13838_v12  ;;  %12087 = vpow2.f32 %v10226_v16 }
 0x370   : > { %v13996_v48 = vpop.f32.mrb[25].mxu0  ;;  %v12070_v60 = vpop.eup %12069  ;;  %v13998_v24 = vrot.slane %v5696_v51, 1  ;;  %v5124_v40 = vpack.c.bf16 %v5077_v35, %v5076_v31  ;;  %v4988_v8 = vadd.f32 1.0, %v12068_v5  ;;  %12089 = vpow2.f32 %v10224_v2  ;;  %v14014_v35 = vld [vmem:[#allocation3 + $0x28] sm:$0xff] }
 0x371   : > { %v14000_v33 = vpop.f32.mrb[26].mxu0  ;;  %v12072_v37 = vpop.eup %12071  ;;  %v14002_v56 = vrot.slane %v5704_v43, 1  ;;  %v5708_v0 = vshrl.u32 %v13927_v36, 16  ;;  %v5123_v20 = vpack.c.bf16 %v5075_v18, %v5074_v6  ;;  %v4986_v59 = vadd.f32 1.0, %v12070_v60  ;;  %v14005_v13 = vld [vmem:[#allocation3 + $0x20] sm:$0xff]  ;;  %15714 = vst [vmem:[#allocation13_spill] sm:$0xff] %v14014_v35 }
 0x372   : > { %v14007_v12 = vpop.f32.mrb[27].mxu0  ;;  %v12074_v16 = vpop.eup %12073  ;;  %v14009_v4 = vcombine.low %v5355_v11, %v5367_v1  ;;  %v14011_v51 = vcombine.low %v5379_v57, %v5391_v55  ;;  %5140 = vst.msk [vmem:[#allocation3 + $0x38] sm:$0xff] %vm5098_vm4, %v5124_v40  ;;  %12091 = vrcp.f32 %v4988_v8  ;;  %v4989_v5 = vadd.f32 1.0, %v12072_v37 }
 0x373   : > { %11150 = vmatmul.mubr.msk.bf16.gmra.mrb[4].mxu1 %vm5098_vm4, %v14005_v13  ;;  %v12076_v36 = vpop.eup %12075  ;;  %v5415_v60 = vrot.slane %v13764_v50, %v15703_v25  ;;  %v5403_v2 = vrot.slane %v13766_v9, %v15703_v25  ;;  %5139 = vst.msk [vmem:[#allocation3 + $0x30] sm:$0xff] %vm5098_vm4, %v5123_v20  ;;  %12093 = vrcp.f32 %v4986_v59  ;;  %v4987_v1 = vadd.f32 1.0, %v12074_v16  ;;  %v14045_v18 = vpop.permute.xlu1 %6475 }
 0x374   : > { %11153 = vmatprep.mubr.msk.bf16.mxu1 %vm5098_vm4, %v14014_v35  ;;  %v12078_v43 = vpop.eup %12077  ;;  %v15715_v11 = vshrl.u32 %v13847_v63, 16  ;;  %v5439_v57 = vrot.slane %v13785_v47, %v15703_v25  ;;  %v5427_v50 = vrot.slane %v13788_v21, %v15703_v25  ;;  %12095 = vrcp.f32 %v4989_v5  ;;  %v14047_v40 = vpop.permute.xlu0 %6463 }
 0x375   : > { %v12080_v9 = vpop.eup %12079  ;;  %v15716_v20 = vshrl.u32 %v13876_v46, 16  ;;  %v14040_v6 = vor.u32 %v5700_v38, %v13998_v24  ;;  %v14043_v63 = vor.u32 %v5708_v0, %v14002_v56  ;;  %12097 = vrcp.f32 %v4987_v1 }
 0x376   : > { %v14028_v55 = vor.u32 %v15715_v11, %v13918_v15  ;;  %v12082_v47 = vpop.eup %12081  ;;  %v5712_v21 = vshll.u32 %v14009_v4, 16  ;;  %v5080_v46 = vmul.f32 %v12076_v36, %v13856_v32  ;;  %v5081_v37 = vmul.f32 %v12080_v9, %v13865_v62  ;;  %v14053_v59 = vpop.f32.mrb[28].mxu0 }
 0x377   : > { %v14037_v31 = vor.u32 %v15716_v20, %v13966_v41  ;;  %15717 = vst [vmem:[#allocation14_spill] sm:$0xff] %v14040_v6  ;;  %15718 = vst [vmem:[#allocation15_spill] sm:$0xff] %v14043_v63  ;;  %v12084_v38 = vpop.eup %12083  ;;  %v5720_v0 = vshll.u32 %v14011_v51, 16  ;;  %v14056_v16 = vcombine.low %v5403_v2, %v5415_v60  ;;  %v5078_v5 = vmul.f32 %v12078_v43, %v13861_v49  ;;  %v14060_v11 = vpop.f32.mrb[29].mxu0 }
 0x378   : > { %v5079_v1 = vmul.f32 %v12082_v47, %v13871_v53  ;;  %v12086_v20 = vpop.eup %12085  ;;  %v14062_v63 = vcombine.low %v5427_v50, %v5439_v57  ;;  %v5126_v8 = vpack.c.bf16 %v5081_v37, %v5080_v46  ;;  %v4992_v32 = vadd.f32 1.0, %v12084_v38  ;;  %v11142_v36 = vpop.f32.mrb[30].mxu0 }
 0x379   : > { %v14066_v62 = vadd.f32 %v13989_v52, %v13762_v58  ;;  %v12088_v9 = vpop.eup %12087  ;;  %v5463_v60 = vrot.slane %v13800_v26, %v15703_v25  ;;  %v5451_v49 = vrot.slane %v13810_v44, %v15703_v25  ;;  %v4990_v2 = vadd.f32 1.0, %v12086_v20  ;;  %v4791_v43 = vpop.f32.mrb[31].mxu0 }
 0x37a   : > { %v5125_v53 = vpack.c.bf16 %v5079_v1, %v5078_v5  ;;  %v12090_v47 = vpop.eup %12089  ;;  %5142 = vst.msk [vmem:[#allocation3 + $0x48] sm:$0xff] %vm5098_vm4, %v5126_v8  ;;  %12099 = vrcp.f32 %v4992_v32  ;;  %v4993_v57 = vadd.f32 1.0, %v12088_v9  ;;  %v14076_v52 = vadd.f32 %v13762_v58, %v13996_v48  ;;  %v14078_v46 = vld [vmem:[#allocation3 + $0x30] sm:$0xff]  ;;  %v14080_v26 = vpop.permute.xlu1 %6499  ;;  %v14093_v48 = vld [vmem:[#allocation3 + $0x38] sm:$0xff] }
 0x37b   : > { %v10229_v50 = vmul.f32 -1.442695, %v14066_v62  ;;  %15719 = vst [vmem:[#allocation16_spill] sm:$0xff] %v14078_v46  ;;  %v14082_v37 = vpop.permute.xlu0 %6487  ;;  %12101 = vrcp.f32 %v4990_v2  ;;  %v4991_v44 = vadd.f32 1.0, %v12090_v47  ;;  %v14087_v8 = vadd.f32 %v14000_v33, %v13762_v58  ;;  %15720 = vst [vmem:[#allocation18_spill] sm:$0xff] %v14093_v48  ;;  %11154 = vmatmul.mubr.msk.bf16.gmra.mrb[8].mxu1 %vm5098_vm4, %v14078_v46 }
 0x37c   : > { %5141 = vst.msk [vmem:[#allocation3 + $0x40] sm:$0xff] %vm5098_vm4, %v5125_v53  ;;  %v14091_v38 = vadd.f32 %v13762_v58, %v14007_v12  ;;  %v12092_v5 = vpop.eup %12091  ;;  %v14097_v1 = vrot.slane %v5712_v21, 1  ;;  %12103 = vrcp.f32 %v4993_v57  ;;  %v10227_v32 = vmul.f32 -1.442695, %v14076_v52  ;;  %11157 = vmatprep.mubr.msk.bf16.mxu1 %vm5098_vm4, %v14093_v48 }
 0x37d   : > { %v12094_v33 = vpop.eup %12093  ;;  %v14103_v9 = vrot.slane %v5720_v0, 1  ;;  %12105 = vrcp.f32 %v4991_v44  ;;  %v10230_v12 = vmul.f32 -1.442695, %v14087_v8  ;;  %v5728_v21 = vshll.u32 %v14056_v16, 16 }
 0x37e   : > { %v10228_v53 = vmul.f32 -1.442695, %v14091_v38  ;;  %v12096_v2 = vpop.eup %12095  ;;  %v5736_v47 = vshll.u32 %v14062_v63, 16  ;;  %v14109_v20 = vcombine.low %v5451_v49, %v5463_v60  ;;  %12107 = vpow2.f32 %v10229_v50 }
 0x37f   : > { %v12098_v57 = vpop.eup %12097  ;;  %v5487_v48 = vrot.slane %v13823_v7, %v15703_v25  ;;  %v5084_v0 = vmul.f32 %v12092_v5, %v13894_v14  ;;  %v5085_v44 = vmul.f32 %v12096_v2, %v13904_v34  ;;  %12109 = vpow2.f32 %v10227_v32  ;;  %v14123_v7 = vpop.permute.xlu1 %6523 }
 0x380   : > { %v5475_v46 = vrot.slane %v13828_v10, %v15703_v25  ;;  %v5082_v35 = vmul.f32 %v12094_v33, %v13899_v30  ;;  %v5083_v6 = vmul.f32 %v12098_v57, %v13911_v45  ;;  %12111 = vpow2.f32 %v10230_v12  ;;  %v14125_v14 = vpop.permute.xlu0 %6511 }
 0x381   : > { %v5511_v60 = vrot.slane %v13849_v28, %v15703_v25  ;;  %v5499_v49 = vrot.slane %v13853_v17, %v15703_v25  ;;  %v5128_v34 = vpack.c.bf16 %v5085_v44, %v5084_v0  ;;  %12113 = vpow2.f32 %v10228_v53 }
 0x382   : > { %v5127_v10 = vpack.c.bf16 %v5083_v6, %v5082_v35  ;;  %v14130_v30 = vadd.f32 %v14053_v59, %v13762_v58  ;;  %v14134_v45 = vadd.f32 %v13762_v58, %v14060_v11  ;;  %v14138_v17 = vrot.slane %v5728_v21, 1  ;;  %v14148_v6 = vld [vmem:[#allocation3 + $0x48] sm:$0xff] }
 0x383   : > { %v14136_v28 = vld [vmem:[#allocation3 + $0x40] sm:$0xff]  ;;  %5144 = vst.msk [vmem:[#allocation3 + $0x58] sm:$0xff] %vm5098_vm4, %v5128_v34  ;;  %v14143_v32 = vadd.f32 %v11142_v36, %v13762_v58  ;;  %v14146_v35 = vadd.f32 %v13762_v58, %v4791_v43  ;;  %15721 = vst [vmem:[#allocation19_spill] sm:$0xff] %v14148_v6  ;;  %v14152_v11 = vrot.slane %v5736_v47, 1  ;;  %v5744_v33 = vshll.u32 %v14109_v20, 16 }
 0x384   : > { %11158 = vmatmul.mubr.msk.bf16.gmra.mrb[12].mxu1 %vm5098_vm4, %v14136_v28  ;;  %v12100_v59 = vpop.eup %12099  ;;  %5143 = vst.msk [vmem:[#allocation3 + $0x50] sm:$0xff] %vm5098_vm4, %v5127_v10  ;;  %v10233_v12 = vmul.f32 -1.442695, %v14130_v30  ;;  %v10231_v36 = vmul.f32 -1.442695, %v14134_v45  ;;  %v14160_v43 = vcombine.low %v5475_v46, %v5487_v48  ;;  %v14162_v53 = vcombine.low %v5499_v49, %v5511_v60  ;;  %v14174_v48 = vpop.permute.xlu1 %6547 }
 0x385   : > { %11161 = vmatprep.mubr.msk.bf16.mxu1 %vm5098_vm4, %v14148_v6  ;;  %v12102_v58 = vpop.eup %12101  ;;  %v10234_v2 = vmul.f32 -1.442695, %v14143_v32  ;;  %v10232_v21 = vmul.f32 -1.442695, %v14146_v35  ;;  %v5535_v57 = vrot.slane %v13880_v29, %v15703_v25  ;;  %v5523_v0 = vrot.slane %v13885_v39, %v15703_v25  ;;  %v14176_v60 = vpop.permute.xlu0 %6535 }
 0x386   : > { %v12104_v47 = vpop.eup %12103  ;;  %v5559_v44 = vrot.slane %v13906_v23, %v15703_v25  ;;  %12115 = vpow2.f32 %v10233_v12  ;;  %v5547_v46 = vrot.slane %v13920_v3, %v15703_v25  ;;  %v5088_v49 = vmul.f32 %v12100_v59, %v13936_v54 }
 0x387   : > { %v12106_v34 = vpop.eup %12105  ;;  %v5089_v10 = vmul.f32 %v12104_v47, %v13953_v19  ;;  %12117 = vpow2.f32 %v10231_v36  ;;  %v6460_v39 = vrot.slane %v13985_v27, %v15703_v25  ;;  %v5086_v23 = vmul.f32 %v12102_v58, %v13941_v22 }
 0x388   : > { %v12108_v29 = vpop.eup %12107  ;;  %v5087_v12 = vmul.f32 %v12106_v34, %v13960_v61  ;;  %12119 = vpow2.f32 %v10234_v2  ;;  %v6448_v3 = vrot.slane %v13992_v42, %v15703_v25  ;;  %v14186_v59 = vrot.slane %v5744_v33, 1  ;;  %v15723_v33 = vld [vmem:[#allocation17_spill] sm:$0xff] }
 0x389   : > { %v12110_v5 = vpop.eup %12109  ;;  %v5130_v50 = vpack.c.bf16 %v5089_v10, %v5088_v49  ;;  %v4996_v6 = vadd.f32 1.0, %v12108_v29  ;;  %12121 = vpow2.f32 %v10232_v21  ;;  %v5748_v19 = vshrl.u32 %v14109_v20, 16 }
 0x38a   : > { %v12112_v54 = vpop.eup %12111  ;;  %v5129_v36 = vpack.c.bf16 %v5087_v12, %v5086_v23  ;;  %v4994_v47 = vadd.f32 1.0, %v12110_v5  ;;  %v5752_v22 = vshll.u32 %v14160_v43, 16  ;;  %v5760_v61 = vshll.u32 %v14162_v53, 16  ;;  %v14199_v5 = vld [vmem:[#allocation3 + $0x58] sm:$0xff] }
 0x38b   : > { %v12114_v27 = vpop.eup %12113  ;;  %5146 = vst.msk [vmem:[#allocation3 + $0x68] sm:$0xff] %vm5098_vm4, %v5130_v50  ;;  %12123 = vrcp.f32 %v4996_v6  ;;  %v4997_v58 = vadd.f32 1.0, %v12112_v54  ;;  %v14192_v42 = vld [vmem:[#allocation3 + $0x50] sm:$0xff]  ;;  %v14194_v2 = vcombine.low %v5523_v0, %v5535_v57  ;;  %v14196_v21 = vcombine.low %v5547_v46, %v5559_v44  ;;  %v14209_v57 = vpop.permute.xlu1 %6571 }
 0x38c   : > { %15722 = vst [vmem:[#allocation4_spill] sm:$0xff] %v14192_v42  ;;  %5145 = vst.msk [vmem:[#allocation3 + $0x60] sm:$0xff] %vm5098_vm4, %v5129_v36  ;;  %12125 = vrcp.f32 %v4994_v47  ;;  %v4995_v20 = vadd.f32 1.0, %v12114_v27  ;;  %11162 = vmatmul.mubr.msk.bf16.gmra.mrb[16].mxu1 %vm5098_vm4, %v14192_v42  ;;  %v5583_v50 = vrot.slane %v15723_v33, %v15703_v25  ;;  %v15724_v6 = vld [vmem:[#allocation6_spill] sm:$0xff]  ;;  %v14207_v49 = vcombine.low %v6448_v3, %v6460_v39  ;;  %v14211_v0 = vpop.permute.xlu0 %6559 }
 0x38d   : > { %v5571_v34 = vrot.slane %v15724_v6, %v15703_v25  ;;  %12127 = vrcp.f32 %v4997_v58  ;;  %11165 = vmatprep.mubr.msk.bf16.mxu1 %vm5098_vm4, %v14199_v5  ;;  %v15725_v44 = vshrl.u32 %v14009_v4, 16  ;;  %v15726_v10 = vshrl.u32 %v14011_v51, 16 }
 0x38e   : > { %v15727_v39 = vshrl.u32 %v14056_v16, 16  ;;  %12129 = vrcp.f32 %v4995_v20  ;;  %v15728_v12 = vshrl.u32 %v14062_v63, 16  ;;  %v14236_v4 = vor.u32 %v5748_v19, %v14186_v59 }
 0x38f   : > { %v14218_v46 = vor.u32 %v15725_v44, %v14097_v1  ;;  %v14223_v29 = vor.u32 %v15726_v10, %v14103_v9  ;;  %v14238_v54 = vrot.slane %v5752_v22, 1  ;;  %v14240_v36 = vrot.slane %v5760_v61, 1 }
 0x390   : > { %v14228_v23 = vor.u32 %v15727_v39, %v14138_v17  ;;  %v14233_v3 = vor.u32 %v15728_v12, %v14152_v11  ;;  %v12116_v51 = vpop.eup %12115  ;;  %v5756_v47 = vshrl.u32 %v14160_v43, 16  ;;  %v5764_v16 = vshrl.u32 %v14162_v53, 16  ;;  %v14265_v39 = vpop.permute.xlu0 %6583 }
 0x391   : > { %15729 = vst [vmem:[#allocation17_spill] sm:$0xff] %v14240_v36  ;;  %v5768_v27 = vshll.u32 %v14194_v2, 16  ;;  %v5776_v58 = vshll.u32 %v14196_v21, 16  ;;  %v12118_v20 = vpop.eup %12117  ;;  %v14246_v63 = vcombine.low %v5571_v34, %v5583_v50  ;;  %v6902_v33 = vshrl.u32 %v14207_v49, 16 }
 0x392   : > { %v6484_v19 = vrot.slane %v14045_v18, %v15703_v25  ;;  %v5000_v22 = vadd.f32 1.0, %v12116_v51  ;;  %v12120_v61 = vpop.eup %12119  ;;  %v6472_v6 = vrot.slane %v14047_v40, %v15703_v25  ;;  %v6508_v43 = vrot.slane %v14080_v26, %v15703_v25  ;;  %v14263_v18 = vpop.permute.xlu1 %6595 }
 0x393   : > { %v6496_v53 = vrot.slane %v14082_v37, %v15703_v25  ;;  %v4998_v44 = vadd.f32 1.0, %v12118_v20  ;;  %v12122_v10 = vpop.eup %12121  ;;  %v14258_v50 = vor.u32 %v5756_v47, %v14238_v54  ;;  %v14261_v34 = vor.u32 %v5764_v16, %v14240_v36  ;;  %v14267_v12 = vld [vmem:[#allocation3 + $0x60] sm:$0xff]  ;;  %v14272_v20 = vld [vmem:[#allocation3 + $0x68] sm:$0xff]  ;;  %v15737_v36 = vld [vmem:[#allocation10_spill] sm:$0xff] }
 0x394   : > { %12131 = vrcp.f32 %v5000_v22  ;;  %v5001_v40 = vadd.f32 1.0, %v12120_v61  ;;  %15732 = vst [vmem:[#allocation21_spill] sm:$0xff] %v14267_v12  ;;  %v14269_v26 = vrot.slane %v5768_v27, 1  ;;  %v5772_v37 = vshrl.u32 %v14194_v2, 16  ;;  %15733 = vst [vmem:[#allocation22_spill] sm:$0xff] %v14272_v20  ;;  %11166 = vmatmul.mubr.msk.bf16.gmra.mrb[20].mxu1 %vm5098_vm4, %v14267_v12 }
 0x395   : > { %15730 = vst [vmem:[#allocation6_spill] sm:$0xff] %v14258_v50  ;;  %15731 = vst [vmem:[#allocation20_spill] sm:$0xff] %v14261_v34  ;;  %12133 = vrcp.f32 %v4998_v44  ;;  %v4999_v51 = vadd.f32 1.0, %v12122_v10  ;;  %v12124_v47 = vpop.eup %12123  ;;  %v14276_v16 = vrot.slane %v5776_v58, 1  ;;  %v5784_v34 = vshll.u32 %v14246_v63, 16  ;;  %11169 = vmatprep.mubr.msk.bf16.mxu1 %vm5098_vm4, %v14272_v20 }
 0x396   : > { %v6905_v22 = vshll.u32 %v14207_v49, 16  ;;  %12135 = vrcp.f32 %v5001_v40  ;;  %v12126_v27 = vpop.eup %12125  ;;  %v14282_v2 = vrot.slane %v6902_v33, 7  ;;  %v14284_v61 = vcombine.low %v6472_v6, %v6484_v19 }
 0x397   : > { %v14286_v44 = vcombine.low %v6496_v53, %v6508_v43  ;;  %12137 = vrcp.f32 %v4999_v51  ;;  %v12128_v10 = vpop.eup %12127  ;;  %v6532_v58 = vrot.slane %v14123_v7, %v15703_v25  ;;  %v6520_v12 = vrot.slane %v14125_v14, %v15703_v25  ;;  %v6620_v51 = vpop.permute.xlu1 %6619 }
 0x398   : > { %v6556_v49 = vrot.slane %v14174_v48, %v15703_v25  ;;  %v6544_v40 = vrot.slane %v14176_v60, %v15703_v25  ;;  %v12130_v33 = vpop.eup %12129  ;;  %v6580_v19 = vrot.slane %v14209_v57, %v15703_v25  ;;  %v6568_v6 = vrot.slane %v14211_v0, %v15703_v25  ;;  %v6608_v48 = vpop.permute.xlu0 %6607  ;;  %v15736_v0 = vld [vmem:[#allocation11_spill] sm:$0xff] }
 0x399   : > { %v5092_v43 = vmul.f32 %v12124_v47, %v14066_v62  ;;  %v5093_v7 = vmul.f32 %v12128_v10, %v14087_v8  ;;  %v5780_v53 = vshrl.u32 %v14196_v21, 16  ;;  %v14303_v14 = vrot.slane %v5784_v34, 1  ;;  %v6388_v21 = vld [vmem:[#allocation3 + $0x8] sm:$0xff] }
 0x39a   : > { %v5090_v20 = vmul.f32 %v12126_v27, %v14076_v52  ;;  %v5091_v60 = vmul.f32 %v12130_v33, %v14091_v38  ;;  %v5788_v50 = vshrl.u32 %v14246_v63, 16  ;;  %v14309_v57 = vor.u32 %v6905_v22, %v14282_v2 }
 0x39b   : > { %15734 = vst [vmem:[#allocation23_spill] sm:$0xff] %v14303_v14  ;;  %v14314_v62 = vsel %vm958_vm2, %v15737_v36, %v15736_v0  ;;  %v5132_v8 = vpack.c.bf16 %v5093_v7, %v5092_v43  ;;  %v6909_v34 = vshrl.u32 %v14284_v61, 16  ;;  %v6917_v47 = vshrl.u32 %v14286_v44, 16 }
 0x39c   : > { %15735 = vst [vmem:[#allocation24_spill] sm:$0xff] %v14309_v57  ;;  %15738 = vst [vmem:[#allocation11_spill] sm:$0xff] %v14314_v62  ;;  %v14318_v10 = vcombine.low %v6520_v12, %v6532_v58  ;;  %v5131_v52 = vpack.c.bf16 %v5091_v60, %v5090_v20  ;;  %v14321_v38 = vor.u32 %v5772_v37, %v14269_v26  ;;  %v12274_v20 = vld [vmem:[#allocation3 + $0x8] sm:$0xff]  ;;  %v6644_v60 = vpop.permute.xlu1 %6643  ;;  %v6632_v0 = vpop.permute.xlu0 %6631 }
 0x39d   : > { %v14324_v63 = vor.u32 %v5780_v53, %v14276_v16  ;;  %v14326_v22 = vcombine.low %v6544_v40, %v6556_v49  ;;  %v14328_v27 = vcombine.low %v6568_v6, %v6580_v19  ;;  %5148 = vst.msk [vmem:[#allocation3 + $0x78] sm:$0xff] %vm5098_vm4, %v5132_v8  ;;  %v14332_v33 = vor.u32 %v5788_v50, %v14303_v14 }
 0x39e   : > { %15739 = vst [vmem:[#allocation10_spill] sm:$0xff] %v14321_v38  ;;  %v12132_v36 = vpop.eup %12131  ;;  %v6604_v12 = vrot.slane %v14263_v18, %v15703_v25  ;;  %v6592_v37 = vrot.slane %v14265_v39, %v15703_v25  ;;  %v14339_v58 = vmul.bf16 %v12274_v20, %v14314_v62  ;;  %5147 = vst.msk [vmem:[#allocation3 + $0x70] sm:$0xff] %vm5098_vm4, %v5131_v52  ;;  %v6912_v19 = vshll.u32 %v14284_v61, 16  ;;  %v15742_v38 = vld [vmem:[#allocation12_spill] sm:$0xff] }
 0x39f   : > { %15740 = vst [vmem:[#allocation25_spill] sm:$0xff] %v14324_v63  ;;  %15741 = vst [vmem:[#allocation26_spill] sm:$0xff] %v14332_v33  ;;  %v12134_v49 = vpop.eup %12133  ;;  %v14343_v40 = vmul.bf16 %v14309_v57, %v6388_v21  ;;  %v6628_v50 = vrot.slane %v6620_v51, %v15703_v25  ;;  %v6616_v6 = vrot.slane %v6608_v48, %v15703_v25  ;;  %v6911_v43 = vrot.slane %v6909_v34, 7  ;;  %v5151_v48 = vld [vmem:[#allocation3] sm:$0x80] }
 0x3a0   : > { %v12136_v18 = vpop.eup %12135  ;;  %v14348_v7 = vrot.slane %v6917_v47, 7  ;;  %v6920_v39 = vshll.u32 %v14286_v44, 16  ;;  %v6925_v53 = vshrl.u32 %v14318_v10, 16  ;;  %v6933_v21 = vshrl.u32 %v14326_v22, 16 }
 0x3a1   : > { %v12138_v8 = vpop.eup %12137  ;;  %v6941_v52 = vshrl.u32 %v14328_v27, 16  ;;  %v5096_v61 = vmul.f32 %v12132_v36, %v14130_v30  ;;  %v5097_v51 = vmul.f32 %v12136_v18, %v14143_v32  ;;  %v10290_v20 = vcombine.low %v6592_v37, %v6604_v12  ;;  %v15743_v36 = vld [vmem:[#allocation9_spill] sm:$0xff]  ;;  %v15745_v18 = vld [vmem:[#allocation8_spill] sm:$0xff] }
 0x3a2   : > { %v6049_v34 = vshrl.u32 %v14339_v58, 16  ;;  %v5094_v47 = vmul.f32 %v12134_v49, %v14134_v45  ;;  %v5095_v44 = vmul.f32 %v12138_v8, %v14146_v35  ;;  %v10291_v57 = vcombine.low %v6616_v6, %v6628_v50  ;;  %v15744_v35 = vld [vmem:[#allocation7_spill] sm:$0xff] }
 0x3a3   : > { %v6652_v62 = vrot.slane %v6644_v60, %v15703_v25  ;;  %v6640_v33 = vrot.slane %v6632_v0, %v15703_v25  ;;  %v5134_v63 = vpack.c.bf16 %v5097_v51, %v5096_v61  ;;  %v6914_v14 = vor.u32 %v6912_v19, %v6911_v43 }
 0x3a4   : > { %v14364_v30 = vsel %vm958_vm2, %v15742_v38, %v13918_v15  ;;  %v5133_v32 = vpack.c.bf16 %v5095_v44, %v5094_v47  ;;  %v5808_v12 = vmul.bf16 %v15743_v36, %v5151_v48  ;;  %v6922_v37 = vor.u32 %v6920_v39, %v14348_v7 }
 0x3a5   : > { %v6927_v45 = vrot.slane %v6925_v53, 7  ;;  %v5810_v49 = vmul.bf16 %v15744_v35, %v14364_v30  ;;  %v14373_v50 = vsel %vm958_vm2, %v14028_v55, %v13966_v41  ;;  %5150 = vst.msk [vmem:[#allocation3 + $0x88] sm:$0xff] %vm5098_vm4, %v5134_v63  ;;  %v14376_v19 = vld [vmem:[#allocation3 + $0x70] sm:$0xff]  ;;  %v6935_v15 = vrot.slane %v6933_v21, 7  ;;  %v14383_v53 = vld [vmem:[#allocation3 + $0x78] sm:$0xff] }
 0x3a6   : > { %v6949_v38 = vshrl.u32 %v10290_v20, 16  ;;  %v14378_v6 = vrot.slane %v6049_v34, 7  ;;  %v5811_v39 = vmul.bf16 %v15745_v18, %v14373_v50  ;;  %5149 = vst.msk [vmem:[#allocation3 + $0x80] sm:$0xff] %vm5098_vm4, %v5133_v32  ;;  %11170 = vmatmul.mubr.msk.bf16.gmra.mrb[24].mxu1 %vm5098_vm4, %v14376_v19  ;;  %v6928_v41 = vshll.u32 %v14318_v10, 16 }
 0x3a7   : > { %v6943_v55 = vrot.slane %v6941_v52, 7  ;;  %v6957_v63 = vshrl.u32 %v10291_v57, 16  ;;  %v10292_v60 = vcombine.low %v6640_v33, %v6652_v62  ;;  %11173 = vmatprep.mubr.msk.bf16.mxu1 %vm5098_vm4, %v14383_v53  ;;  %v14392_v0 = vsel %vm1335_vm3, %v14282_v2, %v6914_v14  ;;  %v6668_v52 = vpop.permute.xlu1 %6667  ;;  %v6656_v62 = vpop.permute.xlu0 %6655 }
 0x3a8   : > { %15746 = vst [vmem:[#allocation12_spill] sm:$0xff] %v14392_v0  ;;  %v6936_v8 = vshll.u32 %v14326_v22, 16  ;;  %v6052_v21 = vshll.u32 %v14339_v58, 16  ;;  %v6045_v61 = vshrl.u32 %v5808_v12, 16  ;;  %v14397_v51 = vsel %vm1335_vm3, %v6911_v43, %v6922_v37 }
 0x3a9   : > { %15747 = vst [vmem:[#allocation7_spill] sm:$0xff] %v14397_v51  ;;  %v6930_v48 = vor.u32 %v6928_v41, %v6927_v45  ;;  %v6944_v10 = vshll.u32 %v14328_v27, 16  ;;  %v6057_v33 = vshrl.u32 %v5810_v49, 16  ;;  %v6951_v47 = vrot.slane %v6949_v38, 7 }
 0x3aa   : > { %v6938_v34 = vor.u32 %v6936_v8, %v6935_v15  ;;  %v6054_v44 = vor.u32 %v6052_v21, %v14378_v6  ;;  %v6065_v2 = vshrl.u32 %v5811_v39, 16  ;;  %v6952_v32 = vshll.u32 %v10290_v20, 16  ;;  %v15749_v20 = vld [vmem:[#allocation14_spill] sm:$0xff] }
 0x3ab   : > { %v6946_v14 = vor.u32 %v6944_v10, %v6943_v55  ;;  %v14401_v22 = vrot.slane %v6957_v63, 7  ;;  %v6965_v58 = vshrl.u32 %v10292_v60, 16  ;;  %v6676_v12 = vrot.slane %v6668_v52, %v15703_v25  ;;  %v15750_v52 = vld [vmem:[#allocation13_spill] sm:$0xff] }
 0x3ac   : > { %v6664_v43 = vrot.slane %v6656_v62, %v15703_v25  ;;  %v14408_v27 = vsel %vm958_vm2, %v14037_v31, %v13998_v24  ;;  %v6047_v37 = vrot.slane %v6045_v61, 7  ;;  %v6960_v35 = vshll.u32 %v10291_v57, 16 }
 0x3ad   : > { %15748 = vst [vmem:[#allocation8_spill] sm:$0xff] %v14401_v22  ;;  %v6059_v38 = vrot.slane %v6057_v33, 7  ;;  %v5812_v41 = vmul.bf16 %v14005_v13, %v14408_v27  ;;  %v14415_v63 = vsel %vm958_vm2, %v15749_v20, %v14002_v56  ;;  %v14417_v8 = vld [vmem:[#allocation3 + $0x80] sm:$0xff]  ;;  %v6954_v21 = vor.u32 %v6952_v32, %v6951_v47  ;;  %v15754_v20 = vld [vmem:[#allocation15_spill] sm:$0xff] }
 0x3ae   : > { %v14419_v10 = vrot.slane %v6065_v2, 7  ;;  %v5813_v24 = vmul.bf16 %v15750_v52, %v14415_v63  ;;  %11174 = vmatmul.mubr.msk.bf16.gmra.mrb[28].mxu1 %vm5098_vm4, %v14417_v8  ;;  %v6055_v31 = vsel %vm1335_vm3, %v6047_v37, %v6054_v44  ;;  %v14428_v57 = vsel %vm1335_vm3, %v14348_v7, %v6930_v48  ;;  %v14447_v7 = vld [vmem:[%s15585_s3 + $0x4] ss:$0 sps:$4 sm:$0xcc]  }
 0x3af   : > { %15751 = vst [vmem:[#allocation14_spill] sm:$0xff] %v14428_v57  ;;  %v6962_v56 = vor.u32 %v6960_v35, %v14401_v22  ;;  %v14431_v61 = vrot.slane %v6965_v58, 7  ;;  %v6060_v62 = vshll.u32 %v5810_v49, 16  ;;  %11179 = vmatprep.mubr.msk.bf16.mxu1 %vm5098_vm4, %v6055_v31  ;;  %v14435_v33 = vsel %vm1335_vm3, %v6927_v45, %v6938_v34  ;;  %15755 = vst [vmem:[#allocation15_spill] sm:$0xff] %v14447_v7  ;;  %v15756_v37 = vld [vmem:[#allocation16_spill] sm:$0xff]  ;;  %v15764_v31 = vld [vmem:[#allocation5_spill] sm:$0xff] }
 0x3b0   : > { %15753 = vst [vmem:[#allocation27_spill] sm:$0xff] %v14435_v33  ;;  %v14437_v2 = vcombine.low %v6664_v43, %v6676_v12  ;;  %v6068_v32 = vshll.u32 %v5811_v39, 16  ;;  %v14442_v44 = vsel %vm958_vm2, %v15754_v20, %v14097_v1  ;;  %v6968_v48 = vshll.u32 %v10292_v60, 16 }
 0x3b1   : > { %15752 = vst [vmem:[#allocation13_spill] sm:$0xff] %v14431_v61  ;;  %v6062_v49 = vor.u32 %v6060_v62, %v6059_v38  ;;  %v6073_v58 = vshrl.u32 %v5812_v41, 16  ;;  %v5814_v45 = vmul.bf16 %v15756_v37, %v14442_v44  ;;  %v14452_v34 = vsel %vm1335_vm3, %v6935_v15, %v6946_v14  ;;  %v15763_v14 = vld [vmem:[#allocation18_spill] sm:$0xff]  ;;  %v14479_v62 = vpop.permute.xlu1 %6691 }
 0x3b2   : > { %15757 = vst [vmem:[#allocation16_spill] sm:$0xff] %v14452_v34  ;;  %v14455_v39 = vsel %vm1335_vm3, %v6943_v55, %v6954_v21  ;;  %v6081_v12 = vshrl.u32 %v5813_v24, 16  ;;  %v6070_v1 = vor.u32 %v6068_v32, %v14419_v10  ;;  %v14459_v43 = vsel %vm1335_vm3, %v6951_v47, %v6962_v56  ;;  %v14481_v32 = vpop.permute.xlu0 %6679 }
 0x3b3   : > { %15758 = vst [vmem:[#allocation28_spill] sm:$0xff] %v14455_v39  ;;  %15759 = vst [vmem:[#allocation29_spill] sm:$0xff] %v14459_v43  ;;  %v14462_v35 = vor.u32 %v6968_v48, %v14431_v61  ;;  %v14466_v60 = vmul.bf16 %v15745_v18, %v14364_v30  ;;  %v14471_v15 = vsel %vm958_vm2, %v14218_v46, %v14103_v9  ;;  %v6973_v55 = vshrl.u32 %v14437_v2, 16 }
 0x3b4   : > { %15762 = vst [vmem:[#allocation32_spill] sm:$0xff] %v14471_v15  ;;  %v5815_v21 = vmul.bf16 %v15763_v14, %v14471_v15  ;;  %v7244_v47 = vsel %vm5879_vm5, %v15764_v31, 0  ;;  %v6075_v18 = vrot.slane %v6073_v58, 7  ;;  %v6089_v20 = vshrl.u32 %v5814_v45, 16 }
 0x3b5   : > { %15760 = vst [vmem:[#allocation30_spill] sm:$0xff] %v14462_v35  ;;  %15761 = vst [vmem:[#allocation31_spill] sm:$0xff] %v14466_v60  ;;  %v14486_v9 = vsel %vm958_vm2, %v14223_v29, %v14138_v17  ;;  %v6063_v46 = vsel %vm1335_vm3, %v14378_v6, %v6062_v49  ;;  %v6083_v48 = vrot.slane %v6081_v12, 7  ;;  %v14497_v56 = vsel %vm958_vm2, %v14228_v23, %v14152_v11  ;;  %v15767_v6 = vld [vmem:[#allocation19_spill] sm:$0xff] }
 0x3b6   : > { %15765 = vst [vmem:[#allocation18_spill] sm:$0xff] %v14486_v9  ;;  %v14492_v31 = vmul.bf16 %v14136_v28, %v14486_v9  ;;  %15766 = vst [vmem:[#allocation5_spill] sm:$0xff] %v14497_v56  ;;  %11180 = vmatmul.mubr.msk.bf16.vlgmr.msra.gmra.mrb[0].mxu1 %vm5098_vm4, %v6063_v46  ;;  %v6071_v58 = vsel %vm1335_vm3, %v6059_v38, %v6070_v1  ;;  %v7472_v29 = vshrl.u32 %v14466_v60, 16  ;;  %v6076_v36 = vshll.u32 %v5812_v41, 16 }
 0x3b7   : > { %v14505_v49 = vmul.bf16 %v15767_v6, %v14497_v56  ;;  %11212 = vmatpush3.bf16.msra.mxu1 %v7244_v47  ;;  %11183 = vmatprep.mubr.msk.bf16.mxu1 %vm5098_vm4, %v6071_v58  ;;  %v6084_v12 = vshll.u32 %v5813_v24, 16  ;;  %v6097_v38 = vshrl.u32 %v5815_v21, 16  ;;  %v15768_v1 = vrot.slane %v14447_v7, 2 }
 0x3b8   : > { %v14515_v41 = vrot.slane %v6973_v55, 7  ;;  %v6091_v46 = vrot.slane %v6089_v20, 7  ;;  %v14520_v47 = vsel %vm958_vm2, %v14233_v3, %v14186_v59  ;;  %v6078_v58 = vor.u32 %v6076_v36, %v6075_v18 }
 0x3b9   : > { %11973 = vmatprep.subr.msk.bf16.mxu1 %vm5879_vm5, %v15768_v1  ;;  %15769 = vst [vmem:[#allocation33_spill] sm:$0xff] %v14520_v47  ;;  %v7444_v17 = vmul.bf16 %v14005_v13, %v14373_v50  ;;  %v6105_v23 = vshrl.u32 %v14492_v31, 16  ;;  %v14528_v24 = vsel %vm958_vm2, %v14236_v4, %v14238_v54  ;;  %v6086_v1 = vor.u32 %v6084_v12, %v6083_v48 }
 0x3ba   : > { %v14530_v55 = vrot.slane %v7472_v29, 7  ;;  %v7445_v20 = vmul.bf16 %v15750_v52, %v14408_v27  ;;  %v6092_v11 = vshll.u32 %v5814_v45, 16  ;;  %v6113_v59 = vshrl.u32 %v14505_v49, 16 }
 0x3bb   : > { %v7446_v3 = vmul.bf16 %v15756_v37, %v14415_v63  ;;  %v7447_v36 = vmul.bf16 %v15763_v14, %v14442_v44  ;;  %v14539_v60 = vrot.slane %v6097_v38, 7  ;;  %v7448_v4 = vmul.bf16 %v14136_v28, %v14471_v15  ;;  %v14572_v15 = vpop.permute.xlu1 %6715 }
 0x3bc   : > { %v6100_v54 = vshll.u32 %v5815_v21, 16  ;;  %v7449_v29 = vmul.bf16 %v15767_v6, %v14486_v9  ;;  %v6079_v52 = vsel %vm1335_vm3, %v14419_v10, %v6078_v58  ;;  %v6094_v45 = vor.u32 %v6092_v11, %v6091_v46 }
 0x3bd   : > { %v14547_v12 = vrot.slane %v6105_v23, 7  ;;  %v14551_v61 = vmul.bf16 %v14192_v42, %v14497_v56  ;;  %v6087_v38 = vsel %vm1335_vm3, %v6075_v18, %v6086_v1  ;;  %v7480_v22 = vshrl.u32 %v7444_v17, 16 }
 0x3be   : > { %11184 = vmatmul.mubr.msk.bf16.gmra.mrb[4].mxu1 %vm5098_vm4, %v6079_v52  ;;  %v14555_v35 = vrot.slane %v6113_v59, 7  ;;  %v14559_v21 = vmul.bf16 %v14192_v42, %v14520_v47  ;;  %v14563_v10 = vmul.bf16 %v14199_v5, %v14520_v47  ;;  %v7488_v11 = vshrl.u32 %v7445_v20, 16 }
 0x3bf   : > { %11187 = vmatprep.mubr.msk.bf16.mxu1 %vm5098_vm4, %v6087_v38  ;;  %v6102_v23 = vor.u32 %v6100_v54, %v14539_v60  ;;  %v7482_v58 = vrot.slane %v7480_v22, 7  ;;  %v7483_v52 = vshll.u32 %v7444_v17, 16  ;;  %v7496_v43 = vshrl.u32 %v7446_v3, 16 }
 0x3c0   : > { %v6095_v18 = vsel %vm1335_vm3, %v6083_v48, %v6094_v45  ;;  %v7490_v1 = vrot.slane %v7488_v11, 7  ;;  %v7491_v59 = vshll.u32 %v7445_v20, 16  ;;  %v7504_v39 = vshrl.u32 %v7447_v36, 16 }
 0x3c1   : > { %v7485_v34 = vor.u32 %v7483_v52, %v7482_v58  ;;  %v7498_v7 = vrot.slane %v7496_v43, 7  ;;  %v7499_v56 = vshll.u32 %v7446_v3, 16  ;;  %v7512_v33 = vshrl.u32 %v7448_v4, 16  ;;  %v15774_v52 = vld [vmem:[#allocation17_spill] sm:$0xff] }
 0x3c2   : > { %v7493_v42 = vor.u32 %v7491_v59, %v7490_v1  ;;  %v7506_v47 = vrot.slane %v7504_v39, 7  ;;  %v7507_v9 = vshll.u32 %v7447_v36, 16  ;;  %v7520_v6 = vshrl.u32 %v7449_v29, 16  ;;  %v15776_v59 = vld [vmem:[#allocation20_spill] sm:$0xff] }
 0x3c3   : > { %v14570_v38 = vsel %vm1335_vm3, %v14530_v55, %v7485_v34  ;;  %v7501_v22 = vor.u32 %v7499_v56, %v7498_v7  ;;  %v7514_v17 = vrot.slane %v7512_v33, 7  ;;  %v7515_v54 = vshll.u32 %v7448_v4, 16 }
 0x3c4   : > { %v14575_v48 = vsel %vm1335_vm3, %v7482_v58, %v7493_v42  ;;  %v7509_v20 = vor.u32 %v7507_v9, %v7506_v47  ;;  %v7522_v43 = vrot.slane %v7520_v6, 7  ;;  %v7523_v3 = vshll.u32 %v7449_v29, 16 }
 0x3c5   : > { %v5819_v39 = vmul.bf16 %v14199_v5, %v14528_v24  ;;  %v6103_v36 = vsel %vm1335_vm3, %v6091_v46, %v6102_v23  ;;  %v14582_v34 = vsel %vm1335_vm3, %v7490_v1, %v7501_v22  ;;  %v7517_v33 = vor.u32 %v7515_v54, %v7514_v17 }
 0x3c6   : > { %11188 = vmatmul.mubr.msk.bf16.gmra.mrb[8].mxu1 %vm5098_vm4, %v6095_v18  ;;  %v15770_v56 = vrot.slane %v14479_v62, %v15703_v25  ;;  %v15771_v42 = vrot.slane %v14481_v32, %v15703_v25  ;;  %v6108_v6 = vshll.u32 %v14492_v31, 16  ;;  %v14595_v4 = vsel %vm1335_vm3, %v7498_v7, %v7509_v20  ;;  %v15775_v18 = vld [vmem:[#allocation6_spill] sm:$0xff] }
 0x3c7   : > { %11191 = vmatprep.mubr.msk.bf16.mxu1 %vm5098_vm4, %v6103_v36  ;;  %v7525_v46 = vor.u32 %v7523_v3, %v7522_v43  ;;  %v15772_v29 = vshll.u32 %v14437_v2, 16  ;;  %v6116_v32 = vshll.u32 %v14505_v49, 16  ;;  %v14606_v11 = vsel %vm1335_vm3, %v7506_v47, %v7517_v33  ;;  %v6704_v3 = vpop.permute.xlu0 %6703  ;;  %v15777_v36 = vld [vmem:[#allocation21_spill] sm:$0xff] }
 0x3c8   : > { %v14590_v9 = vcombine.low %v15771_v42, %v15770_v56  ;;  %v6121_v31 = vshrl.u32 %v14559_v21, 16  ;;  %v6110_v23 = vor.u32 %v6108_v6, %v14547_v12  ;;  %v7536_v58 = vshrl.u32 %v14563_v10, 16  ;;  %v15778_v56 = vld [vmem:[#allocation22_spill] sm:$0xff] }
 0x3c9   : > { %v14600_v45 = vor.u32 %v15772_v29, %v14515_v41  ;;  %v14611_v7 = vsel %vm1335_vm3, %v7514_v17, %v7525_v46  ;;  %v6129_v2 = vshrl.u32 %v5819_v39, 16  ;;  %v14617_v1 = vsel %vm958_vm2, %v15775_v18, %v15774_v52 }
 0x3ca   : > { %15773 = vst [vmem:[#allocation34_spill] sm:$0xff] %v14611_v7  ;;  %v6118_v49 = vor.u32 %v6116_v32, %v14555_v35  ;;  %v7528_v47 = vshrl.u32 %v14551_v61, 16  ;;  %v14624_v22 = vsel %vm958_vm2, %v15776_v59, %v14269_v26  ;;  %v7066_v17 = vshll.u32 %v14343_v40, 16 }
 0x3cb   : > { %v7538_v54 = vrot.slane %v7536_v58, 7  ;;  %v7539_v20 = vshll.u32 %v14563_v10, 16  ;;  %v5820_v33 = vmul.bf16 %v15777_v36, %v14617_v1  ;;  %v5821_v42 = vmul.bf16 %v15778_v56, %v14624_v22 }
 0x3cc   : > { %v7530_v6 = vrot.slane %v7528_v47, 7  ;;  %v7531_v46 = vshll.u32 %v14551_v61, 16  ;;  %v6123_v29 = vrot.slane %v6121_v31, 7  ;;  %v7453_v26 = vmul.bf16 %v15778_v56, %v14617_v1 }
 0x3cd   : > { %v6111_v32 = vsel %vm1335_vm3, %v14539_v60, %v6110_v23  ;;  %v7541_v58 = vor.u32 %v7539_v20, %v7538_v54  ;;  %v14637_v52 = vrot.slane %v6129_v2, 7  ;;  %v7452_v10 = vmul.bf16 %v15777_v36, %v14528_v24 }
 0x3ce   : > { %11192 = vmatmul.mubr.msk.bf16.gmra.mrb[12].mxu1 %vm5098_vm4, %v6111_v32  ;;  %v6119_v18 = vsel %vm1335_vm3, %v14547_v12, %v6118_v49  ;;  %v7533_v47 = vor.u32 %v7531_v46, %v7530_v6  ;;  %v6712_v61 = vrot.slane %v6704_v3, %v15703_v25  ;;  %v14647_v31 = vmul.bf16 %v14005_v13, %v14364_v30  ;;  %v15782_v12 = vld [vmem:[#allocation10_spill] sm:$0xff]  ;;  %v15783_v13 = vld [vmem:[#allocation23_spill] sm:$0xff]  ;;  %v15784_v30 = vld [vmem:[#allocation25_spill] sm:$0xff] }
 0x3cf   : > { %v6124_v60 = vshll.u32 %v14559_v21, 16  ;;  %11195 = vmatprep.mubr.msk.bf16.mxu1 %vm5098_vm4, %v6119_v18  ;;  %v14652_v23 = vsel %vm1335_vm3, %v7530_v6, %v7541_v58  ;;  %v6132_v2 = vshll.u32 %v5819_v39, 16  ;;  %v6137_v59 = vshrl.u32 %v5820_v33, 16 }
 0x3d0   : > { %15779 = vst [vmem:[#allocation17_spill] sm:$0xff] %v14647_v31  ;;  %15780 = vst [vmem:[#allocation6_spill] sm:$0xff] %v14652_v23  ;;  %v6145_v20 = vshrl.u32 %v5821_v42, 16  ;;  %v14655_v32 = vsel %vm1335_vm3, %v7522_v43, %v7533_v47  ;;  %v14660_v49 = vsel %vm958_vm2, %v15782_v12, %v14276_v16  ;;  %v14665_v21 = vsel %vm958_vm2, %v15784_v30, %v15783_v13 }
 0x3d1   : > { %15781 = vst [vmem:[#allocation20_spill] sm:$0xff] %v14655_v32  ;;  %v6126_v3 = vor.u32 %v6124_v60, %v6123_v29  ;;  %v7552_v46 = vshrl.u32 %v7453_v26, 16  ;;  %v6134_v6 = vor.u32 %v6132_v2, %v14637_v52  ;;  %v7064_v39 = vshrl.u32 %v14343_v40, 16 }
 0x3d2   : > { %v7068_v58 = vrot.slane %v7066_v17, 1  ;;  %v7544_v18 = vshrl.u32 %v7452_v10, 16  ;;  %v8532_v43 = vshrl.u32 %v14647_v31, 16  ;;  %v6140_v47 = vshll.u32 %v5820_v33, 16 }
 0x3d3   : > { %v7554_v62 = vrot.slane %v7552_v46, 7  ;;  %v7555_v23 = vshll.u32 %v7453_v26, 16  ;;  %v6139_v16 = vrot.slane %v6137_v59, 7  ;;  %v14670_v12 = vrot.slane %v6145_v20, 7 }
 0x3d4   : > { %v7546_v32 = vrot.slane %v7544_v18, 7  ;;  %v7547_v7 = vshll.u32 %v7452_v10, 16  ;;  %v5822_v60 = vmul.bf16 %v14376_v19, %v14660_v49  ;;  %v7455_v2 = vmul.bf16 %v14383_v53, %v14660_v49 }
 0x3d5   : > { %v6127_v40 = vsel %vm1335_vm3, %v14555_v35, %v6126_v3  ;;  %v7557_v17 = vor.u32 %v7555_v23, %v7554_v62  ;;  %v7454_v33 = vmul.bf16 %v14376_v19, %v14624_v22  ;;  %v5823_v26 = vmul.bf16 %v14383_v53, %v14665_v21  ;;  %v14694_v3 = vld [vmem:[#allocation3 + $0x18] sm:$0xff] }
 0x3d6   : > { %11196 = vmatmul.mubr.msk.bf16.gmra.mrb[16].mxu1 %vm5098_vm4, %v6127_v40  ;;  %v6135_v10 = vsel %vm1335_vm3, %v6123_v29, %v6134_v6  ;;  %v7549_v59 = vor.u32 %v7547_v7, %v7546_v32  ;;  %v15785_v13 = vrot.slane %v14572_v15, %v15703_v25  ;;  %v6148_v35 = vshll.u32 %v5821_v42, 16  ;;  %15787 = vst [vmem:[#allocation22_spill] sm:$0xff] %v14694_v3 }
 0x3d7   : > { %11199 = vmatprep.mubr.msk.bf16.mxu1 %vm5098_vm4, %v6135_v10  ;;  %v14692_v23 = vsel %vm1335_vm3, %v7546_v32, %v7557_v17  ;;  %v14698_v46 = vmul.bf16 %v14694_v3, %v14397_v51  ;;  %v6142_v7 = vor.u32 %v6140_v47, %v6139_v16  ;;  %v14700_v29 = vor.u32 %v7068_v58, %v7064_v39  ;;  %v14712_v17 = vld [vmem:[#allocation3 + $0x28] sm:$0xff]  ;;  %v15790_v10 = vld [vmem:[#allocation26_spill] sm:$0xff] }
 0x3d8   : > { %v14688_v30 = vcombine.low %v6712_v61, %v15785_v13  ;;  %15786 = vst [vmem:[#allocation21_spill] sm:$0xff] %v14692_v23  ;;  %v14703_v6 = vsel %vm1335_vm3, %v7538_v54, %v7549_v59  ;;  %v6153_v15 = vshrl.u32 %v5822_v60, 16  ;;  %v6150_v42 = vor.u32 %v6148_v35, %v14670_v12  ;;  %v14706_v61 = vld [vmem:[#allocation3 + $0x10] sm:$0xff]  ;;  %15789 = vst [vmem:[#allocation23_spill] sm:$0xff] %v14712_v17 }
 0x3d9   : > { %v7046_v32 = vmul.bf16 %v14706_v61, %v14392_v0  ;;  %v7568_v18 = vshrl.u32 %v7455_v2, 16  ;;  %v14710_v40 = vrot.slane %v8532_v43, 7  ;;  %v14716_v39 = vmul.bf16 %v14712_v17, %v14373_v50 }
 0x3da   : > { %v6161_v58 = vshrl.u32 %v5823_v26, 16  ;;  %v7560_v54 = vshrl.u32 %v7454_v33, 16  ;;  %v14720_v47 = vmul.bf16 %v15756_v37, %v14408_v27  ;;  %v5824_v59 = vmul.bf16 %v14417_v8, %v15790_v10 }
 0x3db   : > { %15788 = vst [vmem:[#allocation10_spill] sm:$0xff] %v14710_v40  ;;  %v7570_v13 = vrot.slane %v7568_v18, 7  ;;  %v7571_v35 = vshll.u32 %v7455_v2, 16  ;;  %v14726_v43 = vmul.bf16 %v15763_v14, %v14415_v63  ;;  %v6143_v20 = vsel %vm1335_vm3, %v14637_v52, %v6142_v7  ;;  %v14734_v2 = vld [vmem:[#allocation3 + $0x20] sm:$0xff] }
 0x3dc   : > { %v7562_v50 = vrot.slane %v7560_v54, 7  ;;  %v7563_v31 = vshll.u32 %v7454_v33, 16  ;;  %v6155_v51 = vrot.slane %v6153_v15, 7  ;;  %v6151_v0 = vsel %vm1335_vm3, %v6139_v16, %v6150_v42  ;;  %15791 = vst [vmem:[#allocation25_spill] sm:$0xff] %v14734_v2  ;;  %v15793_v15 = vld [vmem:[#allocation32_spill] sm:$0xff]  ;;  %v15794_v42 = vld [vmem:[#allocation19_spill] sm:$0xff] }
 0x3dd   : > { %v7071_v3 = vshll.u32 %v7046_v32, 16  ;;  %v7573_v27 = vor.u32 %v7571_v35, %v7570_v13  ;;  %v6163_v37 = vrot.slane %v6161_v58, 7  ;;  %v7456_v23 = vmul.bf16 %v14417_v8, %v14665_v21  ;;  %v15795_v54 = vld [vmem:[#allocation18_spill] sm:$0xff] }
 0x3de   : > { %11200 = vmatmul.mubr.msk.bf16.gmra.mrb[20].mxu1 %vm5098_vm4, %v6143_v20  ;;  %v7048_v63 = vmul.bf16 %v14734_v2, %v14428_v57  ;;  %v7565_v14 = vor.u32 %v7563_v31, %v7562_v50  ;;  %v14740_v52 = vmul.bf16 %v14136_v28, %v14442_v44  ;;  %v6156_v33 = vshll.u32 %v5822_v60, 16  ;;  %v15796_v28 = vld [vmem:[#allocation4_spill] sm:$0xff]  ;;  %v15799_v2 = vld [vmem:[#allocation33_spill] sm:$0xff] }
 0x3df   : > { %v6169_v16 = vshrl.u32 %v5824_v59, 16  ;;  %11203 = vmatprep.mubr.msk.bf16.mxu1 %vm5098_vm4, %v6151_v0  ;;  %v14744_v7 = vsel %vm1335_vm3, %v7562_v50, %v7573_v27  ;;  %v14748_v20 = vmul.bf16 %v15794_v42, %v15793_v15  ;;  %v6164_v18 = vshll.u32 %v5823_v26, 16  ;;  %v15797_v0 = vld [vmem:[#allocation27_spill] sm:$0xff]  ;;  %v15798_v27 = vld [vmem:[#allocation5_spill] sm:$0xff] }
 0x3e0   : > { %15792 = vst [vmem:[#allocation26_spill] sm:$0xff] %v14744_v7  ;;  %v7079_v58 = vshll.u32 %v14698_v46, 16  ;;  %v14752_v31 = vsel %vm1335_vm3, %v7554_v62, %v7565_v14  ;;  %v14756_v44 = vmul.bf16 %v15796_v28, %v15795_v54  ;;  %v6158_v60 = vor.u32 %v6156_v33, %v6155_v51  ;;  %v15800_v28 = vld [vmem:[#allocation15_spill] sm:$0xff] }
 0x3e1   : > { %v7073_v35 = vrot.slane %v7071_v3, 1  ;;  %v14760_v50 = vmul.bf16 %v14712_v17, %v15797_v0  ;;  %v14764_v15 = vmul.bf16 %v14199_v5, %v15798_v27  ;;  %v6166_v26 = vor.u32 %v6164_v18, %v6163_v37 }
 0x3e2   : > { %v7087_v42 = vshll.u32 %v7048_v63, 16  ;;  %v7576_v57 = vshrl.u32 %v7456_v23, 16  ;;  %v14768_v62 = vmul.bf16 %v15777_v36, %v15799_v2  ;;  %v14772_v14 = vmul.bf16 %v15778_v56, %v14528_v24 }
 0x3e3   : > { %v6171_v3 = vrot.slane %v6169_v16, 7  ;;  %v7075_v33 = vshrl.u32 %v7046_v32, 16  ;;  %v7081_v54 = vrot.slane %v7079_v58, 1  ;;  %v15801_v0 = vrot.slane %v15800_v28, 2 }
 0x3e4   : > { %v14779_v5 = vrot.slane %v7576_v57, 7  ;;  %v7579_v18 = vshll.u32 %v7456_v23, 16  ;;  %v6172_v27 = vshll.u32 %v5824_v59, 16  ;;  %v6159_v36 = vsel %vm1335_vm3, %v14670_v12, %v6158_v60  ;;  %v14791_v59 = vld [vmem:[#allocation3 + $0x30] sm:$0xff]  ;;  %v15802_v12 = vld [vmem:[#allocation16_spill] sm:$0xff]  ;;  %v14797_v60 = vld [vmem:[#allocation3 + $0x38] sm:$0xff] }
 0x3e5   : > { %v14777_v17 = vsel %vm5879_vm5, %v15801_v0, 0  ;;  %v7077_v2 = vor.u32 %v7075_v33, %v7073_v35  ;;  %v7095_v7 = vshll.u32 %v14760_v50, 16  ;;  %v6167_v24 = vsel %vm1335_vm3, %v6155_v51, %v6166_v26  ;;  %v15803_v51 = vld [vmem:[#allocation28_spill] sm:$0xff] }
 0x3e6   : > { %11204 = vmatmul.mubr.msk.bf16.gmra.mrb[24].mxu1 %vm5098_vm4, %v6159_v36  ;;  %v7083_v56 = vshrl.u32 %v14698_v46, 16  ;;  %v7089_v32 = vrot.slane %v7087_v42, 1  ;;  %v7581_v16 = vor.u32 %v7579_v18, %v14779_v5  ;;  %v6174_v57 = vor.u32 %v6172_v27, %v6171_v3 }
 0x3e7   : > { %11207 = vmatprep.mubr.msk.bf16.mxu1 %vm5098_vm4, %v6167_v24  ;;  %v7074_v23 = vsel %vm958_vm2, %v14700_v29, %v7073_v35  ;;  %v14795_v58 = vmul.bf16 %v14791_v59, %v15802_v12  ;;  %v14801_v46 = vmul.bf16 %v14797_v60, %v15803_v51  ;;  %v14805_v0 = vmul.bf16 %v14383_v53, %v14624_v22  ;;  %v14831_v22 = vld [vmem:[#allocation3 + $0x88] sm:$0xff] }
 0x3e8   : > { %v7085_v26 = vor.u32 %v7083_v56, %v7081_v54  ;;  %v7091_v42 = vshrl.u32 %v7048_v63, 16  ;;  %v14808_v29 = vsel %vm1335_vm3, %v7570_v13, %v7581_v16  ;;  %v14812_v35 = vmul.bf16 %v14376_v19, %v14617_v1 }
 0x3e9   : > { %v7082_v3 = vsel %vm958_vm2, %v7077_v2, %v7081_v54  ;;  %v14815_v33 = vrot.slane %v7095_v7, 1  ;;  %v8540_v28 = vshrl.u32 %v14716_v39, 16  ;;  %v8548_v63 = vshrl.u32 %v14720_v47, 16 }
 0x3ea   : > { %v7090_v18 = vsel %vm958_vm2, %v7085_v26, %v7089_v32  ;;  %v14819_v27 = vor.u32 %v7091_v42, %v7089_v32  ;;  %v6175_v13 = vsel %vm1335_vm3, %v6163_v37, %v6174_v57  ;;  %v8543_v1 = vshll.u32 %v14716_v39, 16 }
 0x3eb   : > { %v8542_v36 = vrot.slane %v8540_v28, 7  ;;  %v8556_v24 = vshrl.u32 %v14726_v43, 16  ;;  %v8550_v54 = vrot.slane %v8548_v63, 7  ;;  %v8551_v7 = vshll.u32 %v14720_v47, 16 }
 0x3ec   : > { %v8559_v2 = vshll.u32 %v14726_v43, 16  ;;  %v8564_v56 = vshrl.u32 %v14740_v52, 16  ;;  %v8567_v26 = vshll.u32 %v14740_v52, 16  ;;  %v8572_v42 = vshrl.u32 %v14748_v20, 16 }
 0x3ed   : > { %v8545_v32 = vor.u32 %v8543_v1, %v8542_v36  ;;  %v8558_v16 = vrot.slane %v8556_v24, 7  ;;  %v8553_v39 = vor.u32 %v8551_v7, %v8550_v54  ;;  %v8575_v57 = vshll.u32 %v14748_v20, 16  ;;  %v14842_v1 = vpop.permute.xlu1 %6739  ;;  %v14844_v24 = vpop.permute.xlu0 %6727 }
 0x3ee   : > { %11208 = vmatmul.mubr.msk.bf16.gmra.mrb[28].mxu1 %vm5098_vm4, %v6175_v13  ;;  %v8566_v37 = vrot.slane %v8564_v56, 7  ;;  %v8580_v47 = vshrl.u32 %v14756_v44, 16  ;;  %v8574_v52 = vrot.slane %v8572_v42, 7  ;;  %v8583_v63 = vshll.u32 %v14756_v44, 16 }
 0x3ef   : > { %11213 = vmatprep.mubr.msk.bf16.mxu1 %vm5098_vm4, %v7074_v23  ;;  %v14839_v43 = vsel %vm1335_vm3, %v14710_v40, %v8545_v32  ;;  %v8561_v28 = vor.u32 %v8559_v2, %v8558_v16  ;;  %v14847_v13 = vsel %vm1335_vm3, %v8542_v36, %v8553_v39  ;;  %v8588_v56 = vshrl.u32 %v14764_v15, 16 }
 0x3f0   : > { %15804 = vst [vmem:[#allocation32_spill] sm:$0xff] %v14839_v43  ;;  %v8569_v20 = vor.u32 %v8567_v26, %v8566_v37  ;;  %v8582_v7 = vrot.slane %v8580_v47, 7  ;;  %v8516_v23 = vmul.bf16 %v14831_v22, %v14665_v21  ;;  %v8577_v2 = vor.u32 %v8575_v57, %v8574_v52 }
 0x3f1   : > { %v14853_v32 = vsel %vm1335_vm3, %v8550_v54, %v8561_v28  ;;  %v8591_v44 = vshll.u32 %v14764_v15, 16  ;;  %v8590_v40 = vrot.slane %v8588_v56, 7  ;;  %v8596_v36 = vshrl.u32 %v14768_v62, 16  ;;  %v6752_v56 = vpop.permute.xlu0 %6751 }
 0x3f2   : > { %15805 = vst [vmem:[#allocation19_spill] sm:$0xff] %v14853_v32  ;;  %v14857_v42 = vsel %vm1335_vm3, %v8558_v16, %v8569_v20  ;;  %v8585_v43 = vor.u32 %v8583_v63, %v8582_v7  ;;  %v8515_v26 = vmul.bf16 %v14417_v8, %v14660_v49  ;;  %v14863_v39 = vsel %vm1335_vm3, %v8566_v37, %v8577_v2  ;;  %v14875_v49 = vld [vmem:[%s15585_s3 + $0x8] sm:$0x3]  ;;  %v6764_v20 = vpop.permute.xlu1 %6763 }
 0x3f3   : > { %15806 = vst [vmem:[#allocation18_spill] sm:$0xff] %v14857_v42  ;;  %15807 = vst [vmem:[#allocation4_spill] sm:$0xff] %v14863_v39  ;;  %v8599_v21 = vshll.u32 %v14768_v62, 16  ;;  %v8604_v54 = vshrl.u32 %v14772_v14, 16  ;;  %v8593_v15 = vor.u32 %v8591_v44, %v8590_v40  ;;  %v8598_v16 = vrot.slane %v8596_v36, 7  ;;  %v14887_v39 = vld [vmem:[#allocation3 + $0x40] sm:$0xff] }
 0x3f4   : > { %v14868_v57 = vsel %vm1335_vm3, %v8574_v52, %v8585_v43  ;;  %v8612_v47 = vshrl.u32 %v14812_v35, 16  ;;  %v7103_v28 = vshll.u32 %v14795_v58, 16  ;;  %v8607_v63 = vshll.u32 %v14772_v14, 16  ;;  %v15810_v42 = vld [vmem:[#allocation29_spill] sm:$0xff] }
 0x3f5   : > { %15808 = vst [vmem:[#allocation5_spill] sm:$0xff] %v14868_v57  ;;  %v8606_v37 = vrot.slane %v8604_v54, 7  ;;  %v8620_v62 = vshrl.u32 %v14805_v0, 16  ;;  %v14881_v43 = vsel %vm1335_vm3, %v8582_v7, %v8593_v15  ;;  %v8601_v52 = vor.u32 %v8599_v21, %v8598_v16 }
 0x3f6   : > { %11214 = vmatmul.mubr.msk.bf16.vlgmr.msra.gmra.mrb[0].mxu1 %vm5098_vm4, %v7082_v3  ;;  %15809 = vst [vmem:[#allocation33_spill] sm:$0xff] %v14881_v43  ;;  %v8614_v2 = vrot.slane %v8612_v47, 7  ;;  %v8615_v44 = vshll.u32 %v14812_v35, 16  ;;  %v8623_v14 = vshll.u32 %v14805_v0, 16  ;;  %v8628_v57 = vshrl.u32 %v8515_v26, 16 }
 0x3f7   : > { %11246 = vmatpush3.bf16.msra.mxu1 %v14777_v17  ;;  %11217 = vmatprep.mubr.msk.bf16.mxu1 %vm5098_vm4, %v7090_v18  ;;  %v8609_v36 = vor.u32 %v8607_v63, %v8606_v37  ;;  %v8622_v54 = vrot.slane %v8620_v62, 7  ;;  %v14891_v3 = vmul.bf16 %v14887_v39, %v15810_v42  ;;  %v14896_v35 = vsel %vm1335_vm3, %v8590_v40, %v8601_v52 }
 0x3f8   : > { %11974 = vmatprep.subr.msk.bf16.mxu1 %vm5879_vm5, %v14875_v49  ;;  %v8617_v17 = vor.u32 %v8615_v44, %v8614_v2  ;;  %v8636_v7 = vshrl.u32 %v8516_v23, 16  ;;  %v8630_v0 = vrot.slane %v8628_v57, 7  ;;  %v8631_v15 = vshll.u32 %v8515_v26, 16  ;;  %v6788_v26 = vpop.permute.xlu1 %6787 }
 0x3f9   : > { %v14899_v18 = vsel %vm1335_vm3, %v8598_v16, %v8609_v36  ;;  %v8625_v21 = vor.u32 %v8623_v14, %v8622_v54  ;;  %v7105_v47 = vrot.slane %v7103_v28, 1  ;;  %v8639_v43 = vshll.u32 %v8516_v23, 16  ;;  %v6776_v28 = vpop.permute.xlu0 %6775 }
 0x3fa   : > { %v14902_v63 = vsel %vm1335_vm3, %v8606_v37, %v8617_v17  ;;  %v14904_v62 = vrot.slane %v8636_v7, 7  ;;  %v6748_v32 = vrot.slane %v14842_v1, %v15703_v25  ;;  %v6736_v40 = vrot.slane %v14844_v24, %v15703_v25 }
 0x3fb   : > { %15811 = vst [vmem:[#allocation15_spill] sm:$0xff] %v14902_v63  ;;  %v14911_v52 = vsel %vm1335_vm3, %v8614_v2, %v8625_v21  ;;  %v8633_v16 = vor.u32 %v8631_v15, %v8630_v0  ;;  %v6989_v57 = vshrl.u32 %v14688_v30, 16  ;;  %v15814_v37 = vshrl.u32 %v14760_v50, 16 }
 0x3fc   : > { %15812 = vst [vmem:[#allocation16_spill] sm:$0xff] %v14904_v62  ;;  %15813 = vst [vmem:[#allocation28_spill] sm:$0xff] %v14911_v52  ;;  %v7111_v23 = vshll.u32 %v14801_v46, 16  ;;  %v8641_v36 = vor.u32 %v8639_v43, %v14904_v62  ;;  %v6772_v1 = vrot.slane %v6764_v20, %v15703_v25  ;;  %v6760_v24 = vrot.slane %v6752_v56, %v15703_v25  ;;  %v15817_v43 = vld [vmem:[#allocation30_spill] sm:$0xff]  ;;  %v15818_v20 = vld [vmem:[#allocation8_spill] sm:$0xff] }
 0x3fd   : > { %v7101_v44 = vor.u32 %v15814_v37, %v14815_v33  ;;  %v7098_v2 = vsel %vm958_vm2, %v14819_v27, %v14815_v33  ;;  %v14925_v14 = vsel %vm1335_vm3, %v8622_v54, %v8633_v16  ;;  %v7119_v17 = vshll.u32 %v14891_v3, 16  ;;  %v14942_v37 = vld [vmem:[#allocation3 + $0x48] sm:$0xff] }
 0x3fe   : > { %15815 = vst [vmem:[#allocation29_spill] sm:$0xff] %v14925_v14  ;;  %11218 = vmatmul.mubr.msk.bf16.gmra.mrb[4].mxu1 %vm5098_vm4, %v7098_v2  ;;  %v14931_v7 = vsel %vm1335_vm3, %v8630_v0, %v8641_v36  ;;  %v14936_v56 = vsel %vm1335_vm3, %v15818_v20, %v15817_v43  ;;  %v15819_v21 = vshrl.u32 %v14590_v9, 16  ;;  %v10296_v27 = vcombine.low %v6736_v40, %v6748_v32  ;;  %v14954_v20 = vld [vmem:[#allocation3 + $0x50] sm:$0xff] }
 0x3ff   : > { %v7106_v50 = vsel %vm958_vm2, %v7101_v44, %v7105_v47  ;;  %15816 = vst [vmem:[#allocation35_spill] sm:$0xff] %v14931_v7  ;;  %v7107_v54 = vshrl.u32 %v14795_v58, 16  ;;  %v6991_v15 = vrot.slane %v6989_v57, 7  ;;  %v7113_v16 = vrot.slane %v7111_v23, 1  ;;  %v15820_v44 = vld [vmem:[#allocation13_spill] sm:$0xff]  ;;  %v6800_v58 = vpop.permute.xlu0 %6799 }
 0x400   : > { %v6983_v33 = vrot.slane %v15819_v21, 7  ;;  %11221 = vmatprep.mubr.msk.bf16.mxu1 %vm5098_vm4, %v7106_v50  ;;  %v7053_v0 = vmul.bf16 %v14942_v37, %v14936_v56  ;;  %v14949_v36 = vsel %vm1335_vm3, %v15820_v44, %v14600_v45  ;;  %v6984_v2 = vshll.u32 %v14590_v9, 16  ;;  %v6812_v50 = vpop.permute.xlu1 %6811 }
 0x401   : > { %v10297_v43 = vcombine.low %v6760_v24, %v6772_v1  ;;  %v7109_v32 = vor.u32 %v7107_v54, %v7105_v47  ;;  %v6992_v40 = vshll.u32 %v14688_v30, 16  ;;  %v7115_v57 = vshrl.u32 %v14801_v46, 16 }
 0x402   : > { %v7121_v23 = vrot.slane %v7119_v17, 1  ;;  %v7054_v21 = vmul.bf16 %v14954_v20, %v14949_v36  ;;  %v6986_v62 = vor.u32 %v6984_v2, %v6983_v33  ;;  %v6997_v7 = vshrl.u32 %v10296_v27, 16 }
 0x403   : > { %v6796_v45 = vrot.slane %v6788_v26, %v15703_v25  ;;  %v6784_v9 = vrot.slane %v6776_v28, %v15703_v25  ;;  %v6994_v1 = vor.u32 %v6992_v40, %v6991_v15  ;;  %v7117_v47 = vor.u32 %v7115_v57, %v7113_v16 }
 0x404   : > { %v7127_v24 = vshll.u32 %v7053_v0, 16  ;;  %v7005_v30 = vshrl.u32 %v10297_v43, 16  ;;  %v6820_v54 = vrot.slane %v6812_v50, %v15703_v25  ;;  %v6808_v46 = vrot.slane %v6800_v58, %v15703_v25  ;;  %v14971_v25 = vld [vmem:[#allocation3 + $0x58] sm:$0xff] }
 0x405   : > { %v7114_v17 = vsel %vm958_vm2, %v7109_v32, %v7113_v16  ;;  %v7122_v44 = vsel %vm958_vm2, %v7117_v47, %v7121_v23  ;;  %v7135_v2 = vshll.u32 %v7054_v21, 16  ;;  %v14967_v26 = vsel %vm1335_vm3, %v14515_v41, %v6986_v62 }
 0x406   : > { %11222 = vmatmul.mubr.msk.bf16.gmra.mrb[8].mxu1 %vm5098_vm4, %v7114_v17  ;;  %v6999_v28 = vrot.slane %v6997_v7, 7  ;;  %v10298_v40 = vcombine.low %v6784_v9, %v6796_v45  ;;  %v7123_v57 = vshrl.u32 %v14891_v3, 16  ;;  %v7000_v50 = vshll.u32 %v10296_v27, 16  ;;  %v14978_v45 = vld [vmem:[#allocation3 + $0x60] sm:$0xff] }
 0x407   : > { %11225 = vmatprep.mubr.msk.bf16.mxu1 %vm5098_vm4, %v7122_v44  ;;  %v7129_v14 = vrot.slane %v7127_v24, 1  ;;  %v7055_v16 = vmul.bf16 %v14971_v25, %v14967_v26  ;;  %v14976_v32 = vsel %vm1335_vm3, %v6983_v33, %v6994_v1  ;;  %v7007_v58 = vrot.slane %v7005_v30, 7 }
 0x408   : > { %v10299_v47 = vcombine.low %v6808_v46, %v6820_v54  ;;  %v7125_v41 = vor.u32 %v7123_v57, %v7121_v23  ;;  %v7131_v62 = vshrl.u32 %v7053_v0, 16  ;;  %v7137_v7 = vrot.slane %v7135_v2, 1  ;;  %v14989_v46 = vld [vmem:[#allocation3 + $0x68] sm:$0xff] }
 0x409   : > { %v7056_v3 = vmul.bf16 %v14978_v45, %v14976_v32  ;;  %v7002_v27 = vor.u32 %v7000_v50, %v6999_v28  ;;  %v7008_v9 = vshll.u32 %v10297_v43, 16  ;;  %v7013_v24 = vshrl.u32 %v10298_v40, 16 }
 0x40a   : > { %v7133_v17 = vor.u32 %v7131_v62, %v7129_v14  ;;  %v7143_v44 = vshll.u32 %v7055_v16, 16  ;;  %v7021_v63 = vshrl.u32 %v10299_v47, 16  ;;  %v7130_v33 = vsel %vm958_vm2, %v7125_v41, %v7129_v14 }
 0x40b   : > { %v7010_v52 = vor.u32 %v7008_v9, %v7007_v58  ;;  %v7151_v0 = vshll.u32 %v7056_v3, 16  ;;  %v14986_v1 = vsel %vm1335_vm3, %v6991_v15, %v7002_v27  ;;  %v7015_v30 = vrot.slane %v7013_v24, 7 }
 0x40c   : > { %v7138_v23 = vsel %vm958_vm2, %v7133_v17, %v7137_v7  ;;  %v7139_v54 = vshrl.u32 %v7054_v21, 16  ;;  %v7145_v43 = vrot.slane %v7143_v44, 1  ;;  %v7057_v2 = vmul.bf16 %v14989_v46, %v14986_v1 }
 0x40d   : > { %v14994_v14 = vsel %vm1335_vm3, %v6999_v28, %v7010_v52  ;;  %v7016_v57 = vshll.u32 %v10298_v40, 16  ;;  %v14996_v50 = vrot.slane %v7021_v63, 7  ;;  %v7147_v62 = vshrl.u32 %v7055_v16, 16 }
 0x40e   : > { %11226 = vmatmul.mubr.msk.bf16.gmra.mrb[12].mxu1 %vm5098_vm4, %v7130_v33  ;;  %v7141_v41 = vor.u32 %v7139_v54, %v7137_v7  ;;  %v7153_v15 = vrot.slane %v7151_v0, 1  ;;  %v7058_v27 = vmul.bf16 %v14376_v19, %v14994_v14  ;;  %v7024_v21 = vshll.u32 %v10299_v47, 16 }
 0x40f   : > { %11229 = vmatprep.mubr.msk.bf16.mxu1 %vm5098_vm4, %v7138_v23  ;;  %v7018_v9 = vor.u32 %v7016_v57, %v7015_v30  ;;  %v7149_v24 = vor.u32 %v7147_v62, %v7145_v43  ;;  %v7159_v17 = vshll.u32 %v7057_v2, 16  ;;  %v7155_v40 = vshrl.u32 %v7056_v3, 16 }
 0x410   : > { %v7026_v44 = vor.u32 %v7024_v21, %v14996_v50  ;;  %v7146_v33 = vsel %vm958_vm2, %v7141_v41, %v7145_v43  ;;  %v7167_v63 = vshll.u32 %v7058_v27, 16  ;;  %v7163_v23 = vshrl.u32 %v7057_v2, 16  ;;  %v15821_v41 = vld [vmem:[#allocation11_spill] sm:$0xff]  ;;  %v7439_v21 = vld [vmem:[#allocation3 + $0x8] sm:$0x80] }
 0x411   : > { %v7154_v52 = vsel %vm958_vm2, %v7149_v24, %v7153_v15  ;;  %v15005_v28 = vsel %vm1335_vm3, %v7007_v58, %v7018_v9  ;;  %v7161_v19 = vrot.slane %v7159_v17, 1  ;;  %v7157_v7 = vor.u32 %v7155_v40, %v7153_v15  ;;  %v6404_v15 = vld [vmem:[#allocation3 + $0x88] sm:$0x1] }
 0x412   : > { %v7059_v16 = vmul.bf16 %v14383_v53, %v15005_v28  ;;  %v15011_v47 = vsel %vm1335_vm3, %v7015_v30, %v7026_v44  ;;  %v7169_v0 = vrot.slane %v7167_v63, 1  ;;  %v7442_v3 = vmul.bf16 %v14706_v61, %v15821_v41 }
 0x413   : > { %v7060_v54 = vmul.bf16 %v14417_v8, %v15011_v47  ;;  %v7165_v43 = vor.u32 %v7163_v23, %v7161_v19  ;;  %v7162_v58 = vsel %vm958_vm2, %v7157_v7, %v7161_v19  ;;  %v7171_v30 = vshrl.u32 %v7058_v27, 16 }
 0x414   : > { %v7175_v57 = vshll.u32 %v7059_v16, 16  ;;  %v7464_v8 = vshrl.u32 %v7442_v3, 16  ;;  %v7179_v24 = vshrl.u32 %v7059_v16, 16  ;;  %v7061_v44 = vmul.bf16 %v14996_v50, %v6404_v15 }
 0x415   : > { %v7170_v53 = vsel %vm958_vm2, %v7165_v43, %v7169_v0  ;;  %v7183_v62 = vshll.u32 %v7060_v54, 16  ;;  %v7173_v9 = vor.u32 %v7171_v30, %v7169_v0  ;;  %v7187_v27 = vshrl.u32 %v7060_v54, 16  ;;  %v12009_v54 = vld [vmem:[%s15585_s3 + $0x8] ss:$0 sps:$4 sm:$0xcc]  }
 0x416   : > { %11230 = vmatmul.mubr.msk.bf16.gmra.mrb[16].mxu1 %vm5098_vm4, %v7146_v33  ;;  %v7177_v2 = vrot.slane %v7175_v57, 1  ;;  %v7466_v19 = vrot.slane %v7464_v8, 7  ;;  %v7191_v23 = vshll.u32 %v7061_v44, 16  ;;  %v7467_v0 = vshll.u32 %v7442_v3, 16 }
 0x417   : > { %11233 = vmatprep.mubr.msk.bf16.mxu1 %vm5098_vm4, %v7154_v52  ;;  %v7185_v17 = vrot.slane %v7183_v62, 1  ;;  %v15822_v52 = vld [vmem:[#allocation9_spill] sm:$0xff] }
 0x418   : > { %v7181_v33 = vor.u32 %v7179_v24, %v7177_v2  ;;  %v7441_v63 = vmul.bf16 %v7439_v21, %v15822_v52  ;;  %v7178_v40 = vsel %vm958_vm2, %v7173_v9, %v7177_v2  ;;  %v7469_v57 = vor.u32 %v7467_v0, %v7466_v19  ;;  %v15823_v2 = vld [vmem:[#allocation31_spill] sm:$0xff]  ;;  %v15828_v24 = vld [vmem:[#allocation26_spill] sm:$0xff] }
 0x419   : > { %v7189_v16 = vor.u32 %v7187_v27, %v7185_v17  ;;  %v7475_v15 = vshll.u32 %v15823_v2, 16  ;;  %v7889_v9 = vsel %vm5879_vm5, %v14875_v49, 0  ;;  %v8254_v21 = vrot.slane %v12009_v54, 2  ;;  %v15825_v49 = vld [vmem:[#allocation20_spill] sm:$0xff] }
 0x41a   : > { %v7186_v7 = vsel %vm958_vm2, %v7181_v33, %v7185_v17  ;;  %v7460_v43 = vshrl.u32 %v7441_v63, 16  ;;  %v8518_v33 = vld [vmem:[%s15585_s3 + $0xc] sm:$0x3]  ;;  %v15829_v63 = vld [vmem:[#allocation22_spill] sm:$0xff] }
 0x41b   : > { %v7477_v3 = vor.u32 %v7475_v15, %v14530_v55  ;;  %v15824_v55 = vld [vmem:[#allocation34_spill] sm:$0xff] }
 0x41d   : > { %v7478_v8 = vsel %vm1335_vm3, %v7466_v19, %v7477_v3  ;;  %v15835_v3 = vld [vmem:[#allocation14_spill] sm:$0xff] }
 0x41e   : > { %11234 = vmatmul.mubr.msk.bf16.gmra.mrb[20].mxu1 %vm5098_vm4, %v7162_v58  ;;  %v7193_v58 = vrot.slane %v7191_v23, 1  ;;  %v15833_v23 = vld [vmem:[#allocation12_spill] sm:$0xff] }
 0x41f   : > { %11237 = vmatprep.mubr.msk.bf16.mxu1 %vm5098_vm4, %v7170_v53  ;;  %v7462_v53 = vrot.slane %v7460_v43, 7  ;;  %v8102_v0 = vmul.bf16 %v15829_v63, %v15833_v23  ;;  %v15834_v43 = vld [vmem:[#allocation7_spill] sm:$0xff] }
 0x420   : > { %v7194_v62 = vsel %vm958_vm2, %v7189_v16, %v7193_v58 }
 0x421   : > { %v7470_v30 = vsel %vm1335_vm3, %v7462_v53, %v7469_v57  ;;  %v15110_v57 = vld [vmem:[#allocation3 + $0x78] sm:$0xff]  ;;  %v15114_v53 = vld [vmem:[#allocation3 + $0x80] sm:$0xff] }
 0x426   : > { %11238 = vmatmul.mubr.msk.bf16.gmra.mrb[24].mxu1 %vm5098_vm4, %v7178_v40  ;;  %v15832_v40 = vld [vmem:[#allocation24_spill] sm:$0xff] }
 0x427   : > { %11241 = vmatprep.mubr.msk.bf16.mxu1 %vm5098_vm4, %v7186_v7  ;;  %v15102_v7 = vld [vmem:[#allocation3 + $0x70] sm:$0xff] }
 0x42e   : > { %11242 = vmatmul.mubr.msk.bf16.gmra.mrb[28].mxu1 %vm5098_vm4, %v7194_v62 }
 0x42f   : > { %11247 = vmatprep.mubr.msk.bf16.mxu1 %vm5098_vm4, %v7470_v30  ;;  %v8127_v30 = vshll.u32 %v8102_v0, 16 }
 0x431   : > { %v8129_v54 = vrot.slane %v8127_v30, 1 }
 0x436   : > { %11248 = vmatmul.mubr.msk.bf16.vlgmr.msra.gmra.mrb[0].mxu1 %vm5098_vm4, %v7478_v8 }
 0x437   : > { %11280 = vmatpush3.bf16.msra.mxu1 %v7889_v9  ;;  %11251 = vmatprep.mubr.msk.bf16.mxu1 %vm5098_vm4, %v14570_v38  ;;  %v15826_v38 = vld [vmem:[#allocation6_spill] sm:$0xff] }
 0x438   : > { %11975 = vmatprep.subr.msk.bf16.mxu1 %vm5879_vm5, %v8254_v21 }
 0x43e   : > { %11252 = vmatmul.mubr.msk.bf16.gmra.mrb[4].mxu1 %vm5098_vm4, %v14575_v48  ;;  %v7457_v48 = vmul.bf16 %v14831_v22, %v15790_v10 }
 0x43f   : > { %11255 = vmatprep.mubr.msk.bf16.mxu1 %vm5098_vm4, %v14582_v34  ;;  %v15827_v34 = vld [vmem:[#allocation21_spill] sm:$0xff] }
 0x440   : > { %v7587_v17 = vshll.u32 %v7457_v48, 16 }
 0x446   : > { %11256 = vmatmul.mubr.msk.bf16.gmra.mrb[8].mxu1 %vm5098_vm4, %v14595_v4  ;;  %v7584_v4 = vshrl.u32 %v7457_v48, 16 }
 0x447   : > { %11259 = vmatprep.mubr.msk.bf16.mxu1 %vm5098_vm4, %v14606_v11 }
 0x448   : > { %v7586_v11 = vrot.slane %v7584_v4, 7  ;;  %v8131_v4 = vshrl.u32 %v8102_v0, 16  ;;  %v8107_v0 = vmul.bf16 %v14887_v39, %v15803_v51 }
 0x44a   : > { %v7589_v44 = vor.u32 %v7587_v17, %v7586_v11  ;;  %v8133_v17 = vor.u32 %v8131_v4, %v8129_v54 }
 0x44e   : > { %11260 = vmatmul.mubr.msk.bf16.gmra.mrb[12].mxu1 %vm5098_vm4, %v15824_v55  ;;  %v15836_v55 = vld [vmem:[#allocation27_spill] sm:$0xff] }
 0x44f   : > { %11263 = vmatprep.mubr.msk.bf16.mxu1 %vm5098_vm4, %v15825_v49  ;;  %v8105_v49 = vmul.bf16 %v14791_v59, %v15836_v55 }
 0x456   : > { %11264 = vmatmul.mubr.msk.bf16.gmra.mrb[16].mxu1 %vm5098_vm4, %v15826_v38 }
 0x457   : > { %11267 = vmatprep.mubr.msk.bf16.mxu1 %vm5098_vm4, %v14703_v6  ;;  %v7590_v6 = vsel %vm1335_vm3, %v14779_v5, %v7589_v44  ;;  %v15831_v5 = vld [vmem:[#allocation23_spill] sm:$0xff]  ;;  %v8700_v44 = vsel %vm5879_vm5, %v8518_v33, 0 }
 0x458   : > { %v8104_v9 = vmul.bf16 %v15831_v5, %v15835_v3 }
 0x45a   : > { %v8143_v48 = vshll.u32 %v8104_v9, 16 }
 0x45e   : > { %11268 = vmatmul.mubr.msk.bf16.gmra.mrb[20].mxu1 %vm5098_vm4, %v15827_v34  ;;  %v15129_v34 = vld [vmem:[%s15585_s3 + $0xc] ss:$0 sps:$4 sm:$0xcc]  }
 0x45f   : > { %11271 = vmatprep.mubr.msk.bf16.mxu1 %vm5098_vm4, %v14752_v31  ;;  %v8304_v31 = vsel %vm5879_vm5, %v8254_v21, 0 }
 0x466   : > { %11272 = vmatmul.mubr.msk.bf16.gmra.mrb[24].mxu1 %vm5098_vm4, %v15828_v24  ;;  %v8151_v24 = vshll.u32 %v8105_v49, 16 }
 0x467   : > { %11275 = vmatprep.mubr.msk.bf16.mxu1 %vm5098_vm4, %v14808_v29  ;;  %v15830_v29 = vld [vmem:[#allocation25_spill] sm:$0xff] }
 0x468   : > { %v8103_v16 = vmul.bf16 %v15830_v29, %v15834_v43 }
 0x46a   : > { %v8135_v15 = vshll.u32 %v8103_v16, 16  ;;  %v8139_v38 = vshrl.u32 %v8103_v16, 16  ;;  %v8153_v16 = vrot.slane %v8151_v24, 1 }
 0x46c   : > { %v8137_v8 = vrot.slane %v8135_v15, 1 }
 0x46e   : > { %11276 = vmatmul.mubr.msk.bf16.gmra.mrb[28].mxu1 %vm5098_vm4, %v7590_v6  ;;  %v8141_v11 = vor.u32 %v8139_v38, %v8137_v8  ;;  %v8145_v6 = vrot.slane %v8143_v48, 1  ;;  %v8109_v48 = vmul.bf16 %v14954_v20, %v14936_v56 }
 0x46f   : > { %11281 = vmatprep.mubr.msk.bf16.mxu1 %vm5098_vm4, %v14706_v61  ;;  %v8084_v61 = vld [vmem:[#allocation3 + $0x10] sm:$0xff] }
 0x470   : > { %v8101_v19 = vmul.bf16 %v8084_v61, %v15832_v40  ;;  %v8899_v61 = vrot.slane %v15129_v34, 2  ;;  %v15840_v34 = vld [vmem:[#allocation19_spill] sm:$0xff] }
 0x472   : > { %v8122_v27 = vshll.u32 %v8101_v19, 16  ;;  %v8120_v62 = vshrl.u32 %v8101_v19, 16  ;;  %v8138_v19 = vsel %vm958_vm2, %v8133_v17, %v8137_v8  ;;  %v8183_v17 = vshll.u32 %v8109_v48, 16 }
 0x474   : > { %v8124_v58 = vrot.slane %v8122_v27, 1  ;;  %v8146_v27 = vsel %vm958_vm2, %v8141_v11, %v8145_v6 }
 0x476   : > { %11282 = vmatmul.mubr.msk.bf16.vlgmr.msra.gmra.mrb[0].mxu1 %vm5098_vm4, %v15829_v63  ;;  %v8125_v2 = vor.u32 %v8124_v58, %v8120_v62  ;;  %v8147_v62 = vshrl.u32 %v8104_v9, 16  ;;  %v8171_v9 = vshrl.u32 %v8107_v0, 16 }
 0x477   : > { %11314 = vmatpush3.bf16.msra.mxu1 %v8304_v31  ;;  %11285 = vmatprep.mubr.msk.bf16.mxu1 %vm5098_vm4, %v15830_v29  ;;  %v8106_v31 = vmul.bf16 %v14797_v60, %v15802_v12 }
 0x478   : > { %11976 = vmatprep.subr.msk.bf16.mxu1 %vm5879_vm5, %v8518_v33  ;;  %v8130_v21 = vsel %vm958_vm2, %v8125_v2, %v8129_v54  ;;  %v8155_v33 = vshrl.u32 %v8105_v49, 16  ;;  %v8167_v2 = vshll.u32 %v8107_v0, 16  ;;  %v8149_v15 = vor.u32 %v8147_v62, %v8145_v6 }
 0x479   : > { %v8159_v58 = vshll.u32 %v8106_v31, 16  ;;  %v8163_v11 = vshrl.u32 %v8106_v31, 16  ;;  %v8187_v31 = vshrl.u32 %v8109_v48, 16 }
 0x47a   : > { %v8157_v30 = vor.u32 %v8155_v33, %v8153_v16  ;;  %v8154_v8 = vsel %vm958_vm2, %v8149_v15, %v8153_v16  ;;  %v8169_v49 = vrot.slane %v8167_v2, 1  ;;  %v8185_v33 = vrot.slane %v8183_v17, 1 }
 0x47b   : > { %v8161_v54 = vrot.slane %v8159_v58, 1  ;;  %v8111_v58 = vmul.bf16 %v14978_v45, %v14967_v26 }
 0x47c   : > { %v8173_v24 = vor.u32 %v8171_v9, %v8169_v49 }
 0x47d   : > { %v8162_v38 = vsel %vm958_vm2, %v8157_v30, %v8161_v54  ;;  %v8189_v30 = vor.u32 %v8187_v31, %v8185_v33  ;;  %v8199_v2 = vshll.u32 %v8111_v58, 16 }
 0x47e   : > { %11286 = vmatmul.mubr.msk.bf16.gmra.mrb[4].mxu1 %vm5098_vm4, %v15831_v5 }
 0x47f   : > { %11289 = vmatprep.mubr.msk.bf16.mxu1 %vm5098_vm4, %v14791_v59  ;;  %v8201_v9 = vrot.slane %v8199_v2, 1 }
 0x486   : > { %11290 = vmatmul.mubr.msk.bf16.gmra.mrb[8].mxu1 %vm5098_vm4, %v14797_v60 }
 0x487   : > { %11293 = vmatprep.mubr.msk.bf16.mxu1 %vm5098_vm4, %v14887_v39 }
 0x48e   : > { %11294 = vmatmul.mubr.msk.bf16.gmra.mrb[12].mxu1 %vm5098_vm4, %v14942_v37 }
 0x48f   : > { %11297 = vmatprep.mubr.msk.bf16.mxu1 %vm5098_vm4, %v14954_v20 }
 0x496   : > { %11298 = vmatmul.mubr.msk.bf16.gmra.mrb[16].mxu1 %vm5098_vm4, %v14971_v25 }
 0x497   : > { %11301 = vmatprep.mubr.msk.bf16.mxu1 %vm5098_vm4, %v14978_v45 }
 0x49e   : > { %11302 = vmatmul.mubr.msk.bf16.gmra.mrb[20].mxu1 %vm5098_vm4, %v14989_v46 }
 0x49f   : > { %11305 = vmatprep.mubr.msk.bf16.mxu1 %vm5098_vm4, %v15102_v7 }
 0x4a6   : > { %11306 = vmatmul.mubr.msk.bf16.gmra.mrb[24].mxu1 %vm5098_vm4, %v15110_v57 }
 0x4a7   : > { %11309 = vmatprep.mubr.msk.bf16.mxu1 %vm5098_vm4, %v15114_v53 }
 0x4ae   : > { %11310 = vmatmul.mubr.msk.bf16.gmra.mrb[28].mxu1 %vm5098_vm4, %v14831_v22 }
 0x4af   : > { %11315 = vmatprep.mubr.msk.bf16.mxu1 %vm5098_vm4, %v8130_v21  ;;  %v8108_v21 = vmul.bf16 %v14942_v37, %v15810_v42 }
 0x4b1   : > { %v8175_v4 = vshll.u32 %v8108_v21, 16  ;;  %v8179_v62 = vshrl.u32 %v8108_v21, 16  ;;  %v8203_v21 = vshrl.u32 %v8111_v58, 16 }
 0x4b3   : > { %v8177_v6 = vrot.slane %v8175_v4, 1  ;;  %v8113_v4 = vmul.bf16 %v15102_v7, %v14986_v1 }
 0x4b5   : > { %v8178_v16 = vsel %vm958_vm2, %v8173_v24, %v8177_v6  ;;  %v8181_v15 = vor.u32 %v8179_v62, %v8177_v6  ;;  %v8205_v24 = vor.u32 %v8203_v21, %v8201_v9  ;;  %v8215_v17 = vshll.u32 %v8113_v4, 16 }
 0x4b6   : > { %11316 = vmatmul.mubr.msk.bf16.vlgmr.msra.gmra.mrb[0].mxu1 %vm5098_vm4, %v8138_v19  ;;  %v8110_v19 = vmul.bf16 %v14971_v25, %v14949_v36 }
 0x4b7   : > { %11348 = vmatpush3.bf16.msra.mxu1 %v8700_v44  ;;  %11319 = vmatprep.mubr.msk.bf16.mxu1 %vm5098_vm4, %v8146_v27  ;;  %v8165_v44 = vor.u32 %v8163_v11, %v8161_v54  ;;  %v8217_v31 = vrot.slane %v8215_v17, 1 }
 0x4b8   : > { %11977 = vmatprep.subr.msk.bf16.mxu1 %vm5879_vm5, %v8899_v61  ;;  %v8191_v0 = vshll.u32 %v8110_v19, 16  ;;  %v8195_v11 = vshrl.u32 %v8110_v19, 16  ;;  %v8219_v19 = vshrl.u32 %v8113_v4, 16 }
 0x4b9   : > { %v8170_v27 = vsel %vm958_vm2, %v8165_v44, %v8169_v49 }
 0x4ba   : > { %v8193_v54 = vrot.slane %v8191_v0, 1  ;;  %v8115_v0 = vmul.bf16 %v15114_v53, %v15005_v28 }
 0x4bc   : > { %v8194_v49 = vsel %vm958_vm2, %v8189_v30, %v8193_v54  ;;  %v8197_v44 = vor.u32 %v8195_v11, %v8193_v54  ;;  %v8221_v30 = vor.u32 %v8219_v19, %v8217_v31  ;;  %v8231_v2 = vshll.u32 %v8115_v0, 16 }
 0x4bd   : > { %v8235_v4 = vshrl.u32 %v8115_v0, 16 }
 0x4be   : > { %11320 = vmatmul.mubr.msk.bf16.gmra.mrb[4].mxu1 %vm5098_vm4, %v8154_v8  ;;  %v8112_v8 = vmul.bf16 %v14989_v46, %v14976_v32 }
 0x4bf   : > { %11323 = vmatprep.mubr.msk.bf16.mxu1 %vm5098_vm4, %v8162_v38  ;;  %v8186_v38 = vsel %vm958_vm2, %v8181_v15, %v8185_v33 }
 0x4c0   : > { %v8207_v48 = vshll.u32 %v8112_v8, 16  ;;  %v8211_v62 = vshrl.u32 %v8112_v8, 16  ;;  %v8499_v8 = vld [vmem:[#allocation3 + $0x10] sm:$0x80] }
 0x4c2   : > { %v8209_v6 = vrot.slane %v8207_v48, 1  ;;  %v8233_v48 = vrot.slane %v8231_v2, 1 }
 0x4c4   : > { %v8210_v33 = vsel %vm958_vm2, %v8205_v24, %v8209_v6  ;;  %v8213_v15 = vor.u32 %v8211_v62, %v8209_v6  ;;  %v8100_v24 = vld [vmem:[#allocation3 + $0x90] sm:$0x1]  ;;  %v8237_v6 = vor.u32 %v8235_v4, %v8233_v48 }
 0x4c6   : > { %11324 = vmatmul.mubr.msk.bf16.gmra.mrb[8].mxu1 %vm5098_vm4, %v8170_v27  ;;  %v8114_v27 = vmul.bf16 %v15110_v57, %v14994_v14 }
 0x4c7   : > { %11327 = vmatprep.mubr.msk.bf16.mxu1 %vm5098_vm4, %v8178_v16  ;;  %v8202_v16 = vsel %vm958_vm2, %v8197_v44, %v8201_v9  ;;  %v8502_v9 = vmul.bf16 %v15829_v63, %v15821_v41 }
 0x4c8   : > { %v8223_v58 = vshll.u32 %v8114_v27, 16  ;;  %v8227_v17 = vshrl.u32 %v8114_v27, 16 }
 0x4c9   : > { %v8524_v44 = vshrl.u32 %v8502_v9, 16  ;;  %v8527_v2 = vshll.u32 %v8502_v9, 16 }
 0x4ca   : > { %v8225_v54 = vrot.slane %v8223_v58, 1 }
 0x4cb   : > { %v8526_v58 = vrot.slane %v8524_v44, 7  ;;  %v15839_v44 = vld [vmem:[#allocation32_spill] sm:$0xff] }
 0x4cc   : > { %v8226_v21 = vsel %vm958_vm2, %v8221_v30, %v8225_v54 }
 0x4ce   : > { %11328 = vmatmul.mubr.msk.bf16.gmra.mrb[12].mxu1 %vm5098_vm4, %v8186_v38  ;;  %v8116_v38 = vmul.bf16 %v14831_v22, %v15011_v47 }
 0x4cf   : > { %11331 = vmatprep.mubr.msk.bf16.mxu1 %vm5098_vm4, %v8194_v49  ;;  %v8218_v49 = vsel %vm958_vm2, %v8213_v15, %v8217_v31  ;;  %v8117_v31 = vmul.bf16 %v8100_v24, %v14996_v50 }
 0x4d0   : > { %v8239_v11 = vshll.u32 %v8116_v38, 16  ;;  %v8243_v0 = vshrl.u32 %v8116_v38, 16  ;;  %v8949_v38 = vsel %vm5879_vm5, %v8899_v61, 0  ;;  %v15841_v61 = vld [vmem:[#allocation18_spill] sm:$0xff] }
 0x4d1   : > { %v8247_v27 = vshll.u32 %v8117_v31, 16  ;;  %v15845_v31 = vld [vmem:[#allocation15_spill] sm:$0xff] }
 0x4d2   : > { %v8241_v41 = vrot.slane %v8239_v11, 1  ;;  %v15838_v11 = vld [vmem:[#allocation10_spill] sm:$0xff] }
 0x4d4   : > { %v8242_v62 = vsel %vm958_vm2, %v8237_v6, %v8241_v41  ;;  %v8245_v15 = vor.u32 %v8243_v0, %v8241_v41  ;;  %v15842_v6 = vld [vmem:[#allocation4_spill] sm:$0xff] }
 0x4d6   : > { %11332 = vmatmul.mubr.msk.bf16.gmra.mrb[16].mxu1 %vm5098_vm4, %v8202_v16  ;;  %v8501_v16 = vmul.bf16 %v8499_v8, %v15822_v52  ;;  %v8529_v52 = vor.u32 %v8527_v2, %v8526_v58  ;;  %v15837_v8 = vld [vmem:[#allocation17_spill] sm:$0xff] }
 0x4d7   : > { %11335 = vmatprep.mubr.msk.bf16.mxu1 %vm5098_vm4, %v8210_v33  ;;  %v8229_v33 = vor.u32 %v8227_v17, %v8225_v54  ;;  %v8249_v54 = vrot.slane %v8247_v27, 1  ;;  %v8535_v4 = vshll.u32 %v15837_v8, 16  ;;  %v9178_v17 = vld [vmem:[%s15585_s3 + $0x10] sm:$0x3] }
 0x4d8   : > { %v8520_v30 = vshrl.u32 %v8501_v16, 16  ;;  %v15843_v16 = vld [vmem:[#allocation5_spill] sm:$0xff] }
 0x4d9   : > { %v8234_v19 = vsel %vm958_vm2, %v8229_v33, %v8233_v48  ;;  %v8537_v24 = vor.u32 %v8535_v4, %v15838_v11  ;;  %v15844_v33 = vld [vmem:[#allocation33_spill] sm:$0xff] }
 0x4db   : > { %v8538_v9 = vsel %vm1335_vm3, %v8526_v58, %v8537_v24 }
 0x4de   : > { %11336 = vmatmul.mubr.msk.bf16.gmra.mrb[20].mxu1 %vm5098_vm4, %v8218_v49  ;;  %v8522_v49 = vrot.slane %v8520_v30, 7  ;;  %v15848_v30 = vld [vmem:[#allocation35_spill] sm:$0xff] }
 0x4df   : > { %11339 = vmatprep.mubr.msk.bf16.mxu1 %vm5098_vm4, %v8226_v21  ;;  %v8250_v21 = vsel %vm958_vm2, %v8245_v15, %v8249_v54 }
 0x4e0   : > { %v8530_v48 = vsel %vm1335_vm3, %v8522_v49, %v8529_v52 }
 0x4e6   : > { %11340 = vmatmul.mubr.msk.bf16.gmra.mrb[24].mxu1 %vm5098_vm4, %v8234_v19  ;;  %v15846_v19 = vld [vmem:[#allocation28_spill] sm:$0xff] }
 0x4e7   : > { %11343 = vmatprep.mubr.msk.bf16.mxu1 %vm5098_vm4, %v8242_v62  ;;  %v15847_v62 = vld [vmem:[#allocation29_spill] sm:$0xff] }
 0x4ee   : > { %11344 = vmatmul.mubr.msk.bf16.gmra.mrb[28].mxu1 %vm5098_vm4, %v8250_v21 }
 0x4ef   : > { %11349 = vmatprep.mubr.msk.bf16.mxu1 %vm5098_vm4, %v8530_v48 }
 0x4f6   : > { %11350 = vmatmul.mubr.msk.bf16.vlgmr.msra.gmra.mrb[0].mxu1 %vm5098_vm4, %v8538_v9 }
 0x4f7   : > { %11382 = vmatpush3.bf16.msra.mxu1 %v8949_v38  ;;  %11353 = vmatprep.mubr.msk.bf16.mxu1 %vm5098_vm4, %v15839_v44  ;;  %v9150_v38 = vld [vmem:[#allocation3 + $0x48] sm:$0xff] }
 0x4f8   : > { %11978 = vmatprep.subr.msk.bf16.mxu1 %vm5879_vm5, %v9178_v17 }
 0x4fe   : > { %11354 = vmatmul.mubr.msk.bf16.gmra.mrb[4].mxu1 %vm5098_vm4, %v14847_v13  ;;  %v8500_v13 = vld [vmem:[#allocation3 + $0x90] sm:$0xff] }
 0x4ff   : > { %11357 = vmatprep.mubr.msk.bf16.mxu1 %vm5098_vm4, %v15840_v34  ;;  %v8517_v41 = vmul.bf16 %v8500_v13, %v15790_v10  ;;  %v9360_v10 = vsel %vm5879_vm5, %v9178_v17, 0  ;;  %v9151_v34 = vld [vmem:[#allocation3 + $0x50] sm:$0xff] }
 0x501   : > { %v8644_v58 = vshrl.u32 %v8517_v41, 16  ;;  %v8647_v0 = vshll.u32 %v8517_v41, 16 }
 0x506   : > { %11358 = vmatmul.mubr.msk.bf16.gmra.mrb[8].mxu1 %vm5098_vm4, %v15841_v61  ;;  %v9167_v61 = vmul.bf16 %v9150_v38, %v15803_v51 }
 0x507   : > { %11361 = vmatprep.mubr.msk.bf16.mxu1 %vm5098_vm4, %v15842_v6 }
 0x50e   : > { %11362 = vmatmul.mubr.msk.bf16.gmra.mrb[12].mxu1 %vm5098_vm4, %v15843_v16 }
 0x50f   : > { %11365 = vmatprep.mubr.msk.bf16.mxu1 %vm5098_vm4, %v15844_v33  ;;  %v9168_v33 = vmul.bf16 %v9151_v34, %v15810_v42 }
 0x516   : > { %11366 = vmatmul.mubr.msk.bf16.gmra.mrb[16].mxu1 %vm5098_vm4, %v14896_v35  ;;  %v8646_v35 = vrot.slane %v8644_v58, 7 }
 0x517   : > { %11369 = vmatprep.mubr.msk.bf16.mxu1 %vm5098_vm4, %v14899_v18  ;;  %v15849_v18 = vld [vmem:[#allocation16_spill] sm:$0xff] }
 0x518   : > { %v8649_v27 = vor.u32 %v8647_v0, %v8646_v35  ;;  %v9153_v35 = vld [vmem:[#allocation3 + $0x60] sm:$0xff] }
 0x51a   : > { %v8650_v2 = vsel %vm1335_vm3, %v15849_v18, %v8649_v27  ;;  %v9231_v18 = vshrl.u32 %v9167_v61, 16 }
 0x51e   : > { %11370 = vmatmul.mubr.msk.bf16.gmra.mrb[20].mxu1 %vm5098_vm4, %v15845_v31  ;;  %v9227_v31 = vshll.u32 %v9167_v61, 16 }
 0x51f   : > { %11373 = vmatprep.mubr.msk.bf16.mxu1 %vm5098_vm4, %v15846_v19  ;;  %v9152_v19 = vld [vmem:[#allocation3 + $0x58] sm:$0xff] }
 0x520   : > { %v9229_v51 = vrot.slane %v9227_v31, 1  ;;  %v9169_v0 = vmul.bf16 %v9152_v19, %v14936_v56 }
 0x526   : > { %11374 = vmatmul.mubr.msk.bf16.gmra.mrb[24].mxu1 %vm5098_vm4, %v15847_v62  ;;  %v9235_v62 = vshll.u32 %v9168_v33, 16 }
 0x527   : > { %11377 = vmatprep.mubr.msk.bf16.mxu1 %vm5098_vm4, %v15848_v30 }
 0x528   : > { %v9237_v42 = vrot.slane %v9235_v62, 1 }
 0x52e   : > { %11378 = vmatmul.mubr.msk.bf16.gmra.mrb[28].mxu1 %vm5098_vm4, %v8650_v2  ;;  %v9170_v2 = vmul.bf16 %v9153_v35, %v14949_v36 }
 0x52f   : > { %11383 = vmatprep.mubr.msk.bf16.mxu1 %vm5098_vm4, %v15829_v63 }
 0x536   : > { %11384 = vmatmul.mubr.msk.bf16.vlgmr.msra.gmra.mrb[0].mxu1 %vm5098_vm4, %v15830_v29 }
 0x537   : > { %11416 = vmatpush3.bf16.msra.mxu1 %v9360_v10  ;;  %11387 = vmatprep.mubr.msk.bf16.mxu1 %vm5098_vm4, %v15831_v5  ;;  %v9233_v10 = vor.u32 %v9231_v18, %v9229_v51 }
 0x53e   : > { %11388 = vmatmul.mubr.msk.bf16.gmra.mrb[4].mxu1 %vm5098_vm4, %v14791_v59  ;;  %v9144_v59 = vld [vmem:[#allocation3 + $0x18] sm:$0xff] }
 0x53f   : > { %11391 = vmatprep.mubr.msk.bf16.mxu1 %vm5098_vm4, %v14797_v60  ;;  %v9145_v60 = vld [vmem:[#allocation3 + $0x20] sm:$0xff] }
 0x546   : > { %11392 = vmatmul.mubr.msk.bf16.gmra.mrb[8].mxu1 %vm5098_vm4, %v14887_v39  ;;  %v9161_v39 = vmul.bf16 %v9144_v59, %v15832_v40  ;;  %v9243_v59 = vshll.u32 %v9169_v0, 16 }
 0x547   : > { %11395 = vmatprep.mubr.msk.bf16.mxu1 %vm5098_vm4, %v14942_v37  ;;  %v9162_v37 = vmul.bf16 %v9145_v60, %v15833_v23  ;;  %v9148_v23 = vld [vmem:[#allocation3 + $0x38] sm:$0xff] }
 0x548   : > { %v9180_v5 = vshrl.u32 %v9161_v39, 16  ;;  %v9165_v21 = vmul.bf16 %v9148_v23, %v15836_v55  ;;  %v9245_v56 = vrot.slane %v9243_v59, 1 }
 0x549   : > { %v9191_v52 = vshrl.u32 %v9162_v37, 16 }
 0x54a   : > { %v9211_v11 = vshll.u32 %v9165_v21, 16  ;;  %v9215_v16 = vshrl.u32 %v9165_v21, 16 }
 0x54c   : > { %v9213_v55 = vrot.slane %v9211_v11, 1 }
 0x54e   : > { %11396 = vmatmul.mubr.msk.bf16.gmra.mrb[12].mxu1 %vm5098_vm4, %v14954_v20  ;;  %v9182_v20 = vshll.u32 %v9161_v39, 16  ;;  %v9154_v39 = vld [vmem:[#allocation3 + $0x68] sm:$0xff] }
 0x54f   : > { %11399 = vmatprep.mubr.msk.bf16.mxu1 %vm5098_vm4, %v14971_v25  ;;  %v9146_v25 = vld [vmem:[#allocation3 + $0x28] sm:$0xff] }
 0x550   : > { %v9184_v63 = vrot.slane %v9182_v20, 1  ;;  %v9163_v29 = vmul.bf16 %v9146_v25, %v15834_v43  ;;  %v9251_v20 = vshll.u32 %v9170_v2, 16  ;;  %v9239_v25 = vshrl.u32 %v9168_v33, 16 }
 0x552   : > { %v9185_v40 = vor.u32 %v9184_v63, %v9180_v5  ;;  %v9195_v15 = vshll.u32 %v9163_v29, 16  ;;  %v9199_v48 = vshrl.u32 %v9163_v29, 16  ;;  %v9241_v63 = vor.u32 %v9239_v25, %v9237_v42 }
 0x553   : > { %v9247_v29 = vshrl.u32 %v9169_v0, 16  ;;  %v9253_v36 = vrot.slane %v9251_v20, 1 }
 0x554   : > { %v9197_v54 = vrot.slane %v9195_v15, 1  ;;  %v9156_v15 = vld [vmem:[#allocation3 + $0x78] sm:$0xff] }
 0x556   : > { %11400 = vmatmul.mubr.msk.bf16.gmra.mrb[16].mxu1 %vm5098_vm4, %v14978_v45  ;;  %v9187_v45 = vshll.u32 %v9162_v37, 16  ;;  %v9201_v4 = vor.u32 %v9199_v48, %v9197_v54  ;;  %v9238_v37 = vsel %vm958_vm2, %v9233_v10, %v9237_v42  ;;  %v9158_v48 = vld [vmem:[#allocation3 + $0x88] sm:$0xff] }
 0x557   : > { %11403 = vmatprep.mubr.msk.bf16.mxu1 %vm5098_vm4, %v14989_v46  ;;  %v9147_v46 = vld [vmem:[#allocation3 + $0x30] sm:$0xff]  ;;  %v9175_v38 = vmul.bf16 %v9158_v48, %v15005_v28 }
 0x55e   : > { %11404 = vmatmul.mubr.msk.bf16.gmra.mrb[20].mxu1 %vm5098_vm4, %v15102_v7  ;;  %v9189_v7 = vrot.slane %v9187_v45, 1  ;;  %v9155_v45 = vld [vmem:[#allocation3 + $0x70] sm:$0xff] }
 0x55f   : > { %11407 = vmatprep.mubr.msk.bf16.mxu1 %vm5098_vm4, %v15110_v57  ;;  %v9164_v57 = vmul.bf16 %v9147_v46, %v15835_v3  ;;  %v9171_v46 = vmul.bf16 %v9154_v39, %v14967_v26  ;;  %v9172_v5 = vmul.bf16 %v9155_v45, %v14976_v32 }
 0x560   : > { %v9190_v49 = vsel %vm958_vm2, %v9185_v40, %v9189_v7  ;;  %v9193_v43 = vor.u32 %v9191_v52, %v9189_v7  ;;  %v9249_v7 = vor.u32 %v9247_v29, %v9245_v56  ;;  %v9246_v40 = vsel %vm958_vm2, %v9241_v63, %v9245_v56  ;;  %v9157_v52 = vld [vmem:[#allocation3 + $0x80] sm:$0xff] }
 0x561   : > { %v9207_v44 = vshrl.u32 %v9164_v57, 16  ;;  %v9263_v21 = vshrl.u32 %v9171_v46, 16 }
 0x562   : > { %v9198_v24 = vsel %vm958_vm2, %v9193_v43, %v9197_v54  ;;  %v9254_v23 = vsel %vm958_vm2, %v9249_v7, %v9253_v36  ;;  %v9174_v43 = vmul.bf16 %v9157_v52, %v14994_v14 }
 0x564   : > { %v9287_v28 = vshrl.u32 %v9174_v43, 16 }
 0x566   : > { %11408 = vmatmul.mubr.msk.bf16.gmra.mrb[24].mxu1 %vm5098_vm4, %v15114_v53  ;;  %v9203_v53 = vshll.u32 %v9164_v57, 16  ;;  %v9259_v57 = vshll.u32 %v9171_v46, 16 }
 0x567   : > { %11411 = vmatprep.mubr.msk.bf16.mxu1 %vm5098_vm4, %v14831_v22  ;;  %v9149_v22 = vld [vmem:[#allocation3 + $0x40] sm:$0xff] }
 0x568   : > { %v9205_v8 = vrot.slane %v9203_v53, 1  ;;  %v9166_v3 = vmul.bf16 %v9149_v22, %v15802_v12  ;;  %v9255_v53 = vshrl.u32 %v9170_v2, 16  ;;  %v9261_v26 = vrot.slane %v9259_v57, 1 }
 0x569   : > { %v9173_v22 = vmul.bf16 %v9156_v15, %v14986_v1  ;;  %v9271_v1 = vshrl.u32 %v9172_v5, 16 }
 0x56a   : > { %v9206_v9 = vsel %vm958_vm2, %v9201_v4, %v9205_v8  ;;  %v9219_v17 = vshll.u32 %v9166_v3, 16  ;;  %v9209_v6 = vor.u32 %v9207_v44, %v9205_v8  ;;  %v9223_v30 = vshrl.u32 %v9166_v3, 16  ;;  %v9159_v44 = vld [vmem:[#allocation3 + $0x90] sm:$0xff] }
 0x56b   : > { %v9257_v54 = vor.u32 %v9255_v53, %v9253_v36  ;;  %v9265_v8 = vor.u32 %v9263_v21, %v9261_v26  ;;  %v9275_v3 = vshll.u32 %v9173_v22, 16  ;;  %v9279_v34 = vshrl.u32 %v9173_v22, 16 }
 0x56c   : > { %v9221_v12 = vrot.slane %v9219_v17, 1  ;;  %v9214_v41 = vsel %vm958_vm2, %v9209_v6, %v9213_v55  ;;  %v9176_v6 = vmul.bf16 %v9159_v44, %v15011_v47 }
 0x56d   : > { %v9262_v4 = vsel %vm958_vm2, %v9257_v54, %v9261_v26 }
 0x56e   : > { %11412 = vmatmul.mubr.msk.bf16.gmra.mrb[28].mxu1 %vm5098_vm4, %v8500_v13  ;;  %v9217_v13 = vor.u32 %v9215_v16, %v9213_v55  ;;  %v9225_v27 = vor.u32 %v9223_v30, %v9221_v12  ;;  %v9291_v55 = vshll.u32 %v9175_v38, 16  ;;  %v9299_v31 = vshll.u32 %v9176_v6, 16 }
 0x56f   : > { %11417 = vmatprep.mubr.msk.bf16.mxu1 %vm5098_vm4, %v9190_v49  ;;  %v9267_v49 = vshll.u32 %v9172_v5, 16 }
 0x570   : > { %v9222_v58 = vsel %vm958_vm2, %v9217_v13, %v9221_v12  ;;  %v9230_v60 = vsel %vm958_vm2, %v9225_v27, %v9229_v51  ;;  %v9293_v33 = vrot.slane %v9291_v55, 1  ;;  %v9295_v13 = vshrl.u32 %v9175_v38, 16 }
 0x571   : > { %v9269_v32 = vrot.slane %v9267_v49, 1  ;;  %v9301_v30 = vrot.slane %v9299_v31, 1  ;;  %v9303_v51 = vshrl.u32 %v9176_v6, 16  ;;  %v10453_v31 = vld [vmem:[%s12457_s18] sm:$0xff]  }
 0x573   : > { %v9270_v11 = vsel %vm958_vm2, %v9265_v8, %v9269_v32  ;;  %v9273_v17 = vor.u32 %v9271_v1, %v9269_v32  ;;  %v9305_v27 = vor.u32 %v9303_v51, %v9301_v30 }
 0x576   : > { %11418 = vmatmul.mubr.msk.bf16.vlgmr.msra.gmra.mrb[0].mxu1 %vm5098_vm4, %v9198_v24  ;;  %v9283_v24 = vshll.u32 %v9174_v43, 16 }
 0x577   : > { %11421 = vmatprep.mubr.msk.bf16.mxu1 %vm5098_vm4, %v9206_v9  ;;  %v9277_v9 = vrot.slane %v9275_v3, 1 }
 0x578   : > { %v9285_v14 = vrot.slane %v9283_v24, 1 }
 0x579   : > { %v9281_v61 = vor.u32 %v9279_v34, %v9277_v9  ;;  %v9278_v16 = vsel %vm958_vm2, %v9273_v17, %v9277_v9 }
 0x57a   : > { %v9289_v19 = vor.u32 %v9287_v28, %v9285_v14 }
 0x57b   : > { %v9286_v12 = vsel %vm958_vm2, %v9281_v61, %v9285_v14 }
 0x57c   : > { %v9294_v47 = vsel %vm958_vm2, %v9289_v19, %v9293_v33 }
 0x57e   : > { %11422 = vmatmul.mubr.msk.bf16.gmra.mrb[4].mxu1 %vm5098_vm4, %v9214_v41  ;;  %v9160_v41 = vld [vmem:[#allocation3 + $0x98] sm:$0x1] }
 0x57f   : > { %11425 = vmatprep.mubr.msk.bf16.mxu1 %vm5098_vm4, %v9222_v58  ;;  %v9297_v58 = vor.u32 %v9295_v13, %v9293_v33  ;;  %v9177_v62 = vmul.bf16 %v9160_v41, %v14996_v50  ;;  %v15319_v50 = vld [vmem:[%s15586_s4] ss:$0 sm:$0xff] }
 0x581   : > { %v9302_v35 = vsel %vm958_vm2, %v9297_v58, %v9301_v30  ;;  %v9307_v0 = vshll.u32 %v9177_v62, 16 }
 0x583   : > { %v9309_v18 = vrot.slane %v9307_v0, 1 }
 0x585   : > { %v9310_v42 = vsel %vm958_vm2, %v9305_v27, %v9309_v18 }
 0x586   : > { %11426 = vmatmul.mubr.msk.bf16.gmra.mrb[8].mxu1 %vm5098_vm4, %v9230_v60 }
 0x587   : > { %11429 = vmatprep.mubr.msk.bf16.mxu1 %vm5098_vm4, %v9238_v37 }
 0x58e   : > { %11430 = vmatmul.mubr.msk.bf16.gmra.mrb[12].mxu1 %vm5098_vm4, %v9246_v40 }
 0x58f   : > { %11433 = vmatprep.mubr.msk.bf16.mxu1 %vm5098_vm4, %v9254_v23 }
 0x596   : > { %11434 = vmatmul.mubr.msk.bf16.gmra.mrb[16].mxu1 %vm5098_vm4, %v9262_v4 }
 0x597   : > { %11437 = vmatprep.mubr.msk.bf16.mxu1 %vm5098_vm4, %v9270_v11 }
 0x59e   : > { %11438 = vmatmul.mubr.msk.bf16.gmra.mrb[20].mxu1 %vm5098_vm4, %v9278_v16  ;;  %v10516_v16 = vld [vmem:[%s12457_s18 + $0x8] sm:$0xff]  }
 0x59f   : > { %11441 = vmatprep.mubr.msk.bf16.mxu1 %vm5098_vm4, %v9286_v12  ;;  %v10458_v30 = vunpack.c.l.bf16 %v10516_v16 }
 0x5a6   : > { %11442 = vmatmul.mubr.msk.bf16.gmra.mrb[24].mxu1 %vm5098_vm4, %v9294_v47 }
 0x5a7   : > { %11445 = vmatprep.mubr.msk.bf16.mxu1 %vm5098_vm4, %v9302_v35 }
 0x5ae   : > { %11446 = vmatmul.mubr.msk.bf16.gmra.mrb[28].mxu1 %vm5098_vm4, %v9310_v42 }
 0x649   : > { %v11419_v2 = vpop.f32.mrb[0].mxu1 }
 0x64a   : > { %v15322_v10 = vadd.f32 %v11419_v2, %v15319_v50  ;;  %v9396_v59 = vpop.f32.mrb[1].mxu1 }
 0x64b   : > { %v15325_v60 = vadd.f32 %v15319_v50, %v9396_v59  ;;  %v11420_v39 = vpop.f32.mrb[2].mxu1  ;;  %v10454_v59 = vunpack.c.l.bf16 %v10453_v31 }
 0x64c   : > { %v10418_v37 = vmul.f32 -1.442695, %v15322_v10  ;;  %v15329_v20 = vadd.f32 %v11420_v39, %v15319_v50  ;;  %v9399_v25 = vpop.f32.mrb[3].mxu1 }
 0x64d   : > { %v10416_v45 = vmul.f32 -1.442695, %v15325_v60  ;;  %v15333_v56 = vadd.f32 %v15319_v50, %v9399_v25 }
 0x64e   : > { %12139 = vpow2.f32 %v10418_v37  ;;  %v10419_v46 = vmul.f32 -1.442695, %v15329_v20 }
 0x64f   : > { %12141 = vpow2.f32 %v10416_v45  ;;  %v10417_v63 = vmul.f32 -1.442695, %v15333_v56 }
 0x650   : > { %12143 = vpow2.f32 %v10419_v46  ;;  %v10459_v46 = vunpack.c.h.bf16 %v10516_v16 }
 0x651   : > { %12145 = vpow2.f32 %v10417_v63  ;;  %v11423_v29 = vpop.f32.mrb[4].mxu1  ;;  %v15388_v63 = vld [vmem:[%s12457_s18 + $0x18] sm:$0xff]  }
 0x652   : > { %v15338_v36 = vadd.f32 %v11423_v29, %v15319_v50  ;;  %v9412_v5 = vpop.f32.mrb[5].mxu1 }
 0x653   : > { %v15341_v7 = vadd.f32 %v15319_v50, %v9412_v5  ;;  %v11424_v57 = vpop.f32.mrb[6].mxu1 }
 0x654   : > { %v10422_v40 = vmul.f32 -1.442695, %v15338_v36  ;;  %v15345_v15 = vadd.f32 %v11424_v57, %v15319_v50  ;;  %v9415_v23 = vpop.f32.mrb[7].mxu1 }
 0x655   : > { %v10420_v49 = vmul.f32 -1.442695, %v15341_v7  ;;  %v15349_v53 = vadd.f32 %v15319_v50, %v9415_v23 }
 0x656   : > { %12147 = vpow2.f32 %v10422_v40  ;;  %v10423_v52 = vmul.f32 -1.442695, %v15345_v15  ;;  %v10455_v40 = vunpack.c.h.bf16 %v10453_v31 }
 0x657   : > { %12149 = vpow2.f32 %v10420_v49  ;;  %v10421_v26 = vmul.f32 -1.442695, %v15349_v53 }
 0x658   : > { %v12140_v22 = vpop.eup %12139  ;;  %12151 = vpow2.f32 %v10423_v52 }
 0x659   : > { %v12142_v54 = vpop.eup %12141  ;;  %v9692_v21 = vadd.f32 1.0, %v12140_v22  ;;  %12153 = vpow2.f32 %v10421_v26  ;;  %v11427_v32 = vpop.f32.mrb[8].mxu1  ;;  %v15400_v26 = vld [vmem:[%s12457_s18 + $0x10] sm:$0xff]  }
 0x65a   : > { %v12144_v43 = vpop.eup %12143  ;;  %v9690_v48 = vadd.f32 1.0, %v12142_v54  ;;  %v15354_v8 = vadd.f32 %v11427_v32, %v15319_v50  ;;  %v9428_v3 = vpop.f32.mrb[9].mxu1  ;;  %v10466_v32 = vunpack.c.l.bf16 %v15388_v63 }
 0x65b   : > { %v12146_v4 = vpop.eup %12145  ;;  %12155 = vrcp.f32 %v9692_v21  ;;  %v9693_v11 = vadd.f32 1.0, %v12144_v43  ;;  %v15357_v24 = vadd.f32 %v15319_v50, %v9428_v3  ;;  %v11428_v38 = vpop.f32.mrb[10].mxu1 }
 0x65c   : > { %12157 = vrcp.f32 %v9690_v48  ;;  %v9691_v1 = vadd.f32 1.0, %v12146_v4  ;;  %v10426_v9 = vmul.f32 -1.442695, %v15354_v8  ;;  %v15361_v17 = vadd.f32 %v11428_v38, %v15319_v50  ;;  %v9431_v44 = vpop.f32.mrb[11].mxu1 }
 0x65d   : > { %12159 = vrcp.f32 %v9693_v11  ;;  %v10424_v34 = vmul.f32 -1.442695, %v15357_v24  ;;  %v15365_v14 = vadd.f32 %v15319_v50, %v9431_v44  ;;  %v10462_v38 = vunpack.c.l.bf16 %v15400_v26 }
 0x65e   : > { %12161 = vrcp.f32 %v9691_v1  ;;  %v10427_v55 = vmul.f32 -1.442695, %v15361_v17 }
 0x65f   : > { %12163 = vpow2.f32 %v10426_v9  ;;  %v10425_v61 = vmul.f32 -1.442695, %v15365_v14 }
 0x660   : > { %v12148_v6 = vpop.eup %12147  ;;  %12165 = vpow2.f32 %v10424_v34 }
 0x661   : > { %v12150_v12 = vpop.eup %12149  ;;  %v9696_v33 = vadd.f32 1.0, %v12148_v6  ;;  %12167 = vpow2.f32 %v10427_v55  ;;  %v11431_v28 = vpop.f32.mrb[12].mxu1 }
 0x662   : > { %v12152_v13 = vpop.eup %12151  ;;  %v9694_v41 = vadd.f32 1.0, %v12150_v12  ;;  %12169 = vpow2.f32 %v10425_v61  ;;  %v15372_v19 = vadd.f32 %v11431_v28, %v15319_v50  ;;  %v9444_v58 = vpop.f32.mrb[13].mxu1 }
 0x663   : > { %v12154_v62 = vpop.eup %12153  ;;  %12171 = vrcp.f32 %v9696_v33  ;;  %v9697_v47 = vadd.f32 1.0, %v12152_v13  ;;  %v15375_v35 = vadd.f32 %v15319_v50, %v9444_v58  ;;  %v11432_v51 = vpop.f32.mrb[14].mxu1  ;;  %v10467_v58 = vunpack.c.h.bf16 %v15388_v63 }
 0x664   : > { %12173 = vrcp.f32 %v9694_v41  ;;  %v9695_v0 = vadd.f32 1.0, %v12154_v62  ;;  %v10430_v27 = vmul.f32 -1.442695, %v15372_v19  ;;  %v15380_v18 = vadd.f32 %v11432_v51, %v15319_v50  ;;  %v9447_v42 = vpop.f32.mrb[15].mxu1  ;;  %v15430_v62 = vld [vmem:[%s12457_s18 + $0x28] sm:$0xff]  }
 0x665   : > { %v12156_v2 = vpop.eup %12155  ;;  %12175 = vrcp.f32 %v9697_v47  ;;  %v10428_v39 = vmul.f32 -1.442695, %v15375_v35  ;;  %v15384_v37 = vadd.f32 %v15319_v50, %v9447_v42 }
 0x666   : > { %v12158_v25 = vpop.eup %12157  ;;  %v9788_v45 = vmul.f32 %v12156_v2, %v15322_v10  ;;  %12177 = vrcp.f32 %v9695_v0  ;;  %v10431_v29 = vmul.f32 -1.442695, %v15380_v18  ;;  %v10463_v0 = vunpack.c.h.bf16 %v15400_v26 }
 0x667   : > { %v12160_v5 = vpop.eup %12159  ;;  %v9786_v57 = vmul.f32 %v12158_v25, %v15325_v60  ;;  %12179 = vpow2.f32 %v10430_v27  ;;  %v10429_v23 = vmul.f32 -1.442695, %v15384_v37 }
 0x668   : > { %v12162_v10 = vpop.eup %12161  ;;  %v9884_v49 = vadd.f32 %v10458_v30, %v9788_v45  ;;  %v9789_v52 = vmul.f32 %v12160_v5, %v15329_v20  ;;  %12181 = vpow2.f32 %v10428_v39  ;;  %v10474_v45 = vunpack.c.l.bf16 %v15430_v62 }
 0x669   : > { %v12164_v22 = vpop.eup %12163  ;;  %v9882_v54 = vadd.f32 %v10454_v59, %v9786_v57  ;;  %v9787_v21 = vmul.f32 %v12162_v10, %v15333_v56  ;;  %12183 = vpow2.f32 %v10431_v29  ;;  %v11435_v60 = vpop.f32.mrb[16].mxu1 }
 0x66a   : > { %v12166_v43 = vpop.eup %12165  ;;  %9916 = vst.msk [vmem:[%s15394_s27 + $0x10] sm:$0xff] %vm280_vm1, %v9884_v49  ;;  %v9885_v48 = vadd.f32 %v10459_v46, %v9789_v52  ;;  %v9700_v3 = vadd.f32 1.0, %v12164_v22  ;;  %12185 = vpow2.f32 %v10429_v23  ;;  %v15407_v20 = vadd.f32 %v11435_v60, %v15319_v50  ;;  %v9460_v4 = vpop.f32.mrb[17].mxu1 }
 0x66b   : > { %v12168_v11 = vpop.eup %12167  ;;  %9914 = vst.msk [vmem:[%s15394_s27] sm:$0xff] %vm280_vm1, %v9882_v54  ;;  %v9883_v56 = vadd.f32 %v10455_v40, %v9787_v21  ;;  %v9698_v1 = vadd.f32 1.0, %v12166_v43  ;;  %v15413_v9 = vadd.f32 %v15319_v50, %v9460_v4  ;;  %v11436_v44 = vpop.f32.mrb[18].mxu1  ;;  %v10519_v40 = vld [vmem:[%s12457_s18 + $0x20] sm:$0xff]  }
 0x66c   : > { %v12170_v34 = vpop.eup %12169  ;;  %9917 = vst.msk [vmem:[%s15394_s27 + $0x18] sm:$0xff] %vm280_vm1, %v9885_v48  ;;  %12187 = vrcp.f32 %v9700_v3  ;;  %v9701_v55 = vadd.f32 1.0, %v12168_v11  ;;  %v10434_v61 = vmul.f32 -1.442695, %v15407_v20  ;;  %v15419_v6 = vadd.f32 %v11436_v44, %v15319_v50  ;;  %v9463_v16 = vpop.f32.mrb[19].mxu1 }
 0x66d   : > { %v12172_v12 = vpop.eup %12171  ;;  %9915 = vst.msk [vmem:[%s15394_s27 + $0x8] sm:$0xff] %vm280_vm1, %v9883_v56  ;;  %12189 = vrcp.f32 %v9698_v1  ;;  %v9699_v33 = vadd.f32 1.0, %v12170_v34  ;;  %v10432_v28 = vmul.f32 -1.442695, %v15413_v9  ;;  %v15425_v13 = vadd.f32 %v15319_v50, %v9463_v16 }
 0x66e   : > { %v12174_v31 = vpop.eup %12173  ;;  %v9792_v41 = vmul.f32 %v12172_v12, %v15338_v36  ;;  %12191 = vrcp.f32 %v9701_v55  ;;  %v10435_v30 = vmul.f32 -1.442695, %v15419_v6  ;;  %v10470_v3 = vunpack.c.l.bf16 %v10519_v40 }
 0x66f   : > { %v12176_v47 = vpop.eup %12175  ;;  %v9790_v51 = vmul.f32 %v12174_v31, %v15341_v7  ;;  %12193 = vrcp.f32 %v9699_v33  ;;  %v10433_v27 = vmul.f32 -1.442695, %v15425_v13  ;;  %v10471_v55 = vunpack.c.h.bf16 %v10519_v40  ;;  %v10522_v33 = vld [vmem:[%s12457_s18 + $0x38] sm:$0xff]  }
 0x670   : > { %v12178_v42 = vpop.eup %12177  ;;  %v9888_v2 = vadd.f32 %v10466_v32, %v9792_v41  ;;  %v9793_v36 = vmul.f32 %v12176_v47, %v15345_v15  ;;  %12195 = vpow2.f32 %v10434_v61  ;;  %v10521_v47 = vld [vmem:[%s12457_s18 + $0x30] sm:$0xff]   ;;  %v10483_v40 = vunpack.c.h.bf16 %v10522_v33 }
 0x671   : > { %v12180_v59 = vpop.eup %12179  ;;  %v9886_v39 = vadd.f32 %v10462_v38, %v9790_v51  ;;  %v9791_v25 = vmul.f32 %v12178_v42, %v15349_v53  ;;  %12197 = vpow2.f32 %v10432_v28  ;;  %v11439_v7 = vpop.f32.mrb[20].mxu1  ;;  %v10475_v38 = vunpack.c.h.bf16 %v15430_v62 }
 0x672   : > { %v12182_v46 = vpop.eup %12181  ;;  %9920 = vst.msk [vmem:[%s15394_s27 + $0x30] sm:$0xff] %vm280_vm1, %v9888_v2  ;;  %v9889_v63 = vadd.f32 %v10467_v58, %v9793_v36  ;;  %v9704_v29 = vadd.f32 1.0, %v12180_v59  ;;  %12199 = vpow2.f32 %v10435_v30  ;;  %v15442_v15 = vadd.f32 %v11439_v7, %v15319_v50  ;;  %v9476_v5 = vpop.f32.mrb[21].mxu1 }
 0x673   : > { %v12184_v57 = vpop.eup %12183  ;;  %9918 = vst.msk [vmem:[%s15394_s27 + $0x20] sm:$0xff] %vm280_vm1, %v9886_v39  ;;  %v9887_v53 = vadd.f32 %v10463_v0, %v9791_v25  ;;  %v9702_v23 = vadd.f32 1.0, %v12182_v46  ;;  %12201 = vpow2.f32 %v10433_v27  ;;  %v15448_v10 = vadd.f32 %v15319_v50, %v9476_v5  ;;  %v11440_v49 = vpop.f32.mrb[22].mxu1 }
 0x674   : > { %v12186_v52 = vpop.eup %12185  ;;  %9921 = vst.msk [vmem:[%s15394_s27 + $0x38] sm:$0xff] %vm280_vm1, %v9889_v63  ;;  %12203 = vrcp.f32 %v9704_v29  ;;  %v9705_v26 = vadd.f32 1.0, %v12184_v57  ;;  %v10438_v22 = vmul.f32 -1.442695, %v15442_v15  ;;  %v15454_v54 = vadd.f32 %v11440_v49, %v15319_v50  ;;  %v9479_v21 = vpop.f32.mrb[23].mxu1 }
 0x675   : > { %9919 = vst.msk [vmem:[%s15394_s27 + $0x28] sm:$0xff] %vm280_vm1, %v9887_v53  ;;  %12205 = vrcp.f32 %v9702_v23  ;;  %v9703_v32 = vadd.f32 1.0, %v12186_v52  ;;  %v10436_v60 = vmul.f32 -1.442695, %v15448_v10  ;;  %v15460_v43 = vadd.f32 %v15319_v50, %v9479_v21 }
 0x676   : > { %v12188_v48 = vpop.eup %12187  ;;  %12207 = vrcp.f32 %v9705_v26  ;;  %v10439_v4 = vmul.f32 -1.442695, %v15454_v54  ;;  %v10482_v42 = vunpack.c.l.bf16 %v10522_v33  ;;  %v10478_v63 = vunpack.c.l.bf16 %v10521_v47 }
 0x677   : > { %v12190_v11 = vpop.eup %12189  ;;  %v9796_v56 = vmul.f32 %v12188_v48, %v15354_v8  ;;  %12209 = vrcp.f32 %v9703_v32  ;;  %v10437_v1 = vmul.f32 -1.442695, %v15460_v43  ;;  %v10479_v26 = vunpack.c.h.bf16 %v10521_v47  ;;  %v10524_v48 = vld [vmem:[%s12457_s18 + $0x48] sm:$0xff]  }
 0x678   : > { %v12192_v44 = vpop.eup %12191  ;;  %v9794_v34 = vmul.f32 %v12190_v11, %v15357_v24  ;;  %12211 = vpow2.f32 %v10438_v22 }
 0x679   : > { %v12194_v61 = vpop.eup %12193  ;;  %v9892_v16 = vadd.f32 %v10474_v45, %v9796_v56  ;;  %v9797_v12 = vmul.f32 %v12192_v44, %v15361_v17  ;;  %12213 = vpow2.f32 %v10436_v60  ;;  %v11443_v28 = vpop.f32.mrb[24].mxu1 }
 0x67a   : > { %v12196_v8 = vpop.eup %12195  ;;  %v9890_v31 = vadd.f32 %v10470_v3, %v9794_v34  ;;  %v9795_v41 = vmul.f32 %v12194_v61, %v15365_v14  ;;  %12215 = vpow2.f32 %v10439_v4  ;;  %v15471_v58 = vadd.f32 %v11443_v28, %v15319_v50  ;;  %v9492_v24 = vpop.f32.mrb[25].mxu1 }
 0x67b   : > { %v12198_v62 = vpop.eup %12197  ;;  %9924 = vst.msk [vmem:[%s15394_s27 + $0x50] sm:$0xff] %vm280_vm1, %v9892_v16  ;;  %v9893_v30 = vadd.f32 %v10475_v38, %v9797_v12  ;;  %v9708_v17 = vadd.f32 1.0, %v12196_v8  ;;  %12217 = vpow2.f32 %v10437_v1  ;;  %v15477_v51 = vadd.f32 %v15319_v50, %v9492_v24  ;;  %v11444_v0 = vpop.f32.mrb[26].mxu1  ;;  %v10523_v16 = vld [vmem:[%s12457_s18 + $0x40] sm:$0xff]  }
 0x67c   : > { %v12200_v27 = vpop.eup %12199  ;;  %9922 = vst.msk [vmem:[%s15394_s27 + $0x40] sm:$0xff] %vm280_vm1, %v9890_v31  ;;  %v9891_v14 = vadd.f32 %v10471_v55, %v9795_v41  ;;  %v9706_v2 = vadd.f32 1.0, %v12198_v62  ;;  %v15482_v36 = vadd.f32 %v11444_v0, %v15319_v50  ;;  %v9495_v59 = vpop.f32.mrb[27].mxu1  ;;  %v10442_v45 = vmul.f32 -1.442695, %v15471_v58 }
 0x67d   : > { %v12202_v39 = vpop.eup %12201  ;;  %9925 = vst.msk [vmem:[%s15394_s27 + $0x58] sm:$0xff] %vm280_vm1, %v9893_v30  ;;  %12219 = vrcp.f32 %v9708_v17  ;;  %v9709_v25 = vadd.f32 1.0, %v12200_v27  ;;  %v15488_v7 = vadd.f32 %v15319_v50, %v9495_v59  ;;  %v10440_v5 = vmul.f32 -1.442695, %v15477_v51 }
 0x67e   : > { %v12204_v46 = vpop.eup %12203  ;;  %9923 = vst.msk [vmem:[%s15394_s27 + $0x48] sm:$0xff] %vm280_vm1, %v9891_v14  ;;  %12221 = vrcp.f32 %v9706_v2  ;;  %v9707_v29 = vadd.f32 1.0, %v12202_v39  ;;  %v10443_v23 = vmul.f32 -1.442695, %v15482_v36  ;;  %v10490_v61 = vunpack.c.l.bf16 %v10524_v48 }
 0x67f   : > { %v12206_v57 = vpop.eup %12205  ;;  %v9800_v53 = vmul.f32 %v12204_v46, %v15372_v19  ;;  %12223 = vrcp.f32 %v9709_v25  ;;  %v10441_v22 = vmul.f32 -1.442695, %v15488_v7  ;;  %v10486_v17 = vunpack.c.l.bf16 %v10523_v16 }
 0x680   : > { %v12208_v49 = vpop.eup %12207  ;;  %v9798_v52 = vmul.f32 %v12206_v57, %v15375_v35  ;;  %12225 = vrcp.f32 %v9707_v29 }
 0x681   : > { %v12210_v21 = vpop.eup %12209  ;;  %v9896_v32 = vadd.f32 %v10482_v42, %v9800_v53  ;;  %v9801_v60 = vmul.f32 %v12208_v49, %v15380_v18  ;;  %12227 = vpow2.f32 %v10442_v45  ;;  %v11447_v19 = vpop.f32.mrb[28].mxu1  ;;  %v10491_v42 = vunpack.c.h.bf16 %v10524_v48  ;;  %v10525_v53 = vld [vmem:[%s12457_s18 + $0x50] sm:$0xff]  }
 0x682   : > { %v12212_v3 = vpop.eup %12211  ;;  %v9894_v4 = vadd.f32 %v10478_v63, %v9798_v52  ;;  %v9799_v11 = vmul.f32 %v12210_v21, %v15384_v37  ;;  %12229 = vpow2.f32 %v10440_v5  ;;  %v15501_v35 = vadd.f32 %v11447_v19, %v15319_v50  ;;  %v9508_v56 = vpop.f32.mrb[29].mxu1  ;;  %v10526_v5 = vld [vmem:[%s12457_s18 + $0x58] sm:$0xff]  }
 0x683   : > { %v12214_v38 = vpop.eup %12213  ;;  %9928 = vst.msk [vmem:[%s15394_s27 + $0x70] sm:$0xff] %vm280_vm1, %v9896_v32  ;;  %v9897_v1 = vadd.f32 %v10483_v40, %v9801_v60  ;;  %v9712_v18 = vadd.f32 1.0, %v12212_v3  ;;  %12231 = vpow2.f32 %v10443_v23  ;;  %v15506_v44 = vadd.f32 %v15319_v50, %v9508_v56  ;;  %v11448_v34 = vpop.f32.mrb[30].mxu1 }
 0x684   : > { %v12216_v55 = vpop.eup %12215  ;;  %9926 = vst.msk [vmem:[%s15394_s27 + $0x60] sm:$0xff] %vm280_vm1, %v9894_v4  ;;  %v9895_v37 = vadd.f32 %v10479_v26, %v9799_v11  ;;  %v9710_v12 = vadd.f32 1.0, %v12214_v38  ;;  %12233 = vpow2.f32 %v10441_v22  ;;  %v9511_v33 = vpop.f32.mrb[31].mxu1  ;;  %v10446_v31 = vmul.f32 -1.442695, %v15501_v35 }
 0x685   : > { %v12218_v28 = vpop.eup %12217  ;;  %9929 = vst.msk [vmem:[%s15394_s27 + $0x78] sm:$0xff] %vm280_vm1, %v9897_v1  ;;  %12235 = vrcp.f32 %v9712_v18  ;;  %v9713_v8 = vadd.f32 1.0, %v12216_v55  ;;  %v15515_v41 = vadd.f32 %v11448_v34, %v15319_v50  ;;  %v10444_v62 = vmul.f32 -1.442695, %v15506_v44 }
 0x686   : > { %9927 = vst.msk [vmem:[%s15394_s27 + $0x68] sm:$0xff] %vm280_vm1, %v9895_v37  ;;  %12237 = vrcp.f32 %v9710_v12  ;;  %v9711_v24 = vadd.f32 1.0, %v12218_v28  ;;  %v15521_v30 = vadd.f32 %v15319_v50, %v9511_v33  ;;  %v10487_v50 = vunpack.c.h.bf16 %v10523_v16  ;;  %v10527_v33 = vld [vmem:[%s12457_s18 + $0x60] sm:$0xff]  }
 0x687   : > { %v12220_v47 = vpop.eup %12219  ;;  %12239 = vrcp.f32 %v9713_v8  ;;  %v10447_v0 = vmul.f32 -1.442695, %v15515_v41  ;;  %v10498_v26 = vunpack.c.l.bf16 %v10526_v5  ;;  %v10494_v21 = vunpack.c.l.bf16 %v10525_v53 }
 0x688   : > { %v12222_v27 = vpop.eup %12221  ;;  %v9804_v14 = vmul.f32 %v12220_v47, %v15407_v20  ;;  %12241 = vrcp.f32 %v9711_v24  ;;  %v10445_v2 = vmul.f32 -1.442695, %v15521_v30  ;;  %v10499_v19 = vunpack.c.h.bf16 %v10526_v5 }
 0x689   : > { %v12224_v59 = vpop.eup %12223  ;;  %v9802_v39 = vmul.f32 %v12222_v27, %v15413_v9  ;;  %12243 = vpow2.f32 %v10446_v31  ;;  %v10495_v11 = vunpack.c.h.bf16 %v10525_v53 }
 0x68a   : > { %v12226_v25 = vpop.eup %12225  ;;  %v9900_v45 = vadd.f32 %v10490_v61, %v9804_v14  ;;  %v9805_v46 = vmul.f32 %v12224_v59, %v15419_v6  ;;  %12245 = vpow2.f32 %v10444_v62  ;;  %v10528_v61 = vld [vmem:[%s12457_s18 + $0x68] sm:$0xff]   ;;  %v10502_v62 = vunpack.c.l.bf16 %v10527_v33 }
 0x68b   : > { %v12228_v63 = vpop.eup %12227  ;;  %v9898_v20 = vadd.f32 %v10486_v17, %v9802_v39  ;;  %v9803_v29 = vmul.f32 %v12226_v25, %v15425_v13  ;;  %12247 = vpow2.f32 %v10447_v0  ;;  %v10507_v0 = vunpack.c.h.bf16 %v10528_v61 }
 0x68c   : > { %v12230_v57 = vpop.eup %12229  ;;  %9932 = vst.msk [vmem:[%s15394_s27 + $0x90] sm:$0xff] %vm280_vm1, %v9900_v45  ;;  %v9901_v9 = vadd.f32 %v10491_v42, %v9805_v46  ;;  %v9716_v40 = vadd.f32 1.0, %v12228_v63  ;;  %12249 = vpow2.f32 %v10445_v2  ;;  %v10503_v42 = vunpack.c.h.bf16 %v10527_v33  ;;  %v10530_v45 = vld [vmem:[%s12457_s18 + $0x78] sm:$0xff]  }
 0x68d   : > { %v12232_v23 = vpop.eup %12231  ;;  %9930 = vst.msk [vmem:[%s15394_s27 + $0x80] sm:$0xff] %vm280_vm1, %v9898_v20  ;;  %v9899_v6 = vadd.f32 %v10487_v50, %v9803_v29  ;;  %v9714_v49 = vadd.f32 1.0, %v12230_v57  ;;  %v10515_v5 = vunpack.c.h.bf16 %v10530_v45 }
 0x68e   : > { %v12234_v52 = vpop.eup %12233  ;;  %9933 = vst.msk [vmem:[%s15394_s27 + $0x98] sm:$0xff] %vm280_vm1, %v9901_v9  ;;  %12251 = vrcp.f32 %v9716_v40  ;;  %v9717_v13 = vadd.f32 1.0, %v12232_v23 }
 0x68f   : > { %v12236_v22 = vpop.eup %12235  ;;  %9931 = vst.msk [vmem:[%s15394_s27 + $0x88] sm:$0xff] %vm280_vm1, %v9899_v6  ;;  %12253 = vrcp.f32 %v9714_v49  ;;  %v9715_v32 = vadd.f32 1.0, %v12234_v52 }
 0x690   : > { %v12238_v60 = vpop.eup %12237  ;;  %v9808_v48 = vmul.f32 %v12236_v22, %v15442_v15  ;;  %12255 = vrcp.f32 %v9717_v13 }
 0x691   : > { %v12240_v3 = vpop.eup %12239  ;;  %v9806_v4 = vmul.f32 %v12238_v60, %v15448_v10  ;;  %12257 = vrcp.f32 %v9715_v32 }
 0x692   : > { %v12242_v56 = vpop.eup %12241  ;;  %v9904_v38 = vadd.f32 %v10498_v26, %v9808_v48  ;;  %v9809_v1 = vmul.f32 %v12240_v3, %v15454_v54 }
 0x693   : > { %v12244_v18 = vpop.eup %12243  ;;  %v9902_v34 = vadd.f32 %v10494_v21, %v9806_v4  ;;  %v9807_v15 = vmul.f32 %v12242_v56, %v15460_v43  ;;  %v10506_v43 = vunpack.c.l.bf16 %v10528_v61 }
 0x694   : > { %v12246_v55 = vpop.eup %12245  ;;  %9936 = vst.msk [vmem:[%s15394_s27 + $0xb0] sm:$0xff] %vm280_vm1, %v9904_v38  ;;  %v9905_v37 = vadd.f32 %v10499_v19, %v9809_v1  ;;  %v9720_v16 = vadd.f32 1.0, %v12244_v18 }
 0x695   : > { %v12248_v10 = vpop.eup %12247  ;;  %9934 = vst.msk [vmem:[%s15394_s27 + $0xa0] sm:$0xff] %vm280_vm1, %v9902_v34  ;;  %v9903_v12 = vadd.f32 %v10495_v11, %v9807_v15  ;;  %v9718_v28 = vadd.f32 1.0, %v12246_v55 }
 0x696   : > { %v12250_v8 = vpop.eup %12249  ;;  %9937 = vst.msk [vmem:[%s15394_s27 + $0xb8] sm:$0xff] %vm280_vm1, %v9905_v37  ;;  %12259 = vrcp.f32 %v9720_v16  ;;  %v9721_v54 = vadd.f32 1.0, %v12248_v10 }
 0x697   : > { %9935 = vst.msk [vmem:[%s15394_s27 + $0xa8] sm:$0xff] %vm280_vm1, %v9903_v12  ;;  %12261 = vrcp.f32 %v9718_v28  ;;  %v9719_v31 = vadd.f32 1.0, %v12250_v8 }
 0x698   : > { %v12252_v24 = vpop.eup %12251  ;;  %12263 = vrcp.f32 %v9721_v54 }
 0x699   : > { %v12254_v47 = vpop.eup %12253  ;;  %v9812_v17 = vmul.f32 %v12252_v24, %v15471_v58  ;;  %12265 = vrcp.f32 %v9719_v31  ;;  %v10529_v58 = vld [vmem:[%s12457_s18 + $0x70] sm:$0xff]  }
 0x69a   : > { %v12256_v27 = vpop.eup %12255  ;;  %v9810_v14 = vmul.f32 %v12254_v47, %v15477_v51  ;;  %v10514_v51 = vunpack.c.l.bf16 %v10530_v45  ;;  %v10511_v53 = vunpack.c.h.bf16 %v10529_v58 }
 0x69b   : > { %v12258_v2 = vpop.eup %12257  ;;  %v9908_v59 = vadd.f32 %v10506_v43, %v9812_v17  ;;  %v9813_v39 = vmul.f32 %v12256_v27, %v15482_v36  ;;  %v10510_v36 = vunpack.c.l.bf16 %v10529_v58 }
 0x69c   : > { %v9906_v50 = vadd.f32 %v10502_v62, %v9810_v14  ;;  %v9811_v25 = vmul.f32 %v12258_v2, %v15488_v7 }
 0x69d   : > { %9940 = vst.msk [vmem:[%s15394_s27 + $0xd0] sm:$0xff] %vm280_vm1, %v9908_v59  ;;  %v9909_v46 = vadd.f32 %v10507_v0, %v9813_v39 }
 0x69e   : > { %9938 = vst.msk [vmem:[%s15394_s27 + $0xc0] sm:$0xff] %vm280_vm1, %v9906_v50  ;;  %v9907_v63 = vadd.f32 %v10503_v42, %v9811_v25 }
 0x69f   : > { %9941 = vst.msk [vmem:[%s15394_s27 + $0xd8] sm:$0xff] %vm280_vm1, %v9909_v46 }
 0x6a0   : > { %v12260_v20 = vpop.eup %12259  ;;  %9939 = vst.msk [vmem:[%s15394_s27 + $0xc8] sm:$0xff] %vm280_vm1, %v9907_v63 }
 0x6a1   : > { %v12262_v29 = vpop.eup %12261  ;;  %v9816_v7 = vmul.f32 %v12260_v20, %v15501_v35 }
 0x6a2   : > { %v12264_v57 = vpop.eup %12263  ;;  %v9814_v9 = vmul.f32 %v12262_v29, %v15506_v44 }
 0x6a3   : > { %v12266_v40 = vpop.eup %12265  ;;  %v9912_v23 = vadd.f32 %v10514_v51, %v9816_v7  ;;  %v9817_v6 = vmul.f32 %v12264_v57, %v15515_v41 }
 0x6a4   : > { %v9910_v49 = vadd.f32 %v10510_v36, %v9814_v9  ;;  %v9815_v52 = vmul.f32 %v12266_v40, %v15521_v30 }
 0x6a5   : > { %9944 = vst.msk [vmem:[%s15394_s27 + $0xf0] sm:$0xff] %vm280_vm1, %v9912_v23  ;;  %v9913_v26 = vadd.f32 %v10515_v5, %v9817_v6 }
 0x6a6   : > { %9942 = vst.msk [vmem:[%s15394_s27 + $0xe0] sm:$0xff] %vm280_vm1, %v9910_v49  ;;  %v9911_v13 = vadd.f32 %v10511_v53, %v9815_v52 }
 0x6a7   : > { %9945 = vst.msk [vmem:[%s15394_s27 + $0xf8] sm:$0xff] %vm280_vm1, %v9913_v26 }
 0x6a8   : > { %9943 = vst.msk [vmem:[%s15394_s27 + $0xe8] sm:$0xff] %vm280_vm1, %v9911_v13 }
 0x6a9 PF: > { %s17_s24 = sadd.s32 1, %s12296_s24  }
 0x6aa   : > { %p14_p4 = scmp.ge.s32.totalorder %s17_s24, 4  }
 0x6ac   :  { %16 = sbr.rel (!%p14_p4) target bundleno = 1 (0x1), region = 78 }

</bundles_post_ra>
